<compile_context>
chip_gen: v7x
topology: tpu7x:2x2x1
jax: 0.10.0
libtpu: 0.0.40
codegen_flags: <defaults>
</compile_context>

<pallas_src>
import jax
import jax.numpy as jnp
import numpy as np
from jax.experimental import pallas as pl
from jax.experimental.pallas import tpu as pltpu


# --------------------------------------------------------------------- layout
def _mlp_layout(in0, widths, out_dim):
    """Column layout of the packed (feature-major) MLP/classifier slab.

    Per hidden layer the slab holds [W (in_dim cols) | b | bn_scale | bn_shift];
    the classifier holds [Wc | bc].  Rows are zero-padded to max_rows.
    Returns (hidden_layers, classifier, total_cols, max_rows); each hidden entry
    is (width, in_dim, w_col, b_col, scale_col, shift_col); the classifier entry
    is (out_dim, in_dim, w_col, b_col).
    """
    layers = []
    col = 0
    in_dim = in0
    for w in widths:
        layers.append((w, in_dim, col, col + in_dim, col + in_dim + 1,
                       col + in_dim + 2))
        col += in_dim + 3
        in_dim = w
    cls = (out_dim, in_dim, col, col + in_dim)
    total_cols = col + in_dim + 1
    max_rows = max(list(widths) + [out_dim])
    return layers, cls, total_cols, max_rows


# --------------------------------------------------------------------- kernel
def make_fused_kernel(hidden_layers, classifier, mxu_min_k=32):
    """2-layer unidirectional LSTM (last step) + MLP + SiLU + classifier.

    Everything is feature-major ([features, batch]); batch rides the lane axis.
    """

    def kernel(seq_ref, stat_ref, lstm_ref, mlp_ref, out_ref):
        f32 = jnp.float32
        T, E = seq_ref.shape[0], seq_ref.shape[1]
        F_static = stat_ref.shape[0]
        G = lstm_ref.shape[0]            # 4*H
        H = G // 4
        B = out_ref.shape[1]             # batch tile (lanes)

        def bcols(w, n):
            # lane-broadcasts of weight columns ([rows,1] -> [rows,B]).  JAX
            # does not CSE broadcast_in_dim, so these are built once, outside
            # the recurrence, and reused.
            return [jnp.broadcast_to(w[:, j:j + 1], (w.shape[0], B))
                    for j in range(n)]

        def bmac(wcols, x):
            # feature-major mat-vec as VPU broadcast-MACs: sum_j W[:,j] * x[j,:]
            acc = wcols[0] * x[0:1, :]
            for j in range(1, len(wcols)):
                acc = acc + wcols[j] * x[j:j + 1, :]
            return acc

        def matmul(w, x):
            # keep tiny-K contractions off the MXU (push + result-FIFO latency
            # for <2% utilization); only K >= mxu_min_k goes to jnp.dot.
            k = w.shape[1]
            if k >= mxu_min_k:
                return jnp.dot(w, x, preferred_element_type=f32)
            return bmac(bcols(w, k), x)

        # ---- unpack LSTM slab (candidate-gate rows 2H:3H pre-scaled by 2) ----
        lstm = lstm_ref[...]
        wih0 = lstm[:, 0:E]
        whh0 = lstm[:, E:E + H]
        b0 = lstm[:, E + H:E + H + 1]
        wih1 = lstm[:, E + H + 1:E + 2 * H + 1]
        whh1 = lstm[:, E + 2 * H + 1:E + 3 * H + 1]
        b1 = lstm[:, E + 3 * H + 1:E + 3 * H + 2]

        wih0_b = bcols(wih0, E)          # loop-invariant broadcasts, hoisted
        whh0_b = bcols(whh0, H)
        wih1_b = bcols(wih1, H)
        whh1_b = bcols(whh1, H)
        b0_b = jnp.broadcast_to(b0, (G, B))
        b1_b = jnp.broadcast_to(b1, (G, B))

        # layer-0 input projections are time-parallel -> off the serial chain.
        xw0 = [b0_b + bmac(wih0_b, seq_ref[t]) for t in range(T)]

        def cell(g, c):
            # one tanh covers sigmoid(i,f,o) = 0.5*tanh(0.5*)+0.5 and
            # tanh(g_cand) (candidate rows were pre-scaled by 2): 2 EUP ops.
            tq = jnp.tanh(0.5 * g)                       # [4H, B]
            i = 0.5 * tq[0:H, :] + 0.5
            f = 0.5 * tq[H:2 * H, :] + 0.5
            gc = tq[2 * H:3 * H, :]
            o = 0.5 * tq[3 * H:4 * H, :] + 0.5
            c2 = f * c + i * gc
            return o * jnp.tanh(c2), c2

        zeros = jnp.zeros((H, B), f32)
        h0 = c0 = h1 = c1 = zeros
        # stacked stepping: layer 1 consumes h0_t immediately; no [T*B,H]
        # intermediate, no concat, and the two cells' chains overlap.
        # TODO(synk): switch to lax.fori_loop carrying (h0,c0,h1,c1) if T grows
        # beyond ~16 to bound vreg live ranges.
        for t in range(T):
            h0, c0 = cell(xw0[t] + bmac(whh0_b, h0), c0)
            h1, c1 = cell(b1_b + bmac(wih1_b, h0) + bmac(whh1_b, h1), c1)
        lstm_feat = h1                                   # [H,B] == lstm_out[:,-1,:]^T

        # ---- MLP (feature-major); first Linear split static|lstm, no concat --
        mlp = mlp_ref[...]
        stat = stat_ref[...]                             # [F_static, B]

        (w, in_dim, wc, bc, scc, shc) = hidden_layers[0]
        w0 = mlp[0:w, wc:wc + in_dim]
        y = (matmul(w0[:, :F_static], stat)
             + matmul(w0[:, F_static:], lstm_feat)
             + mlp[0:w, bc:bc + 1])
        y = jnp.maximum(y, 0.0) * mlp[0:w, scc:scc + 1] + mlp[0:w, shc:shc + 1]

        for (w, in_dim, wc, bc, scc, shc) in hidden_layers[1:]:
            y = matmul(mlp[0:w, wc:wc + in_dim], y) + mlp[0:w, bc:bc + 1]
            y = (jnp.maximum(y, 0.0) * mlp[0:w, scc:scc + 1]
                 + mlp[0:w, shc:shc + 1])

        # ---- SiLU + classifier, single lane-dense store ----
        y = y * (0.5 * jnp.tanh(0.5 * y) + 0.5)          # sigmoid(y)*y, 1 EUP op
        (od, in_dim, wc, bc) = classifier
        out_ref[...] = matmul(mlp[0:od, wc:wc + in_dim], y) + mlp[0:od, bc:bc + 1]

    return kernel


# -------------------------------------------------------------------- wrapper
def fused_forward_pallas(seq_fm, static_fm, lstm_p, mlp, cls_w_t, cls_b):
    """seq_fm: [T, E, B] embedded sequence; static_fm: [F_static, B]."""
    T, E, B = seq_fm.shape
    F_static = static_fm.shape[0]
    H = lstm_p['whh0_t'].shape[0]
    G = 4 * H
    widths = [w_t.shape[1] for (w_t, _, _, _) in mlp]
    out_dim = cls_w_t.shape[1]

    # ---- pack LSTM params into one feature-major [4H, E+3H+2] slab; pre-scale
    #      the candidate-gate rows (2H:3H) by 2 for the single-tanh cell.
    lstm_slab = jnp.concatenate(
        [lstm_p['wih0_t'].T, lstm_p['whh0_t'].T, lstm_p['b0'].T,
         lstm_p['wih1_t'].T, lstm_p['whh1_t'].T, lstm_p['b1'].T], axis=1)
    gate_scale = jnp.concatenate(
        [jnp.ones((2 * H, 1)), jnp.full((H, 1), 2.0), jnp.ones((H, 1))],
        axis=0).astype(jnp.float32)
    lstm_slab = (lstm_slab * gate_scale).astype(jnp.float32)

    # ---- pack MLP + classifier into one zero-padded feature-major slab ----
    hidden_layers, classifier, total_cols, max_rows = _mlp_layout(
        F_static + H, widths, out_dim)
    slab = jnp.zeros((max_rows, total_cols), jnp.float32)
    for (w_t, b, sc, sh), (w, in_dim, wc, bc, scc, shc) in zip(mlp, hidden_layers):
        slab = slab.at[0:w, wc:wc + in_dim].set(w_t.T)
        slab = slab.at[0:w, bc:bc + 1].set(b.T)
        slab = slab.at[0:w, scc:scc + 1].set(sc.T)
        slab = slab.at[0:w, shc:shc + 1].set(sh.T)
    (od, cin, cwc, cbc) = classifier
    slab = slab.at[0:od, cwc:cwc + cin].set(cls_w_t.T)
    slab = slab.at[0:od, cbc:cbc + 1].set(cls_b.T)

    # ---- batch tile on the lane axis: multiples of 128 when possible ----
    tile_b = B
    for cand in (512, 256, 128):
        if B % cand == 0:
            tile_b = cand
            break
    grid = (B // tile_b,)

    out_fm = pl.pallas_call(
        make_fused_kernel(hidden_layers, classifier),
        out_shape=jax.ShapeDtypeStruct((out_dim, B), jnp.float32),
        grid_spec=pltpu.PrefetchScalarGridSpec(
            num_scalar_prefetch=0,
            grid=grid,
            in_specs=[
                pl.BlockSpec((T, E, tile_b), lambda i: (0, 0, i)),
                pl.BlockSpec((F_static, tile_b), lambda i: (0, i)),
                pl.BlockSpec((G, E + 3 * H + 2), lambda i: (0, 0)),
                pl.BlockSpec((max_rows, total_cols), lambda i: (0, 0)),
            ],
            out_specs=pl.BlockSpec((out_dim, tile_b), lambda i: (0, i)),
        ),
        compiler_params=pltpu.CompilerParams(
            dimension_semantics=("parallel",),
            vmem_limit_bytes=32 * 1024 * 1024),
    )(seq_fm.astype(jnp.float32), static_fm.astype(jnp.float32),
      lstm_slab, slab)
    return out_fm.T                                       # back to [B, out_dim]


# ------------------------------------------------ pure-JAX reference (validation)
def lstm_reference(seq_tm, p):
    T, B, _ = seq_tm.shape
    H = p['whh0_t'].shape[0]

    def run(inputs, wih_t, whh_t, b):
        h = jnp.zeros((B, H), jnp.float32)
        c = jnp.zeros((B, H), jnp.float32)
        outs = []
        for t in range(T):
            g = inputs[t] @ wih_t + h @ whh_t + b
            i = jax.nn.sigmoid(g[:, :H]); f = jax.nn.sigmoid(g[:, H:2 * H])
            gc = jnp.tanh(g[:, 2 * H:3 * H]); o = jax.nn.sigmoid(g[:, 3 * H:])
            c = f * c + i * gc
            h = o * jnp.tanh(c)
            outs.append(h)
        return jnp.stack(outs)

    o0 = run(seq_tm, p['wih0_t'], p['whh0_t'], p['b0'])
    o1 = run(o0, p['wih1_t'], p['whh1_t'], p['b1'])
    return o1[-1]


# --------------------------------------------------------------------- params
def init_params(key, embedding_size, num_numerical_cols, output_size, layers,
                vocab_diag=832, hidden_dim=2, z_dim=4):
    keys = iter(jax.random.split(key, 64))

    def nrm(shape, s=0.2):
        return jax.random.normal(next(keys), shape, jnp.float32) * s

    eps = 1e-5
    p = {}
    p['emb_tables'] = [nrm((ni, nf), 1.0) for ni, nf in embedding_size]
    p['rxdx_embedding'] = nrm((vocab_diag, hidden_dim), 1.0)

    H = z_dim
    p['lstm'] = {
        # batch-major weights [in_features, 4H]; b = b_ih + b_hh folded
        'wih0_t': nrm((hidden_dim, 4 * H), 0.3),
        'whh0_t': nrm((H, 4 * H), 0.3),
        'b0':     nrm((1, 4 * H), 0.3),
        'wih1_t': nrm((H, 4 * H), 0.3),
        'whh1_t': nrm((H, 4 * H), 0.3),
        'b1':     nrm((1, 4 * H), 0.3),
    }

    # BatchNorm1d(num_numerical_cols), eval mode, fresh running stats
    p['bn_num'] = dict(gamma=jnp.ones((1, num_numerical_cols), jnp.float32),
                       beta=jnp.zeros((1, num_numerical_cols), jnp.float32),
                       rm=jnp.zeros((1, num_numerical_cols), jnp.float32),
                       rv=jnp.ones((1, num_numerical_cols), jnp.float32))

    num_cat = sum(nf for _, nf in embedding_size)
    in_dim = num_cat + num_numerical_cols + z_dim
    mlp = []
    for width in layers:
        w_t = nrm((in_dim, width), 0.2)
        b = nrm((1, width), 0.2)
        # eval BN folded: scale = gamma/sqrt(rv+eps), shift = beta - rm*scale
        # (must use real running stats when loading a trained checkpoint)
        scale = jnp.full((1, width), 1.0 / np.sqrt(1.0 + eps), jnp.float32)
        shift = jnp.zeros((1, width), jnp.float32)
        mlp.append((w_t, b, scale, shift))
        in_dim = width
    p['mlp'] = mlp
    p['cls_w_t'] = nrm((in_dim, output_size), 0.2)
    p['cls_b'] = nrm((1, output_size), 0.2)
    return p


# -------------------------------------------------------------------- forward
def forward(params, x, use_pallas=True):
    x_cat = x[:, :2].astype(jnp.int32)
    x_num = x[:, 2:3]
    seqs = x[:, 3:].astype(jnp.int32)

    # plain-JAX glue: embedding gathers + eval-mode BN on the numeric column.
    embeds = jnp.concatenate(
        [tbl[x_cat[:, i]] for i, tbl in enumerate(params['emb_tables'])], axis=1)
    bn = params['bn_num']
    x_num = (x_num - bn['rm']) / jnp.sqrt(bn['rv'] + 1e-5) * bn['gamma'] + bn['beta']
    static_feats = jnp.concatenate([embeds, x_num], axis=1).astype(jnp.float32)
    # TODO(synk): embedding_dropout / per-layer Dropout are identity (eval mode);
    # the noise=True Gaussian-ensemble branch is not implemented.

    seq_bm = params['rxdx_embedding'][seqs]               # [B, T, E]

    if use_pallas:
        seq_fm = jnp.transpose(seq_bm, (1, 2, 0))          # [T, E, B]
        return fused_forward_pallas(seq_fm, static_feats.T, params['lstm'],
                                    params['mlp'], params['cls_w_t'],
                                    params['cls_b'])

    # ------- pure-JAX reference path (validation only) -------
    seq_tm = jnp.transpose(seq_bm, (1, 0, 2))              # [T, B, E]
    lstm_feat = lstm_reference(seq_tm, params['lstm'])
    h = jnp.concatenate([static_feats, lstm_feat], axis=1)
    for (w_t, b, scale, shift) in params['mlp']:
        h = jnp.maximum(h @ w_t + b, 0.0) * scale + shift
    h = jax.nn.sigmoid(h) * h
    return h @ params['cls_w_t'] + params['cls_b']


# ----------------------------------------------------------------------- main
if __name__ == "__main__":
    embedding_size = [(10, 3), (8, 2)]   # 2 categorical columns -> matches x[:, :2]
    num_numerical_cols = 1               # forward uses x[:, 2:3]
    output_size = 3
    layers = [32, 16]
    B, T = 4, 6                          # x is [B, 3 + T]
    vocab_diag = 831 + 1

    key = jax.random.PRNGKey(0)
    k1, k2, k3, k4, kp = jax.random.split(key, 5)
    cat0 = jax.random.randint(k1, (B, 1), 0, embedding_size[0][0]).astype(jnp.float32)
    cat1 = jax.random.randint(k2, (B, 1), 0, embedding_size[1][0]).astype(jnp.float32)
    num = jax.random.normal(k3, (B, 1), jnp.float32)
    seq = jax.random.randint(k4, (B, T), 0, vocab_diag).astype(jnp.float32)
    x = jnp.concatenate([cat0, cat1, num, seq], axis=1)   # [B, 3+T]

    params = init_params(kp, embedding_size, num_numerical_cols, output_size,
                         layers, vocab_diag=vocab_diag, hidden_dim=2, z_dim=4)

    out = jax.block_until_ready(forward(params, x, use_pallas=True))
    ref = jax.block_until_ready(forward(params, x, use_pallas=False))
    np.testing.assert_allclose(np.asarray(out), np.asarray(ref),
                               rtol=1e-3, atol=5e-4)

    print("KERNEL_OK")
</pallas_src>

<mosaic_0001>
module attributes {stable_mosaic.version = 11 : i64} {
  func.func @kernel(%arg0: i32, %arg1: memref<6x2x4xf32, #tpu.memory_space<vmem>>, %arg2: memref<6x4xf32, #tpu.memory_space<vmem>>, %arg3: memref<16x16xf32, #tpu.memory_space<vmem>>, %arg4: memref<32x65xf32, #tpu.memory_space<vmem>>, %arg5: memref<3x4xf32, #tpu.memory_space<vmem>>) attributes {dimension_semantics = [#tpu.dimension_semantics<parallel>], iteration_bounds = array<i64: 1>, scalar_prefetch = 0 : i64, scratch_operands = 0 : i64, tpu.core_type = #tpu.core_type<tc>, window_params = [{transform_indices = @transform_0, window_bounds = array<i64: 6, 2, 4>}, {transform_indices = @transform_1, window_bounds = array<i64: 6, 4>}, {pipeline_mode = #tpu.pipeline_mode<synchronous>, transform_indices = @transform_2, window_bounds = array<i64: 16, 16>}, {pipeline_mode = #tpu.pipeline_mode<synchronous>, transform_indices = @transform_3, window_bounds = array<i64: 32, 65>}, {transform_indices = @transform_4, window_bounds = array<i64: 3, 4>}]} {
    %c0 = arith.constant 0 : index
    %c0_0 = arith.constant 0 : index
    %0 = vector.load %arg3[%c0, %c0_0] : memref<16x16xf32, #tpu.memory_space<vmem>>, vector<16x16xf32>
    %1 = vector.extract_strided_slice %0 {offsets = [0, 0], sizes = [16, 2], strides = [1, 1]} : vector<16x16xf32> to vector<16x2xf32>
    %2 = vector.extract_strided_slice %0 {offsets = [0, 2], sizes = [16, 4], strides = [1, 1]} : vector<16x16xf32> to vector<16x4xf32>
    %3 = vector.extract_strided_slice %0 {offsets = [0, 6], sizes = [16, 1], strides = [1, 1]} : vector<16x16xf32> to vector<16x1xf32>
    %4 = vector.extract_strided_slice %0 {offsets = [0, 7], sizes = [16, 4], strides = [1, 1]} : vector<16x16xf32> to vector<16x4xf32>
    %5 = vector.extract_strided_slice %0 {offsets = [0, 11], sizes = [16, 4], strides = [1, 1]} : vector<16x16xf32> to vector<16x4xf32>
    %6 = vector.extract_strided_slice %0 {offsets = [0, 15], sizes = [16, 1], strides = [1, 1]} : vector<16x16xf32> to vector<16x1xf32>
    %7 = vector.extract_strided_slice %1 {offsets = [0, 0], sizes = [16, 1], strides = [1, 1]} : vector<16x2xf32> to vector<16x1xf32>
    %8 = vector.shape_cast %7 : vector<16x1xf32> to vector<16x1xf32>
    %9 = vector.broadcast %8 : vector<16x1xf32> to vector<16x4xf32>
    %10 = vector.extract_strided_slice %1 {offsets = [0, 1], sizes = [16, 1], strides = [1, 1]} : vector<16x2xf32> to vector<16x1xf32>
    %11 = vector.shape_cast %10 : vector<16x1xf32> to vector<16x1xf32>
    %12 = vector.broadcast %11 : vector<16x1xf32> to vector<16x4xf32>
    %13 = vector.extract_strided_slice %2 {offsets = [0, 0], sizes = [16, 1], strides = [1, 1]} : vector<16x4xf32> to vector<16x1xf32>
    %14 = vector.shape_cast %13 : vector<16x1xf32> to vector<16x1xf32>
    %15 = vector.broadcast %14 : vector<16x1xf32> to vector<16x4xf32>
    %16 = vector.extract_strided_slice %2 {offsets = [0, 1], sizes = [16, 1], strides = [1, 1]} : vector<16x4xf32> to vector<16x1xf32>
    %17 = vector.shape_cast %16 : vector<16x1xf32> to vector<16x1xf32>
    %18 = vector.broadcast %17 : vector<16x1xf32> to vector<16x4xf32>
    %19 = vector.extract_strided_slice %2 {offsets = [0, 2], sizes = [16, 1], strides = [1, 1]} : vector<16x4xf32> to vector<16x1xf32>
    %20 = vector.shape_cast %19 : vector<16x1xf32> to vector<16x1xf32>
    %21 = vector.broadcast %20 : vector<16x1xf32> to vector<16x4xf32>
    %22 = vector.extract_strided_slice %2 {offsets = [0, 3], sizes = [16, 1], strides = [1, 1]} : vector<16x4xf32> to vector<16x1xf32>
    %23 = vector.shape_cast %22 : vector<16x1xf32> to vector<16x1xf32>
    %24 = vector.broadcast %23 : vector<16x1xf32> to vector<16x4xf32>
    %25 = vector.extract_strided_slice %4 {offsets = [0, 0], sizes = [16, 1], strides = [1, 1]} : vector<16x4xf32> to vector<16x1xf32>
    %26 = vector.shape_cast %25 : vector<16x1xf32> to vector<16x1xf32>
    %27 = vector.broadcast %26 : vector<16x1xf32> to vector<16x4xf32>
    %28 = vector.extract_strided_slice %4 {offsets = [0, 1], sizes = [16, 1], strides = [1, 1]} : vector<16x4xf32> to vector<16x1xf32>
    %29 = vector.shape_cast %28 : vector<16x1xf32> to vector<16x1xf32>
    %30 = vector.broadcast %29 : vector<16x1xf32> to vector<16x4xf32>
    %31 = vector.extract_strided_slice %4 {offsets = [0, 2], sizes = [16, 1], strides = [1, 1]} : vector<16x4xf32> to vector<16x1xf32>
    %32 = vector.shape_cast %31 : vector<16x1xf32> to vector<16x1xf32>
    %33 = vector.broadcast %32 : vector<16x1xf32> to vector<16x4xf32>
    %34 = vector.extract_strided_slice %4 {offsets = [0, 3], sizes = [16, 1], strides = [1, 1]} : vector<16x4xf32> to vector<16x1xf32>
    %35 = vector.shape_cast %34 : vector<16x1xf32> to vector<16x1xf32>
    %36 = vector.broadcast %35 : vector<16x1xf32> to vector<16x4xf32>
    %37 = vector.extract_strided_slice %5 {offsets = [0, 0], sizes = [16, 1], strides = [1, 1]} : vector<16x4xf32> to vector<16x1xf32>
    %38 = vector.shape_cast %37 : vector<16x1xf32> to vector<16x1xf32>
    %39 = vector.broadcast %38 : vector<16x1xf32> to vector<16x4xf32>
    %40 = vector.extract_strided_slice %5 {offsets = [0, 1], sizes = [16, 1], strides = [1, 1]} : vector<16x4xf32> to vector<16x1xf32>
    %41 = vector.shape_cast %40 : vector<16x1xf32> to vector<16x1xf32>
    %42 = vector.broadcast %41 : vector<16x1xf32> to vector<16x4xf32>
    %43 = vector.extract_strided_slice %5 {offsets = [0, 2], sizes = [16, 1], strides = [1, 1]} : vector<16x4xf32> to vector<16x1xf32>
    %44 = vector.shape_cast %43 : vector<16x1xf32> to vector<16x1xf32>
    %45 = vector.broadcast %44 : vector<16x1xf32> to vector<16x4xf32>
    %46 = vector.extract_strided_slice %5 {offsets = [0, 3], sizes = [16, 1], strides = [1, 1]} : vector<16x4xf32> to vector<16x1xf32>
    %47 = vector.shape_cast %46 : vector<16x1xf32> to vector<16x1xf32>
    %48 = vector.broadcast %47 : vector<16x1xf32> to vector<16x4xf32>
    %49 = vector.shape_cast %3 : vector<16x1xf32> to vector<16x1xf32>
    %50 = vector.broadcast %49 : vector<16x1xf32> to vector<16x4xf32>
    %51 = vector.shape_cast %6 : vector<16x1xf32> to vector<16x1xf32>
    %52 = vector.broadcast %51 : vector<16x1xf32> to vector<16x4xf32>
    %c0_1 = arith.constant 0 : index
    %c0_2 = arith.constant 0 : index
    %c0_3 = arith.constant 0 : index
    %53 = vector.load %arg1[%c0_1, %c0_2, %c0_3] : memref<6x2x4xf32, #tpu.memory_space<vmem>>, vector<1x2x4xf32>
    %54 = vector.shape_cast %53 : vector<1x2x4xf32> to vector<2x4xf32>
    %55 = vector.extract_strided_slice %54 {offsets = [0, 0], sizes = [1, 4], strides = [1, 1]} : vector<2x4xf32> to vector<1x4xf32>
    %56 = vector.broadcast %55 : vector<1x4xf32> to vector<16x4xf32>
    %57 = arith.mulf %9, %56 : vector<16x4xf32>
    %58 = vector.extract_strided_slice %54 {offsets = [1, 0], sizes = [1, 4], strides = [1, 1]} : vector<2x4xf32> to vector<1x4xf32>
    %59 = vector.broadcast %58 : vector<1x4xf32> to vector<16x4xf32>
    %60 = arith.mulf %12, %59 : vector<16x4xf32>
    %61 = arith.addf %57, %60 : vector<16x4xf32>
    %62 = arith.addf %50, %61 : vector<16x4xf32>
    %c1 = arith.constant 1 : index
    %c0_4 = arith.constant 0 : index
    %c0_5 = arith.constant 0 : index
    %63 = vector.load %arg1[%c1, %c0_4, %c0_5] : memref<6x2x4xf32, #tpu.memory_space<vmem>>, vector<1x2x4xf32>
    %64 = vector.shape_cast %63 : vector<1x2x4xf32> to vector<2x4xf32>
    %65 = vector.extract_strided_slice %64 {offsets = [0, 0], sizes = [1, 4], strides = [1, 1]} : vector<2x4xf32> to vector<1x4xf32>
    %66 = vector.broadcast %65 : vector<1x4xf32> to vector<16x4xf32>
    %67 = arith.mulf %9, %66 : vector<16x4xf32>
    %68 = vector.extract_strided_slice %64 {offsets = [1, 0], sizes = [1, 4], strides = [1, 1]} : vector<2x4xf32> to vector<1x4xf32>
    %69 = vector.broadcast %68 : vector<1x4xf32> to vector<16x4xf32>
    %70 = arith.mulf %12, %69 : vector<16x4xf32>
    %71 = arith.addf %67, %70 : vector<16x4xf32>
    %72 = arith.addf %50, %71 : vector<16x4xf32>
    %c2 = arith.constant 2 : index
    %c0_6 = arith.constant 0 : index
    %c0_7 = arith.constant 0 : index
    %73 = vector.load %arg1[%c2, %c0_6, %c0_7] : memref<6x2x4xf32, #tpu.memory_space<vmem>>, vector<1x2x4xf32>
    %74 = vector.shape_cast %73 : vector<1x2x4xf32> to vector<2x4xf32>
    %75 = vector.extract_strided_slice %74 {offsets = [0, 0], sizes = [1, 4], strides = [1, 1]} : vector<2x4xf32> to vector<1x4xf32>
    %76 = vector.broadcast %75 : vector<1x4xf32> to vector<16x4xf32>
    %77 = arith.mulf %9, %76 : vector<16x4xf32>
    %78 = vector.extract_strided_slice %74 {offsets = [1, 0], sizes = [1, 4], strides = [1, 1]} : vector<2x4xf32> to vector<1x4xf32>
    %79 = vector.broadcast %78 : vector<1x4xf32> to vector<16x4xf32>
    %80 = arith.mulf %12, %79 : vector<16x4xf32>
    %81 = arith.addf %77, %80 : vector<16x4xf32>
    %82 = arith.addf %50, %81 : vector<16x4xf32>
    %c3 = arith.constant 3 : index
    %c0_8 = arith.constant 0 : index
    %c0_9 = arith.constant 0 : index
    %83 = vector.load %arg1[%c3, %c0_8, %c0_9] : memref<6x2x4xf32, #tpu.memory_space<vmem>>, vector<1x2x4xf32>
    %84 = vector.shape_cast %83 : vector<1x2x4xf32> to vector<2x4xf32>
    %85 = vector.extract_strided_slice %84 {offsets = [0, 0], sizes = [1, 4], strides = [1, 1]} : vector<2x4xf32> to vector<1x4xf32>
    %86 = vector.broadcast %85 : vector<1x4xf32> to vector<16x4xf32>
    %87 = arith.mulf %9, %86 : vector<16x4xf32>
    %88 = vector.extract_strided_slice %84 {offsets = [1, 0], sizes = [1, 4], strides = [1, 1]} : vector<2x4xf32> to vector<1x4xf32>
    %89 = vector.broadcast %88 : vector<1x4xf32> to vector<16x4xf32>
    %90 = arith.mulf %12, %89 : vector<16x4xf32>
    %91 = arith.addf %87, %90 : vector<16x4xf32>
    %92 = arith.addf %50, %91 : vector<16x4xf32>
    %c4 = arith.constant 4 : index
    %c0_10 = arith.constant 0 : index
    %c0_11 = arith.constant 0 : index
    %93 = vector.load %arg1[%c4, %c0_10, %c0_11] : memref<6x2x4xf32, #tpu.memory_space<vmem>>, vector<1x2x4xf32>
    %94 = vector.shape_cast %93 : vector<1x2x4xf32> to vector<2x4xf32>
    %95 = vector.extract_strided_slice %94 {offsets = [0, 0], sizes = [1, 4], strides = [1, 1]} : vector<2x4xf32> to vector<1x4xf32>
    %96 = vector.broadcast %95 : vector<1x4xf32> to vector<16x4xf32>
    %97 = arith.mulf %9, %96 : vector<16x4xf32>
    %98 = vector.extract_strided_slice %94 {offsets = [1, 0], sizes = [1, 4], strides = [1, 1]} : vector<2x4xf32> to vector<1x4xf32>
    %99 = vector.broadcast %98 : vector<1x4xf32> to vector<16x4xf32>
    %100 = arith.mulf %12, %99 : vector<16x4xf32>
    %101 = arith.addf %97, %100 : vector<16x4xf32>
    %102 = arith.addf %50, %101 : vector<16x4xf32>
    %c5 = arith.constant 5 : index
    %c0_12 = arith.constant 0 : index
    %c0_13 = arith.constant 0 : index
    %103 = vector.load %arg1[%c5, %c0_12, %c0_13] : memref<6x2x4xf32, #tpu.memory_space<vmem>>, vector<1x2x4xf32>
    %104 = vector.shape_cast %103 : vector<1x2x4xf32> to vector<2x4xf32>
    %105 = vector.extract_strided_slice %104 {offsets = [0, 0], sizes = [1, 4], strides = [1, 1]} : vector<2x4xf32> to vector<1x4xf32>
    %106 = vector.broadcast %105 : vector<1x4xf32> to vector<16x4xf32>
    %107 = arith.mulf %9, %106 : vector<16x4xf32>
    %108 = vector.extract_strided_slice %104 {offsets = [1, 0], sizes = [1, 4], strides = [1, 1]} : vector<2x4xf32> to vector<1x4xf32>
    %109 = vector.broadcast %108 : vector<1x4xf32> to vector<16x4xf32>
    %110 = arith.mulf %12, %109 : vector<16x4xf32>
    %111 = arith.addf %107, %110 : vector<16x4xf32>
    %112 = arith.addf %50, %111 : vector<16x4xf32>
    %cst = arith.constant 0.000000e+00 : f32
    %113 = vector.broadcast %cst : f32 to vector<4x4xf32>
    %114 = vector.extract_strided_slice %113 {offsets = [0, 0], sizes = [1, 4], strides = [1, 1]} : vector<4x4xf32> to vector<1x4xf32>
    %115 = vector.broadcast %114 : vector<1x4xf32> to vector<16x4xf32>
    %116 = arith.mulf %15, %115 : vector<16x4xf32>
    %117 = vector.extract_strided_slice %113 {offsets = [1, 0], sizes = [1, 4], strides = [1, 1]} : vector<4x4xf32> to vector<1x4xf32>
    %118 = vector.broadcast %117 : vector<1x4xf32> to vector<16x4xf32>
    %119 = arith.mulf %18, %118 : vector<16x4xf32>
    %120 = arith.addf %116, %119 : vector<16x4xf32>
    %121 = vector.extract_strided_slice %113 {offsets = [2, 0], sizes = [1, 4], strides = [1, 1]} : vector<4x4xf32> to vector<1x4xf32>
    %122 = vector.broadcast %121 : vector<1x4xf32> to vector<16x4xf32>
    %123 = arith.mulf %21, %122 : vector<16x4xf32>
    %124 = arith.addf %120, %123 : vector<16x4xf32>
    %125 = vector.extract_strided_slice %113 {offsets = [3, 0], sizes = [1, 4], strides = [1, 1]} : vector<4x4xf32> to vector<1x4xf32>
    %126 = vector.broadcast %125 : vector<1x4xf32> to vector<16x4xf32>
    %127 = arith.mulf %24, %126 : vector<16x4xf32>
    %128 = arith.addf %124, %127 : vector<16x4xf32>
    %129 = arith.addf %62, %128 : vector<16x4xf32>
    %cst_14 = arith.constant 5.000000e-01 : f32
    %130 = vector.broadcast %cst_14 : f32 to vector<16x4xf32>
    %131 = arith.mulf %130, %129 : vector<16x4xf32>
    %132 = math.tanh %131 : vector<16x4xf32>
    %133 = vector.extract_strided_slice %132 {offsets = [0, 0], sizes = [4, 4], strides = [1, 1]} : vector<16x4xf32> to vector<4x4xf32>
    %cst_15 = arith.constant 5.000000e-01 : f32
    %134 = vector.broadcast %cst_15 : f32 to vector<4x4xf32>
    %135 = arith.mulf %134, %133 : vector<4x4xf32>
    %cst_16 = arith.constant 5.000000e-01 : f32
    %136 = vector.broadcast %cst_16 : f32 to vector<4x4xf32>
    %137 = arith.addf %135, %136 : vector<4x4xf32>
    %138 = vector.extract_strided_slice %132 {offsets = [4, 0], sizes = [4, 4], strides = [1, 1]} : vector<16x4xf32> to vector<4x4xf32>
    %cst_17 = arith.constant 5.000000e-01 : f32
    %139 = vector.broadcast %cst_17 : f32 to vector<4x4xf32>
    %140 = arith.mulf %139, %138 : vector<4x4xf32>
    %cst_18 = arith.constant 5.000000e-01 : f32
    %141 = vector.broadcast %cst_18 : f32 to vector<4x4xf32>
    %142 = arith.addf %140, %141 : vector<4x4xf32>
    %143 = vector.extract_strided_slice %132 {offsets = [8, 0], sizes = [4, 4], strides = [1, 1]} : vector<16x4xf32> to vector<4x4xf32>
    %144 = vector.extract_strided_slice %132 {offsets = [12, 0], sizes = [4, 4], strides = [1, 1]} : vector<16x4xf32> to vector<4x4xf32>
    %cst_19 = arith.constant 5.000000e-01 : f32
    %145 = vector.broadcast %cst_19 : f32 to vector<4x4xf32>
    %146 = arith.mulf %145, %144 : vector<4x4xf32>
    %cst_20 = arith.constant 5.000000e-01 : f32
    %147 = vector.broadcast %cst_20 : f32 to vector<4x4xf32>
    %148 = arith.addf %146, %147 : vector<4x4xf32>
    %149 = arith.mulf %142, %113 : vector<4x4xf32>
    %150 = arith.mulf %137, %143 : vector<4x4xf32>
    %151 = arith.addf %149, %150 : vector<4x4xf32>
    %152 = math.tanh %151 : vector<4x4xf32>
    %153 = arith.mulf %148, %152 : vector<4x4xf32>
    %154 = vector.extract_strided_slice %153 {offsets = [0, 0], sizes = [1, 4], strides = [1, 1]} : vector<4x4xf32> to vector<1x4xf32>
    %155 = vector.broadcast %154 : vector<1x4xf32> to vector<16x4xf32>
    %156 = arith.mulf %27, %155 : vector<16x4xf32>
    %157 = vector.extract_strided_slice %153 {offsets = [1, 0], sizes = [1, 4], strides = [1, 1]} : vector<4x4xf32> to vector<1x4xf32>
    %158 = vector.broadcast %157 : vector<1x4xf32> to vector<16x4xf32>
    %159 = arith.mulf %30, %158 : vector<16x4xf32>
    %160 = arith.addf %156, %159 : vector<16x4xf32>
    %161 = vector.extract_strided_slice %153 {offsets = [2, 0], sizes = [1, 4], strides = [1, 1]} : vector<4x4xf32> to vector<1x4xf32>
    %162 = vector.broadcast %161 : vector<1x4xf32> to vector<16x4xf32>
    %163 = arith.mulf %33, %162 : vector<16x4xf32>
    %164 = arith.addf %160, %163 : vector<16x4xf32>
    %165 = vector.extract_strided_slice %153 {offsets = [3, 0], sizes = [1, 4], strides = [1, 1]} : vector<4x4xf32> to vector<1x4xf32>
    %166 = vector.broadcast %165 : vector<1x4xf32> to vector<16x4xf32>
    %167 = arith.mulf %36, %166 : vector<16x4xf32>
    %168 = arith.addf %164, %167 : vector<16x4xf32>
    %169 = arith.addf %52, %168 : vector<16x4xf32>
    %170 = vector.extract_strided_slice %113 {offsets = [0, 0], sizes = [1, 4], strides = [1, 1]} : vector<4x4xf32> to vector<1x4xf32>
    %171 = vector.broadcast %170 : vector<1x4xf32> to vector<16x4xf32>
    %172 = arith.mulf %39, %171 : vector<16x4xf32>
    %173 = vector.extract_strided_slice %113 {offsets = [1, 0], sizes = [1, 4], strides = [1, 1]} : vector<4x4xf32> to vector<1x4xf32>
    %174 = vector.broadcast %173 : vector<1x4xf32> to vector<16x4xf32>
    %175 = arith.mulf %42, %174 : vector<16x4xf32>
    %176 = arith.addf %172, %175 : vector<16x4xf32>
    %177 = vector.extract_strided_slice %113 {offsets = [2, 0], sizes = [1, 4], strides = [1, 1]} : vector<4x4xf32> to vector<1x4xf32>
    %178 = vector.broadcast %177 : vector<1x4xf32> to vector<16x4xf32>
    %179 = arith.mulf %45, %178 : vector<16x4xf32>
    %180 = arith.addf %176, %179 : vector<16x4xf32>
    %181 = vector.extract_strided_slice %113 {offsets = [3, 0], sizes = [1, 4], strides = [1, 1]} : vector<4x4xf32> to vector<1x4xf32>
    %182 = vector.broadcast %181 : vector<1x4xf32> to vector<16x4xf32>
    %183 = arith.mulf %48, %182 : vector<16x4xf32>
    %184 = arith.addf %180, %183 : vector<16x4xf32>
    %185 = arith.addf %169, %184 : vector<16x4xf32>
    %cst_21 = arith.constant 5.000000e-01 : f32
    %186 = vector.broadcast %cst_21 : f32 to vector<16x4xf32>
    %187 = arith.mulf %186, %185 : vector<16x4xf32>
    %188 = math.tanh %187 : vector<16x4xf32>
    %189 = vector.extract_strided_slice %188 {offsets = [0, 0], sizes = [4, 4], strides = [1, 1]} : vector<16x4xf32> to vector<4x4xf32>
    %cst_22 = arith.constant 5.000000e-01 : f32
    %190 = vector.broadcast %cst_22 : f32 to vector<4x4xf32>
    %191 = arith.mulf %190, %189 : vector<4x4xf32>
    %cst_23 = arith.constant 5.000000e-01 : f32
    %192 = vector.broadcast %cst_23 : f32 to vector<4x4xf32>
    %193 = arith.addf %191, %192 : vector<4x4xf32>
    %194 = vector.extract_strided_slice %188 {offsets = [4, 0], sizes = [4, 4], strides = [1, 1]} : vector<16x4xf32> to vector<4x4xf32>
    %cst_24 = arith.constant 5.000000e-01 : f32
    %195 = vector.broadcast %cst_24 : f32 to vector<4x4xf32>
    %196 = arith.mulf %195, %194 : vector<4x4xf32>
    %cst_25 = arith.constant 5.000000e-01 : f32
    %197 = vector.broadcast %cst_25 : f32 to vector<4x4xf32>
    %198 = arith.addf %196, %197 : vector<4x4xf32>
    %199 = vector.extract_strided_slice %188 {offsets = [8, 0], sizes = [4, 4], strides = [1, 1]} : vector<16x4xf32> to vector<4x4xf32>
    %200 = vector.extract_strided_slice %188 {offsets = [12, 0], sizes = [4, 4], strides = [1, 1]} : vector<16x4xf32> to vector<4x4xf32>
    %cst_26 = arith.constant 5.000000e-01 : f32
    %201 = vector.broadcast %cst_26 : f32 to vector<4x4xf32>
    %202 = arith.mulf %201, %200 : vector<4x4xf32>
    %cst_27 = arith.constant 5.000000e-01 : f32
    %203 = vector.broadcast %cst_27 : f32 to vector<4x4xf32>
    %204 = arith.addf %202, %203 : vector<4x4xf32>
    %205 = arith.mulf %198, %113 : vector<4x4xf32>
    %206 = arith.mulf %193, %199 : vector<4x4xf32>
    %207 = arith.addf %205, %206 : vector<4x4xf32>
    %208 = math.tanh %207 : vector<4x4xf32>
    %209 = arith.mulf %204, %208 : vector<4x4xf32>
    %210 = vector.extract_strided_slice %153 {offsets = [0, 0], sizes = [1, 4], strides = [1, 1]} : vector<4x4xf32> to vector<1x4xf32>
    %211 = vector.broadcast %210 : vector<1x4xf32> to vector<16x4xf32>
    %212 = arith.mulf %15, %211 : vector<16x4xf32>
    %213 = vector.extract_strided_slice %153 {offsets = [1, 0], sizes = [1, 4], strides = [1, 1]} : vector<4x4xf32> to vector<1x4xf32>
    %214 = vector.broadcast %213 : vector<1x4xf32> to vector<16x4xf32>
    %215 = arith.mulf %18, %214 : vector<16x4xf32>
    %216 = arith.addf %212, %215 : vector<16x4xf32>
    %217 = vector.extract_strided_slice %153 {offsets = [2, 0], sizes = [1, 4], strides = [1, 1]} : vector<4x4xf32> to vector<1x4xf32>
    %218 = vector.broadcast %217 : vector<1x4xf32> to vector<16x4xf32>
    %219 = arith.mulf %21, %218 : vector<16x4xf32>
    %220 = arith.addf %216, %219 : vector<16x4xf32>
    %221 = vector.extract_strided_slice %153 {offsets = [3, 0], sizes = [1, 4], strides = [1, 1]} : vector<4x4xf32> to vector<1x4xf32>
    %222 = vector.broadcast %221 : vector<1x4xf32> to vector<16x4xf32>
    %223 = arith.mulf %24, %222 : vector<16x4xf32>
    %224 = arith.addf %220, %223 : vector<16x4xf32>
    %225 = arith.addf %72, %224 : vector<16x4xf32>
    %cst_28 = arith.constant 5.000000e-01 : f32
    %226 = vector.broadcast %cst_28 : f32 to vector<16x4xf32>
    %227 = arith.mulf %226, %225 : vector<16x4xf32>
    %228 = math.tanh %227 : vector<16x4xf32>
    %229 = vector.extract_strided_slice %228 {offsets = [0, 0], sizes = [4, 4], strides = [1, 1]} : vector<16x4xf32> to vector<4x4xf32>
    %cst_29 = arith.constant 5.000000e-01 : f32
    %230 = vector.broadcast %cst_29 : f32 to vector<4x4xf32>
    %231 = arith.mulf %230, %229 : vector<4x4xf32>
    %cst_30 = arith.constant 5.000000e-01 : f32
    %232 = vector.broadcast %cst_30 : f32 to vector<4x4xf32>
    %233 = arith.addf %231, %232 : vector<4x4xf32>
    %234 = vector.extract_strided_slice %228 {offsets = [4, 0], sizes = [4, 4], strides = [1, 1]} : vector<16x4xf32> to vector<4x4xf32>
    %cst_31 = arith.constant 5.000000e-01 : f32
    %235 = vector.broadcast %cst_31 : f32 to vector<4x4xf32>
    %236 = arith.mulf %235, %234 : vector<4x4xf32>
    %cst_32 = arith.constant 5.000000e-01 : f32
    %237 = vector.broadcast %cst_32 : f32 to vector<4x4xf32>
    %238 = arith.addf %236, %237 : vector<4x4xf32>
    %239 = vector.extract_strided_slice %228 {offsets = [8, 0], sizes = [4, 4], strides = [1, 1]} : vector<16x4xf32> to vector<4x4xf32>
    %240 = vector.extract_strided_slice %228 {offsets = [12, 0], sizes = [4, 4], strides = [1, 1]} : vector<16x4xf32> to vector<4x4xf32>
    %cst_33 = arith.constant 5.000000e-01 : f32
    %241 = vector.broadcast %cst_33 : f32 to vector<4x4xf32>
    %242 = arith.mulf %241, %240 : vector<4x4xf32>
    %cst_34 = arith.constant 5.000000e-01 : f32
    %243 = vector.broadcast %cst_34 : f32 to vector<4x4xf32>
    %244 = arith.addf %242, %243 : vector<4x4xf32>
    %245 = arith.mulf %238, %151 : vector<4x4xf32>
    %246 = arith.mulf %233, %239 : vector<4x4xf32>
    %247 = arith.addf %245, %246 : vector<4x4xf32>
    %248 = math.tanh %247 : vector<4x4xf32>
    %249 = arith.mulf %244, %248 : vector<4x4xf32>
    %250 = vector.extract_strided_slice %249 {offsets = [0, 0], sizes = [1, 4], strides = [1, 1]} : vector<4x4xf32> to vector<1x4xf32>
    %251 = vector.broadcast %250 : vector<1x4xf32> to vector<16x4xf32>
    %252 = arith.mulf %27, %251 : vector<16x4xf32>
    %253 = vector.extract_strided_slice %249 {offsets = [1, 0], sizes = [1, 4], strides = [1, 1]} : vector<4x4xf32> to vector<1x4xf32>
    %254 = vector.broadcast %253 : vector<1x4xf32> to vector<16x4xf32>
    %255 = arith.mulf %30, %254 : vector<16x4xf32>
    %256 = arith.addf %252, %255 : vector<16x4xf32>
    %257 = vector.extract_strided_slice %249 {offsets = [2, 0], sizes = [1, 4], strides = [1, 1]} : vector<4x4xf32> to vector<1x4xf32>
    %258 = vector.broadcast %257 : vector<1x4xf32> to vector<16x4xf32>
    %259 = arith.mulf %33, %258 : vector<16x4xf32>
    %260 = arith.addf %256, %259 : vector<16x4xf32>
    %261 = vector.extract_strided_slice %249 {offsets = [3, 0], sizes = [1, 4], strides = [1, 1]} : vector<4x4xf32> to vector<1x4xf32>
    %262 = vector.broadcast %261 : vector<1x4xf32> to vector<16x4xf32>
    %263 = arith.mulf %36, %262 : vector<16x4xf32>
    %264 = arith.addf %260, %263 : vector<16x4xf32>
    %265 = arith.addf %52, %264 : vector<16x4xf32>
    %266 = vector.extract_strided_slice %209 {offsets = [0, 0], sizes = [1, 4], strides = [1, 1]} : vector<4x4xf32> to vector<1x4xf32>
    %267 = vector.broadcast %266 : vector<1x4xf32> to vector<16x4xf32>
    %268 = arith.mulf %39, %267 : vector<16x4xf32>
    %269 = vector.extract_strided_slice %209 {offsets = [1, 0], sizes = [1, 4], strides = [1, 1]} : vector<4x4xf32> to vector<1x4xf32>
    %270 = vector.broadcast %269 : vector<1x4xf32> to vector<16x4xf32>
    %271 = arith.mulf %42, %270 : vector<16x4xf32>
    %272 = arith.addf %268, %271 : vector<16x4xf32>
    %273 = vector.extract_strided_slice %209 {offsets = [2, 0], sizes = [1, 4], strides = [1, 1]} : vector<4x4xf32> to vector<1x4xf32>
    %274 = vector.broadcast %273 : vector<1x4xf32> to vector<16x4xf32>
    %275 = arith.mulf %45, %274 : vector<16x4xf32>
    %276 = arith.addf %272, %275 : vector<16x4xf32>
    %277 = vector.extract_strided_slice %209 {offsets = [3, 0], sizes = [1, 4], strides = [1, 1]} : vector<4x4xf32> to vector<1x4xf32>
    %278 = vector.broadcast %277 : vector<1x4xf32> to vector<16x4xf32>
    %279 = arith.mulf %48, %278 : vector<16x4xf32>
    %280 = arith.addf %276, %279 : vector<16x4xf32>
    %281 = arith.addf %265, %280 : vector<16x4xf32>
    %cst_35 = arith.constant 5.000000e-01 : f32
    %282 = vector.broadcast %cst_35 : f32 to vector<16x4xf32>
    %283 = arith.mulf %282, %281 : vector<16x4xf32>
    %284 = math.tanh %283 : vector<16x4xf32>
    %285 = vector.extract_strided_slice %284 {offsets = [0, 0], sizes = [4, 4], strides = [1, 1]} : vector<16x4xf32> to vector<4x4xf32>
    %cst_36 = arith.constant 5.000000e-01 : f32
    %286 = vector.broadcast %cst_36 : f32 to vector<4x4xf32>
    %287 = arith.mulf %286, %285 : vector<4x4xf32>
    %cst_37 = arith.constant 5.000000e-01 : f32
    %288 = vector.broadcast %cst_37 : f32 to vector<4x4xf32>
    %289 = arith.addf %287, %288 : vector<4x4xf32>
    %290 = vector.extract_strided_slice %284 {offsets = [4, 0], sizes = [4, 4], strides = [1, 1]} : vector<16x4xf32> to vector<4x4xf32>
    %cst_38 = arith.constant 5.000000e-01 : f32
    %291 = vector.broadcast %cst_38 : f32 to vector<4x4xf32>
    %292 = arith.mulf %291, %290 : vector<4x4xf32>
    %cst_39 = arith.constant 5.000000e-01 : f32
    %293 = vector.broadcast %cst_39 : f32 to vector<4x4xf32>
    %294 = arith.addf %292, %293 : vector<4x4xf32>
    %295 = vector.extract_strided_slice %284 {offsets = [8, 0], sizes = [4, 4], strides = [1, 1]} : vector<16x4xf32> to vector<4x4xf32>
    %296 = vector.extract_strided_slice %284 {offsets = [12, 0], sizes = [4, 4], strides = [1, 1]} : vector<16x4xf32> to vector<4x4xf32>
    %cst_40 = arith.constant 5.000000e-01 : f32
    %297 = vector.broadcast %cst_40 : f32 to vector<4x4xf32>
    %298 = arith.mulf %297, %296 : vector<4x4xf32>
    %cst_41 = arith.constant 5.000000e-01 : f32
    %299 = vector.broadcast %cst_41 : f32 to vector<4x4xf32>
    %300 = arith.addf %298, %299 : vector<4x4xf32>
    %301 = arith.mulf %294, %207 : vector<4x4xf32>
    %302 = arith.mulf %289, %295 : vector<4x4xf32>
    %303 = arith.addf %301, %302 : vector<4x4xf32>
    %304 = math.tanh %303 : vector<4x4xf32>
    %305 = arith.mulf %300, %304 : vector<4x4xf32>
    %306 = vector.extract_strided_slice %249 {offsets = [0, 0], sizes = [1, 4], strides = [1, 1]} : vector<4x4xf32> to vector<1x4xf32>
    %307 = vector.broadcast %306 : vector<1x4xf32> to vector<16x4xf32>
    %308 = arith.mulf %15, %307 : vector<16x4xf32>
    %309 = vector.extract_strided_slice %249 {offsets = [1, 0], sizes = [1, 4], strides = [1, 1]} : vector<4x4xf32> to vector<1x4xf32>
    %310 = vector.broadcast %309 : vector<1x4xf32> to vector<16x4xf32>
    %311 = arith.mulf %18, %310 : vector<16x4xf32>
    %312 = arith.addf %308, %311 : vector<16x4xf32>
    %313 = vector.extract_strided_slice %249 {offsets = [2, 0], sizes = [1, 4], strides = [1, 1]} : vector<4x4xf32> to vector<1x4xf32>
    %314 = vector.broadcast %313 : vector<1x4xf32> to vector<16x4xf32>
    %315 = arith.mulf %21, %314 : vector<16x4xf32>
    %316 = arith.addf %312, %315 : vector<16x4xf32>
    %317 = vector.extract_strided_slice %249 {offsets = [3, 0], sizes = [1, 4], strides = [1, 1]} : vector<4x4xf32> to vector<1x4xf32>
    %318 = vector.broadcast %317 : vector<1x4xf32> to vector<16x4xf32>
    %319 = arith.mulf %24, %318 : vector<16x4xf32>
    %320 = arith.addf %316, %319 : vector<16x4xf32>
    %321 = arith.addf %82, %320 : vector<16x4xf32>
    %cst_42 = arith.constant 5.000000e-01 : f32
    %322 = vector.broadcast %cst_42 : f32 to vector<16x4xf32>
    %323 = arith.mulf %322, %321 : vector<16x4xf32>
    %324 = math.tanh %323 : vector<16x4xf32>
    %325 = vector.extract_strided_slice %324 {offsets = [0, 0], sizes = [4, 4], strides = [1, 1]} : vector<16x4xf32> to vector<4x4xf32>
    %cst_43 = arith.constant 5.000000e-01 : f32
    %326 = vector.broadcast %cst_43 : f32 to vector<4x4xf32>
    %327 = arith.mulf %326, %325 : vector<4x4xf32>
    %cst_44 = arith.constant 5.000000e-01 : f32
    %328 = vector.broadcast %cst_44 : f32 to vector<4x4xf32>
    %329 = arith.addf %327, %328 : vector<4x4xf32>
    %330 = vector.extract_strided_slice %324 {offsets = [4, 0], sizes = [4, 4], strides = [1, 1]} : vector<16x4xf32> to vector<4x4xf32>
    %cst_45 = arith.constant 5.000000e-01 : f32
    %331 = vector.broadcast %cst_45 : f32 to vector<4x4xf32>
    %332 = arith.mulf %331, %330 : vector<4x4xf32>
    %cst_46 = arith.constant 5.000000e-01 : f32
    %333 = vector.broadcast %cst_46 : f32 to vector<4x4xf32>
    %334 = arith.addf %332, %333 : vector<4x4xf32>
    %335 = vector.extract_strided_slice %324 {offsets = [8, 0], sizes = [4, 4], strides = [1, 1]} : vector<16x4xf32> to vector<4x4xf32>
    %336 = vector.extract_strided_slice %324 {offsets = [12, 0], sizes = [4, 4], strides = [1, 1]} : vector<16x4xf32> to vector<4x4xf32>
    %cst_47 = arith.constant 5.000000e-01 : f32
    %337 = vector.broadcast %cst_47 : f32 to vector<4x4xf32>
    %338 = arith.mulf %337, %336 : vector<4x4xf32>
    %cst_48 = arith.constant 5.000000e-01 : f32
    %339 = vector.broadcast %cst_48 : f32 to vector<4x4xf32>
    %340 = arith.addf %338, %339 : vector<4x4xf32>
    %341 = arith.mulf %334, %247 : vector<4x4xf32>
    %342 = arith.mulf %329, %335 : vector<4x4xf32>
    %343 = arith.addf %341, %342 : vector<4x4xf32>
    %344 = math.tanh %343 : vector<4x4xf32>
    %345 = arith.mulf %340, %344 : vector<4x4xf32>
    %346 = vector.extract_strided_slice %345 {offsets = [0, 0], sizes = [1, 4], strides = [1, 1]} : vector<4x4xf32> to vector<1x4xf32>
    %347 = vector.broadcast %346 : vector<1x4xf32> to vector<16x4xf32>
    %348 = arith.mulf %27, %347 : vector<16x4xf32>
    %349 = vector.extract_strided_slice %345 {offsets = [1, 0], sizes = [1, 4], strides = [1, 1]} : vector<4x4xf32> to vector<1x4xf32>
    %350 = vector.broadcast %349 : vector<1x4xf32> to vector<16x4xf32>
    %351 = arith.mulf %30, %350 : vector<16x4xf32>
    %352 = arith.addf %348, %351 : vector<16x4xf32>
    %353 = vector.extract_strided_slice %345 {offsets = [2, 0], sizes = [1, 4], strides = [1, 1]} : vector<4x4xf32> to vector<1x4xf32>
    %354 = vector.broadcast %353 : vector<1x4xf32> to vector<16x4xf32>
    %355 = arith.mulf %33, %354 : vector<16x4xf32>
    %356 = arith.addf %352, %355 : vector<16x4xf32>
    %357 = vector.extract_strided_slice %345 {offsets = [3, 0], sizes = [1, 4], strides = [1, 1]} : vector<4x4xf32> to vector<1x4xf32>
    %358 = vector.broadcast %357 : vector<1x4xf32> to vector<16x4xf32>
    %359 = arith.mulf %36, %358 : vector<16x4xf32>
    %360 = arith.addf %356, %359 : vector<16x4xf32>
    %361 = arith.addf %52, %360 : vector<16x4xf32>
    %362 = vector.extract_strided_slice %305 {offsets = [0, 0], sizes = [1, 4], strides = [1, 1]} : vector<4x4xf32> to vector<1x4xf32>
    %363 = vector.broadcast %362 : vector<1x4xf32> to vector<16x4xf32>
    %364 = arith.mulf %39, %363 : vector<16x4xf32>
    %365 = vector.extract_strided_slice %305 {offsets = [1, 0], sizes = [1, 4], strides = [1, 1]} : vector<4x4xf32> to vector<1x4xf32>
    %366 = vector.broadcast %365 : vector<1x4xf32> to vector<16x4xf32>
    %367 = arith.mulf %42, %366 : vector<16x4xf32>
    %368 = arith.addf %364, %367 : vector<16x4xf32>
    %369 = vector.extract_strided_slice %305 {offsets = [2, 0], sizes = [1, 4], strides = [1, 1]} : vector<4x4xf32> to vector<1x4xf32>
    %370 = vector.broadcast %369 : vector<1x4xf32> to vector<16x4xf32>
    %371 = arith.mulf %45, %370 : vector<16x4xf32>
    %372 = arith.addf %368, %371 : vector<16x4xf32>
    %373 = vector.extract_strided_slice %305 {offsets = [3, 0], sizes = [1, 4], strides = [1, 1]} : vector<4x4xf32> to vector<1x4xf32>
    %374 = vector.broadcast %373 : vector<1x4xf32> to vector<16x4xf32>
    %375 = arith.mulf %48, %374 : vector<16x4xf32>
    %376 = arith.addf %372, %375 : vector<16x4xf32>
    %377 = arith.addf %361, %376 : vector<16x4xf32>
    %cst_49 = arith.constant 5.000000e-01 : f32
    %378 = vector.broadcast %cst_49 : f32 to vector<16x4xf32>
    %379 = arith.mulf %378, %377 : vector<16x4xf32>
    %380 = math.tanh %379 : vector<16x4xf32>
    %381 = vector.extract_strided_slice %380 {offsets = [0, 0], sizes = [4, 4], strides = [1, 1]} : vector<16x4xf32> to vector<4x4xf32>
    %cst_50 = arith.constant 5.000000e-01 : f32
    %382 = vector.broadcast %cst_50 : f32 to vector<4x4xf32>
    %383 = arith.mulf %382, %381 : vector<4x4xf32>
    %cst_51 = arith.constant 5.000000e-01 : f32
    %384 = vector.broadcast %cst_51 : f32 to vector<4x4xf32>
    %385 = arith.addf %383, %384 : vector<4x4xf32>
    %386 = vector.extract_strided_slice %380 {offsets = [4, 0], sizes = [4, 4], strides = [1, 1]} : vector<16x4xf32> to vector<4x4xf32>
    %cst_52 = arith.constant 5.000000e-01 : f32
    %387 = vector.broadcast %cst_52 : f32 to vector<4x4xf32>
    %388 = arith.mulf %387, %386 : vector<4x4xf32>
    %cst_53 = arith.constant 5.000000e-01 : f32
    %389 = vector.broadcast %cst_53 : f32 to vector<4x4xf32>
    %390 = arith.addf %388, %389 : vector<4x4xf32>
    %391 = vector.extract_strided_slice %380 {offsets = [8, 0], sizes = [4, 4], strides = [1, 1]} : vector<16x4xf32> to vector<4x4xf32>
    %392 = vector.extract_strided_slice %380 {offsets = [12, 0], sizes = [4, 4], strides = [1, 1]} : vector<16x4xf32> to vector<4x4xf32>
    %cst_54 = arith.constant 5.000000e-01 : f32
    %393 = vector.broadcast %cst_54 : f32 to vector<4x4xf32>
    %394 = arith.mulf %393, %392 : vector<4x4xf32>
    %cst_55 = arith.constant 5.000000e-01 : f32
    %395 = vector.broadcast %cst_55 : f32 to vector<4x4xf32>
    %396 = arith.addf %394, %395 : vector<4x4xf32>
    %397 = arith.mulf %390, %303 : vector<4x4xf32>
    %398 = arith.mulf %385, %391 : vector<4x4xf32>
    %399 = arith.addf %397, %398 : vector<4x4xf32>
    %400 = math.tanh %399 : vector<4x4xf32>
    %401 = arith.mulf %396, %400 : vector<4x4xf32>
    %402 = vector.extract_strided_slice %345 {offsets = [0, 0], sizes = [1, 4], strides = [1, 1]} : vector<4x4xf32> to vector<1x4xf32>
    %403 = vector.broadcast %402 : vector<1x4xf32> to vector<16x4xf32>
    %404 = arith.mulf %15, %403 : vector<16x4xf32>
    %405 = vector.extract_strided_slice %345 {offsets = [1, 0], sizes = [1, 4], strides = [1, 1]} : vector<4x4xf32> to vector<1x4xf32>
    %406 = vector.broadcast %405 : vector<1x4xf32> to vector<16x4xf32>
    %407 = arith.mulf %18, %406 : vector<16x4xf32>
    %408 = arith.addf %404, %407 : vector<16x4xf32>
    %409 = vector.extract_strided_slice %345 {offsets = [2, 0], sizes = [1, 4], strides = [1, 1]} : vector<4x4xf32> to vector<1x4xf32>
    %410 = vector.broadcast %409 : vector<1x4xf32> to vector<16x4xf32>
    %411 = arith.mulf %21, %410 : vector<16x4xf32>
    %412 = arith.addf %408, %411 : vector<16x4xf32>
    %413 = vector.extract_strided_slice %345 {offsets = [3, 0], sizes = [1, 4], strides = [1, 1]} : vector<4x4xf32> to vector<1x4xf32>
    %414 = vector.broadcast %413 : vector<1x4xf32> to vector<16x4xf32>
    %415 = arith.mulf %24, %414 : vector<16x4xf32>
    %416 = arith.addf %412, %415 : vector<16x4xf32>
    %417 = arith.addf %92, %416 : vector<16x4xf32>
    %cst_56 = arith.constant 5.000000e-01 : f32
    %418 = vector.broadcast %cst_56 : f32 to vector<16x4xf32>
    %419 = arith.mulf %418, %417 : vector<16x4xf32>
    %420 = math.tanh %419 : vector<16x4xf32>
    %421 = vector.extract_strided_slice %420 {offsets = [0, 0], sizes = [4, 4], strides = [1, 1]} : vector<16x4xf32> to vector<4x4xf32>
    %cst_57 = arith.constant 5.000000e-01 : f32
    %422 = vector.broadcast %cst_57 : f32 to vector<4x4xf32>
    %423 = arith.mulf %422, %421 : vector<4x4xf32>
    %cst_58 = arith.constant 5.000000e-01 : f32
    %424 = vector.broadcast %cst_58 : f32 to vector<4x4xf32>
    %425 = arith.addf %423, %424 : vector<4x4xf32>
    %426 = vector.extract_strided_slice %420 {offsets = [4, 0], sizes = [4, 4], strides = [1, 1]} : vector<16x4xf32> to vector<4x4xf32>
    %cst_59 = arith.constant 5.000000e-01 : f32
    %427 = vector.broadcast %cst_59 : f32 to vector<4x4xf32>
    %428 = arith.mulf %427, %426 : vector<4x4xf32>
    %cst_60 = arith.constant 5.000000e-01 : f32
    %429 = vector.broadcast %cst_60 : f32 to vector<4x4xf32>
    %430 = arith.addf %428, %429 : vector<4x4xf32>
    %431 = vector.extract_strided_slice %420 {offsets = [8, 0], sizes = [4, 4], strides = [1, 1]} : vector<16x4xf32> to vector<4x4xf32>
    %432 = vector.extract_strided_slice %420 {offsets = [12, 0], sizes = [4, 4], strides = [1, 1]} : vector<16x4xf32> to vector<4x4xf32>
    %cst_61 = arith.constant 5.000000e-01 : f32
    %433 = vector.broadcast %cst_61 : f32 to vector<4x4xf32>
    %434 = arith.mulf %433, %432 : vector<4x4xf32>
    %cst_62 = arith.constant 5.000000e-01 : f32
    %435 = vector.broadcast %cst_62 : f32 to vector<4x4xf32>
    %436 = arith.addf %434, %435 : vector<4x4xf32>
    %437 = arith.mulf %430, %343 : vector<4x4xf32>
    %438 = arith.mulf %425, %431 : vector<4x4xf32>
    %439 = arith.addf %437, %438 : vector<4x4xf32>
    %440 = math.tanh %439 : vector<4x4xf32>
    %441 = arith.mulf %436, %440 : vector<4x4xf32>
    %442 = vector.extract_strided_slice %441 {offsets = [0, 0], sizes = [1, 4], strides = [1, 1]} : vector<4x4xf32> to vector<1x4xf32>
    %443 = vector.broadcast %442 : vector<1x4xf32> to vector<16x4xf32>
    %444 = arith.mulf %27, %443 : vector<16x4xf32>
    %445 = vector.extract_strided_slice %441 {offsets = [1, 0], sizes = [1, 4], strides = [1, 1]} : vector<4x4xf32> to vector<1x4xf32>
    %446 = vector.broadcast %445 : vector<1x4xf32> to vector<16x4xf32>
    %447 = arith.mulf %30, %446 : vector<16x4xf32>
    %448 = arith.addf %444, %447 : vector<16x4xf32>
    %449 = vector.extract_strided_slice %441 {offsets = [2, 0], sizes = [1, 4], strides = [1, 1]} : vector<4x4xf32> to vector<1x4xf32>
    %450 = vector.broadcast %449 : vector<1x4xf32> to vector<16x4xf32>
    %451 = arith.mulf %33, %450 : vector<16x4xf32>
    %452 = arith.addf %448, %451 : vector<16x4xf32>
    %453 = vector.extract_strided_slice %441 {offsets = [3, 0], sizes = [1, 4], strides = [1, 1]} : vector<4x4xf32> to vector<1x4xf32>
    %454 = vector.broadcast %453 : vector<1x4xf32> to vector<16x4xf32>
    %455 = arith.mulf %36, %454 : vector<16x4xf32>
    %456 = arith.addf %452, %455 : vector<16x4xf32>
    %457 = arith.addf %52, %456 : vector<16x4xf32>
    %458 = vector.extract_strided_slice %401 {offsets = [0, 0], sizes = [1, 4], strides = [1, 1]} : vector<4x4xf32> to vector<1x4xf32>
    %459 = vector.broadcast %458 : vector<1x4xf32> to vector<16x4xf32>
    %460 = arith.mulf %39, %459 : vector<16x4xf32>
    %461 = vector.extract_strided_slice %401 {offsets = [1, 0], sizes = [1, 4], strides = [1, 1]} : vector<4x4xf32> to vector<1x4xf32>
    %462 = vector.broadcast %461 : vector<1x4xf32> to vector<16x4xf32>
    %463 = arith.mulf %42, %462 : vector<16x4xf32>
    %464 = arith.addf %460, %463 : vector<16x4xf32>
    %465 = vector.extract_strided_slice %401 {offsets = [2, 0], sizes = [1, 4], strides = [1, 1]} : vector<4x4xf32> to vector<1x4xf32>
    %466 = vector.broadcast %465 : vector<1x4xf32> to vector<16x4xf32>
    %467 = arith.mulf %45, %466 : vector<16x4xf32>
    %468 = arith.addf %464, %467 : vector<16x4xf32>
    %469 = vector.extract_strided_slice %401 {offsets = [3, 0], sizes = [1, 4], strides = [1, 1]} : vector<4x4xf32> to vector<1x4xf32>
    %470 = vector.broadcast %469 : vector<1x4xf32> to vector<16x4xf32>
    %471 = arith.mulf %48, %470 : vector<16x4xf32>
    %472 = arith.addf %468, %471 : vector<16x4xf32>
    %473 = arith.addf %457, %472 : vector<16x4xf32>
    %cst_63 = arith.constant 5.000000e-01 : f32
    %474 = vector.broadcast %cst_63 : f32 to vector<16x4xf32>
    %475 = arith.mulf %474, %473 : vector<16x4xf32>
    %476 = math.tanh %475 : vector<16x4xf32>
    %477 = vector.extract_strided_slice %476 {offsets = [0, 0], sizes = [4, 4], strides = [1, 1]} : vector<16x4xf32> to vector<4x4xf32>
    %cst_64 = arith.constant 5.000000e-01 : f32
    %478 = vector.broadcast %cst_64 : f32 to vector<4x4xf32>
    %479 = arith.mulf %478, %477 : vector<4x4xf32>
    %cst_65 = arith.constant 5.000000e-01 : f32
    %480 = vector.broadcast %cst_65 : f32 to vector<4x4xf32>
    %481 = arith.addf %479, %480 : vector<4x4xf32>
    %482 = vector.extract_strided_slice %476 {offsets = [4, 0], sizes = [4, 4], strides = [1, 1]} : vector<16x4xf32> to vector<4x4xf32>
    %cst_66 = arith.constant 5.000000e-01 : f32
    %483 = vector.broadcast %cst_66 : f32 to vector<4x4xf32>
    %484 = arith.mulf %483, %482 : vector<4x4xf32>
    %cst_67 = arith.constant 5.000000e-01 : f32
    %485 = vector.broadcast %cst_67 : f32 to vector<4x4xf32>
    %486 = arith.addf %484, %485 : vector<4x4xf32>
    %487 = vector.extract_strided_slice %476 {offsets = [8, 0], sizes = [4, 4], strides = [1, 1]} : vector<16x4xf32> to vector<4x4xf32>
    %488 = vector.extract_strided_slice %476 {offsets = [12, 0], sizes = [4, 4], strides = [1, 1]} : vector<16x4xf32> to vector<4x4xf32>
    %cst_68 = arith.constant 5.000000e-01 : f32
    %489 = vector.broadcast %cst_68 : f32 to vector<4x4xf32>
    %490 = arith.mulf %489, %488 : vector<4x4xf32>
    %cst_69 = arith.constant 5.000000e-01 : f32
    %491 = vector.broadcast %cst_69 : f32 to vector<4x4xf32>
    %492 = arith.addf %490, %491 : vector<4x4xf32>
    %493 = arith.mulf %486, %399 : vector<4x4xf32>
    %494 = arith.mulf %481, %487 : vector<4x4xf32>
    %495 = arith.addf %493, %494 : vector<4x4xf32>
    %496 = math.tanh %495 : vector<4x4xf32>
    %497 = arith.mulf %492, %496 : vector<4x4xf32>
    %498 = vector.extract_strided_slice %441 {offsets = [0, 0], sizes = [1, 4], strides = [1, 1]} : vector<4x4xf32> to vector<1x4xf32>
    %499 = vector.broadcast %498 : vector<1x4xf32> to vector<16x4xf32>
    %500 = arith.mulf %15, %499 : vector<16x4xf32>
    %501 = vector.extract_strided_slice %441 {offsets = [1, 0], sizes = [1, 4], strides = [1, 1]} : vector<4x4xf32> to vector<1x4xf32>
    %502 = vector.broadcast %501 : vector<1x4xf32> to vector<16x4xf32>
    %503 = arith.mulf %18, %502 : vector<16x4xf32>
    %504 = arith.addf %500, %503 : vector<16x4xf32>
    %505 = vector.extract_strided_slice %441 {offsets = [2, 0], sizes = [1, 4], strides = [1, 1]} : vector<4x4xf32> to vector<1x4xf32>
    %506 = vector.broadcast %505 : vector<1x4xf32> to vector<16x4xf32>
    %507 = arith.mulf %21, %506 : vector<16x4xf32>
    %508 = arith.addf %504, %507 : vector<16x4xf32>
    %509 = vector.extract_strided_slice %441 {offsets = [3, 0], sizes = [1, 4], strides = [1, 1]} : vector<4x4xf32> to vector<1x4xf32>
    %510 = vector.broadcast %509 : vector<1x4xf32> to vector<16x4xf32>
    %511 = arith.mulf %24, %510 : vector<16x4xf32>
    %512 = arith.addf %508, %511 : vector<16x4xf32>
    %513 = arith.addf %102, %512 : vector<16x4xf32>
    %cst_70 = arith.constant 5.000000e-01 : f32
    %514 = vector.broadcast %cst_70 : f32 to vector<16x4xf32>
    %515 = arith.mulf %514, %513 : vector<16x4xf32>
    %516 = math.tanh %515 : vector<16x4xf32>
    %517 = vector.extract_strided_slice %516 {offsets = [0, 0], sizes = [4, 4], strides = [1, 1]} : vector<16x4xf32> to vector<4x4xf32>
    %cst_71 = arith.constant 5.000000e-01 : f32
    %518 = vector.broadcast %cst_71 : f32 to vector<4x4xf32>
    %519 = arith.mulf %518, %517 : vector<4x4xf32>
    %cst_72 = arith.constant 5.000000e-01 : f32
    %520 = vector.broadcast %cst_72 : f32 to vector<4x4xf32>
    %521 = arith.addf %519, %520 : vector<4x4xf32>
    %522 = vector.extract_strided_slice %516 {offsets = [4, 0], sizes = [4, 4], strides = [1, 1]} : vector<16x4xf32> to vector<4x4xf32>
    %cst_73 = arith.constant 5.000000e-01 : f32
    %523 = vector.broadcast %cst_73 : f32 to vector<4x4xf32>
    %524 = arith.mulf %523, %522 : vector<4x4xf32>
    %cst_74 = arith.constant 5.000000e-01 : f32
    %525 = vector.broadcast %cst_74 : f32 to vector<4x4xf32>
    %526 = arith.addf %524, %525 : vector<4x4xf32>
    %527 = vector.extract_strided_slice %516 {offsets = [8, 0], sizes = [4, 4], strides = [1, 1]} : vector<16x4xf32> to vector<4x4xf32>
    %528 = vector.extract_strided_slice %516 {offsets = [12, 0], sizes = [4, 4], strides = [1, 1]} : vector<16x4xf32> to vector<4x4xf32>
    %cst_75 = arith.constant 5.000000e-01 : f32
    %529 = vector.broadcast %cst_75 : f32 to vector<4x4xf32>
    %530 = arith.mulf %529, %528 : vector<4x4xf32>
    %cst_76 = arith.constant 5.000000e-01 : f32
    %531 = vector.broadcast %cst_76 : f32 to vector<4x4xf32>
    %532 = arith.addf %530, %531 : vector<4x4xf32>
    %533 = arith.mulf %526, %439 : vector<4x4xf32>
    %534 = arith.mulf %521, %527 : vector<4x4xf32>
    %535 = arith.addf %533, %534 : vector<4x4xf32>
    %536 = math.tanh %535 : vector<4x4xf32>
    %537 = arith.mulf %532, %536 : vector<4x4xf32>
    %538 = vector.extract_strided_slice %537 {offsets = [0, 0], sizes = [1, 4], strides = [1, 1]} : vector<4x4xf32> to vector<1x4xf32>
    %539 = vector.broadcast %538 : vector<1x4xf32> to vector<16x4xf32>
    %540 = arith.mulf %27, %539 : vector<16x4xf32>
    %541 = vector.extract_strided_slice %537 {offsets = [1, 0], sizes = [1, 4], strides = [1, 1]} : vector<4x4xf32> to vector<1x4xf32>
    %542 = vector.broadcast %541 : vector<1x4xf32> to vector<16x4xf32>
    %543 = arith.mulf %30, %542 : vector<16x4xf32>
    %544 = arith.addf %540, %543 : vector<16x4xf32>
    %545 = vector.extract_strided_slice %537 {offsets = [2, 0], sizes = [1, 4], strides = [1, 1]} : vector<4x4xf32> to vector<1x4xf32>
    %546 = vector.broadcast %545 : vector<1x4xf32> to vector<16x4xf32>
    %547 = arith.mulf %33, %546 : vector<16x4xf32>
    %548 = arith.addf %544, %547 : vector<16x4xf32>
    %549 = vector.extract_strided_slice %537 {offsets = [3, 0], sizes = [1, 4], strides = [1, 1]} : vector<4x4xf32> to vector<1x4xf32>
    %550 = vector.broadcast %549 : vector<1x4xf32> to vector<16x4xf32>
    %551 = arith.mulf %36, %550 : vector<16x4xf32>
    %552 = arith.addf %548, %551 : vector<16x4xf32>
    %553 = arith.addf %52, %552 : vector<16x4xf32>
    %554 = vector.extract_strided_slice %497 {offsets = [0, 0], sizes = [1, 4], strides = [1, 1]} : vector<4x4xf32> to vector<1x4xf32>
    %555 = vector.broadcast %554 : vector<1x4xf32> to vector<16x4xf32>
    %556 = arith.mulf %39, %555 : vector<16x4xf32>
    %557 = vector.extract_strided_slice %497 {offsets = [1, 0], sizes = [1, 4], strides = [1, 1]} : vector<4x4xf32> to vector<1x4xf32>
    %558 = vector.broadcast %557 : vector<1x4xf32> to vector<16x4xf32>
    %559 = arith.mulf %42, %558 : vector<16x4xf32>
    %560 = arith.addf %556, %559 : vector<16x4xf32>
    %561 = vector.extract_strided_slice %497 {offsets = [2, 0], sizes = [1, 4], strides = [1, 1]} : vector<4x4xf32> to vector<1x4xf32>
    %562 = vector.broadcast %561 : vector<1x4xf32> to vector<16x4xf32>
    %563 = arith.mulf %45, %562 : vector<16x4xf32>
    %564 = arith.addf %560, %563 : vector<16x4xf32>
    %565 = vector.extract_strided_slice %497 {offsets = [3, 0], sizes = [1, 4], strides = [1, 1]} : vector<4x4xf32> to vector<1x4xf32>
    %566 = vector.broadcast %565 : vector<1x4xf32> to vector<16x4xf32>
    %567 = arith.mulf %48, %566 : vector<16x4xf32>
    %568 = arith.addf %564, %567 : vector<16x4xf32>
    %569 = arith.addf %553, %568 : vector<16x4xf32>
    %cst_77 = arith.constant 5.000000e-01 : f32
    %570 = vector.broadcast %cst_77 : f32 to vector<16x4xf32>
    %571 = arith.mulf %570, %569 : vector<16x4xf32>
    %572 = math.tanh %571 : vector<16x4xf32>
    %573 = vector.extract_strided_slice %572 {offsets = [0, 0], sizes = [4, 4], strides = [1, 1]} : vector<16x4xf32> to vector<4x4xf32>
    %cst_78 = arith.constant 5.000000e-01 : f32
    %574 = vector.broadcast %cst_78 : f32 to vector<4x4xf32>
    %575 = arith.mulf %574, %573 : vector<4x4xf32>
    %cst_79 = arith.constant 5.000000e-01 : f32
    %576 = vector.broadcast %cst_79 : f32 to vector<4x4xf32>
    %577 = arith.addf %575, %576 : vector<4x4xf32>
    %578 = vector.extract_strided_slice %572 {offsets = [4, 0], sizes = [4, 4], strides = [1, 1]} : vector<16x4xf32> to vector<4x4xf32>
    %cst_80 = arith.constant 5.000000e-01 : f32
    %579 = vector.broadcast %cst_80 : f32 to vector<4x4xf32>
    %580 = arith.mulf %579, %578 : vector<4x4xf32>
    %cst_81 = arith.constant 5.000000e-01 : f32
    %581 = vector.broadcast %cst_81 : f32 to vector<4x4xf32>
    %582 = arith.addf %580, %581 : vector<4x4xf32>
    %583 = vector.extract_strided_slice %572 {offsets = [8, 0], sizes = [4, 4], strides = [1, 1]} : vector<16x4xf32> to vector<4x4xf32>
    %584 = vector.extract_strided_slice %572 {offsets = [12, 0], sizes = [4, 4], strides = [1, 1]} : vector<16x4xf32> to vector<4x4xf32>
    %cst_82 = arith.constant 5.000000e-01 : f32
    %585 = vector.broadcast %cst_82 : f32 to vector<4x4xf32>
    %586 = arith.mulf %585, %584 : vector<4x4xf32>
    %cst_83 = arith.constant 5.000000e-01 : f32
    %587 = vector.broadcast %cst_83 : f32 to vector<4x4xf32>
    %588 = arith.addf %586, %587 : vector<4x4xf32>
    %589 = arith.mulf %582, %495 : vector<4x4xf32>
    %590 = arith.mulf %577, %583 : vector<4x4xf32>
    %591 = arith.addf %589, %590 : vector<4x4xf32>
    %592 = math.tanh %591 : vector<4x4xf32>
    %593 = arith.mulf %588, %592 : vector<4x4xf32>
    %594 = vector.extract_strided_slice %537 {offsets = [0, 0], sizes = [1, 4], strides = [1, 1]} : vector<4x4xf32> to vector<1x4xf32>
    %595 = vector.broadcast %594 : vector<1x4xf32> to vector<16x4xf32>
    %596 = arith.mulf %15, %595 : vector<16x4xf32>
    %597 = vector.extract_strided_slice %537 {offsets = [1, 0], sizes = [1, 4], strides = [1, 1]} : vector<4x4xf32> to vector<1x4xf32>
    %598 = vector.broadcast %597 : vector<1x4xf32> to vector<16x4xf32>
    %599 = arith.mulf %18, %598 : vector<16x4xf32>
    %600 = arith.addf %596, %599 : vector<16x4xf32>
    %601 = vector.extract_strided_slice %537 {offsets = [2, 0], sizes = [1, 4], strides = [1, 1]} : vector<4x4xf32> to vector<1x4xf32>
    %602 = vector.broadcast %601 : vector<1x4xf32> to vector<16x4xf32>
    %603 = arith.mulf %21, %602 : vector<16x4xf32>
    %604 = arith.addf %600, %603 : vector<16x4xf32>
    %605 = vector.extract_strided_slice %537 {offsets = [3, 0], sizes = [1, 4], strides = [1, 1]} : vector<4x4xf32> to vector<1x4xf32>
    %606 = vector.broadcast %605 : vector<1x4xf32> to vector<16x4xf32>
    %607 = arith.mulf %24, %606 : vector<16x4xf32>
    %608 = arith.addf %604, %607 : vector<16x4xf32>
    %609 = arith.addf %112, %608 : vector<16x4xf32>
    %cst_84 = arith.constant 5.000000e-01 : f32
    %610 = vector.broadcast %cst_84 : f32 to vector<16x4xf32>
    %611 = arith.mulf %610, %609 : vector<16x4xf32>
    %612 = math.tanh %611 : vector<16x4xf32>
    %613 = vector.extract_strided_slice %612 {offsets = [0, 0], sizes = [4, 4], strides = [1, 1]} : vector<16x4xf32> to vector<4x4xf32>
    %cst_85 = arith.constant 5.000000e-01 : f32
    %614 = vector.broadcast %cst_85 : f32 to vector<4x4xf32>
    %615 = arith.mulf %614, %613 : vector<4x4xf32>
    %cst_86 = arith.constant 5.000000e-01 : f32
    %616 = vector.broadcast %cst_86 : f32 to vector<4x4xf32>
    %617 = arith.addf %615, %616 : vector<4x4xf32>
    %618 = vector.extract_strided_slice %612 {offsets = [4, 0], sizes = [4, 4], strides = [1, 1]} : vector<16x4xf32> to vector<4x4xf32>
    %cst_87 = arith.constant 5.000000e-01 : f32
    %619 = vector.broadcast %cst_87 : f32 to vector<4x4xf32>
    %620 = arith.mulf %619, %618 : vector<4x4xf32>
    %cst_88 = arith.constant 5.000000e-01 : f32
    %621 = vector.broadcast %cst_88 : f32 to vector<4x4xf32>
    %622 = arith.addf %620, %621 : vector<4x4xf32>
    %623 = vector.extract_strided_slice %612 {offsets = [8, 0], sizes = [4, 4], strides = [1, 1]} : vector<16x4xf32> to vector<4x4xf32>
    %624 = vector.extract_strided_slice %612 {offsets = [12, 0], sizes = [4, 4], strides = [1, 1]} : vector<16x4xf32> to vector<4x4xf32>
    %cst_89 = arith.constant 5.000000e-01 : f32
    %625 = vector.broadcast %cst_89 : f32 to vector<4x4xf32>
    %626 = arith.mulf %625, %624 : vector<4x4xf32>
    %cst_90 = arith.constant 5.000000e-01 : f32
    %627 = vector.broadcast %cst_90 : f32 to vector<4x4xf32>
    %628 = arith.addf %626, %627 : vector<4x4xf32>
    %629 = arith.mulf %622, %535 : vector<4x4xf32>
    %630 = arith.mulf %617, %623 : vector<4x4xf32>
    %631 = arith.addf %629, %630 : vector<4x4xf32>
    %632 = math.tanh %631 : vector<4x4xf32>
    %633 = arith.mulf %628, %632 : vector<4x4xf32>
    %634 = vector.extract_strided_slice %633 {offsets = [0, 0], sizes = [1, 4], strides = [1, 1]} : vector<4x4xf32> to vector<1x4xf32>
    %635 = vector.broadcast %634 : vector<1x4xf32> to vector<16x4xf32>
    %636 = arith.mulf %27, %635 : vector<16x4xf32>
    %637 = vector.extract_strided_slice %633 {offsets = [1, 0], sizes = [1, 4], strides = [1, 1]} : vector<4x4xf32> to vector<1x4xf32>
    %638 = vector.broadcast %637 : vector<1x4xf32> to vector<16x4xf32>
    %639 = arith.mulf %30, %638 : vector<16x4xf32>
    %640 = arith.addf %636, %639 : vector<16x4xf32>
    %641 = vector.extract_strided_slice %633 {offsets = [2, 0], sizes = [1, 4], strides = [1, 1]} : vector<4x4xf32> to vector<1x4xf32>
    %642 = vector.broadcast %641 : vector<1x4xf32> to vector<16x4xf32>
    %643 = arith.mulf %33, %642 : vector<16x4xf32>
    %644 = arith.addf %640, %643 : vector<16x4xf32>
    %645 = vector.extract_strided_slice %633 {offsets = [3, 0], sizes = [1, 4], strides = [1, 1]} : vector<4x4xf32> to vector<1x4xf32>
    %646 = vector.broadcast %645 : vector<1x4xf32> to vector<16x4xf32>
    %647 = arith.mulf %36, %646 : vector<16x4xf32>
    %648 = arith.addf %644, %647 : vector<16x4xf32>
    %649 = arith.addf %52, %648 : vector<16x4xf32>
    %650 = vector.extract_strided_slice %593 {offsets = [0, 0], sizes = [1, 4], strides = [1, 1]} : vector<4x4xf32> to vector<1x4xf32>
    %651 = vector.broadcast %650 : vector<1x4xf32> to vector<16x4xf32>
    %652 = arith.mulf %39, %651 : vector<16x4xf32>
    %653 = vector.extract_strided_slice %593 {offsets = [1, 0], sizes = [1, 4], strides = [1, 1]} : vector<4x4xf32> to vector<1x4xf32>
    %654 = vector.broadcast %653 : vector<1x4xf32> to vector<16x4xf32>
    %655 = arith.mulf %42, %654 : vector<16x4xf32>
    %656 = arith.addf %652, %655 : vector<16x4xf32>
    %657 = vector.extract_strided_slice %593 {offsets = [2, 0], sizes = [1, 4], strides = [1, 1]} : vector<4x4xf32> to vector<1x4xf32>
    %658 = vector.broadcast %657 : vector<1x4xf32> to vector<16x4xf32>
    %659 = arith.mulf %45, %658 : vector<16x4xf32>
    %660 = arith.addf %656, %659 : vector<16x4xf32>
    %661 = vector.extract_strided_slice %593 {offsets = [3, 0], sizes = [1, 4], strides = [1, 1]} : vector<4x4xf32> to vector<1x4xf32>
    %662 = vector.broadcast %661 : vector<1x4xf32> to vector<16x4xf32>
    %663 = arith.mulf %48, %662 : vector<16x4xf32>
    %664 = arith.addf %660, %663 : vector<16x4xf32>
    %665 = arith.addf %649, %664 : vector<16x4xf32>
    %cst_91 = arith.constant 5.000000e-01 : f32
    %666 = vector.broadcast %cst_91 : f32 to vector<16x4xf32>
    %667 = arith.mulf %666, %665 : vector<16x4xf32>
    %668 = math.tanh %667 : vector<16x4xf32>
    %669 = vector.extract_strided_slice %668 {offsets = [0, 0], sizes = [4, 4], strides = [1, 1]} : vector<16x4xf32> to vector<4x4xf32>
    %cst_92 = arith.constant 5.000000e-01 : f32
    %670 = vector.broadcast %cst_92 : f32 to vector<4x4xf32>
    %671 = arith.mulf %670, %669 : vector<4x4xf32>
    %cst_93 = arith.constant 5.000000e-01 : f32
    %672 = vector.broadcast %cst_93 : f32 to vector<4x4xf32>
    %673 = arith.addf %671, %672 : vector<4x4xf32>
    %674 = vector.extract_strided_slice %668 {offsets = [4, 0], sizes = [4, 4], strides = [1, 1]} : vector<16x4xf32> to vector<4x4xf32>
    %cst_94 = arith.constant 5.000000e-01 : f32
    %675 = vector.broadcast %cst_94 : f32 to vector<4x4xf32>
    %676 = arith.mulf %675, %674 : vector<4x4xf32>
    %cst_95 = arith.constant 5.000000e-01 : f32
    %677 = vector.broadcast %cst_95 : f32 to vector<4x4xf32>
    %678 = arith.addf %676, %677 : vector<4x4xf32>
    %679 = vector.extract_strided_slice %668 {offsets = [8, 0], sizes = [4, 4], strides = [1, 1]} : vector<16x4xf32> to vector<4x4xf32>
    %680 = vector.extract_strided_slice %668 {offsets = [12, 0], sizes = [4, 4], strides = [1, 1]} : vector<16x4xf32> to vector<4x4xf32>
    %cst_96 = arith.constant 5.000000e-01 : f32
    %681 = vector.broadcast %cst_96 : f32 to vector<4x4xf32>
    %682 = arith.mulf %681, %680 : vector<4x4xf32>
    %cst_97 = arith.constant 5.000000e-01 : f32
    %683 = vector.broadcast %cst_97 : f32 to vector<4x4xf32>
    %684 = arith.addf %682, %683 : vector<4x4xf32>
    %685 = arith.mulf %678, %591 : vector<4x4xf32>
    %686 = arith.mulf %673, %679 : vector<4x4xf32>
    %687 = arith.addf %685, %686 : vector<4x4xf32>
    %688 = math.tanh %687 : vector<4x4xf32>
    %689 = arith.mulf %684, %688 : vector<4x4xf32>
    %c0_98 = arith.constant 0 : index
    %c0_99 = arith.constant 0 : index
    %690 = vector.load %arg4[%c0_98, %c0_99] : memref<32x65xf32, #tpu.memory_space<vmem>>, vector<32x65xf32>
    %c0_100 = arith.constant 0 : index
    %c0_101 = arith.constant 0 : index
    %691 = vector.load %arg2[%c0_100, %c0_101] : memref<6x4xf32, #tpu.memory_space<vmem>>, vector<6x4xf32>
    %692 = vector.extract_strided_slice %690 {offsets = [0, 0], sizes = [32, 10], strides = [1, 1]} : vector<32x65xf32> to vector<32x10xf32>
    %693 = vector.extract_strided_slice %692 {offsets = [0, 0], sizes = [32, 6], strides = [1, 1]} : vector<32x10xf32> to vector<32x6xf32>
    %694 = vector.extract_strided_slice %693 {offsets = [0, 0], sizes = [32, 1], strides = [1, 1]} : vector<32x6xf32> to vector<32x1xf32>
    %695 = vector.shape_cast %694 : vector<32x1xf32> to vector<32x1xf32>
    %696 = vector.broadcast %695 : vector<32x1xf32> to vector<32x4xf32>
    %697 = vector.extract_strided_slice %693 {offsets = [0, 1], sizes = [32, 1], strides = [1, 1]} : vector<32x6xf32> to vector<32x1xf32>
    %698 = vector.shape_cast %697 : vector<32x1xf32> to vector<32x1xf32>
    %699 = vector.broadcast %698 : vector<32x1xf32> to vector<32x4xf32>
    %700 = vector.extract_strided_slice %693 {offsets = [0, 2], sizes = [32, 1], strides = [1, 1]} : vector<32x6xf32> to vector<32x1xf32>
    %701 = vector.shape_cast %700 : vector<32x1xf32> to vector<32x1xf32>
    %702 = vector.broadcast %701 : vector<32x1xf32> to vector<32x4xf32>
    %703 = vector.extract_strided_slice %693 {offsets = [0, 3], sizes = [32, 1], strides = [1, 1]} : vector<32x6xf32> to vector<32x1xf32>
    %704 = vector.shape_cast %703 : vector<32x1xf32> to vector<32x1xf32>
    %705 = vector.broadcast %704 : vector<32x1xf32> to vector<32x4xf32>
    %706 = vector.extract_strided_slice %693 {offsets = [0, 4], sizes = [32, 1], strides = [1, 1]} : vector<32x6xf32> to vector<32x1xf32>
    %707 = vector.shape_cast %706 : vector<32x1xf32> to vector<32x1xf32>
    %708 = vector.broadcast %707 : vector<32x1xf32> to vector<32x4xf32>
    %709 = vector.extract_strided_slice %693 {offsets = [0, 5], sizes = [32, 1], strides = [1, 1]} : vector<32x6xf32> to vector<32x1xf32>
    %710 = vector.shape_cast %709 : vector<32x1xf32> to vector<32x1xf32>
    %711 = vector.broadcast %710 : vector<32x1xf32> to vector<32x4xf32>
    %712 = vector.extract_strided_slice %691 {offsets = [0, 0], sizes = [1, 4], strides = [1, 1]} : vector<6x4xf32> to vector<1x4xf32>
    %713 = vector.broadcast %712 : vector<1x4xf32> to vector<32x4xf32>
    %714 = arith.mulf %696, %713 : vector<32x4xf32>
    %715 = vector.extract_strided_slice %691 {offsets = [1, 0], sizes = [1, 4], strides = [1, 1]} : vector<6x4xf32> to vector<1x4xf32>
    %716 = vector.broadcast %715 : vector<1x4xf32> to vector<32x4xf32>
    %717 = arith.mulf %699, %716 : vector<32x4xf32>
    %718 = arith.addf %714, %717 : vector<32x4xf32>
    %719 = vector.extract_strided_slice %691 {offsets = [2, 0], sizes = [1, 4], strides = [1, 1]} : vector<6x4xf32> to vector<1x4xf32>
    %720 = vector.broadcast %719 : vector<1x4xf32> to vector<32x4xf32>
    %721 = arith.mulf %702, %720 : vector<32x4xf32>
    %722 = arith.addf %718, %721 : vector<32x4xf32>
    %723 = vector.extract_strided_slice %691 {offsets = [3, 0], sizes = [1, 4], strides = [1, 1]} : vector<6x4xf32> to vector<1x4xf32>
    %724 = vector.broadcast %723 : vector<1x4xf32> to vector<32x4xf32>
    %725 = arith.mulf %705, %724 : vector<32x4xf32>
    %726 = arith.addf %722, %725 : vector<32x4xf32>
    %727 = vector.extract_strided_slice %691 {offsets = [4, 0], sizes = [1, 4], strides = [1, 1]} : vector<6x4xf32> to vector<1x4xf32>
    %728 = vector.broadcast %727 : vector<1x4xf32> to vector<32x4xf32>
    %729 = arith.mulf %708, %728 : vector<32x4xf32>
    %730 = arith.addf %726, %729 : vector<32x4xf32>
    %731 = vector.extract_strided_slice %691 {offsets = [5, 0], sizes = [1, 4], strides = [1, 1]} : vector<6x4xf32> to vector<1x4xf32>
    %732 = vector.broadcast %731 : vector<1x4xf32> to vector<32x4xf32>
    %733 = arith.mulf %711, %732 : vector<32x4xf32>
    %734 = arith.addf %730, %733 : vector<32x4xf32>
    %735 = vector.extract_strided_slice %692 {offsets = [0, 6], sizes = [32, 4], strides = [1, 1]} : vector<32x10xf32> to vector<32x4xf32>
    %736 = vector.extract_strided_slice %735 {offsets = [0, 0], sizes = [32, 1], strides = [1, 1]} : vector<32x4xf32> to vector<32x1xf32>
    %737 = vector.shape_cast %736 : vector<32x1xf32> to vector<32x1xf32>
    %738 = vector.broadcast %737 : vector<32x1xf32> to vector<32x4xf32>
    %739 = vector.extract_strided_slice %735 {offsets = [0, 1], sizes = [32, 1], strides = [1, 1]} : vector<32x4xf32> to vector<32x1xf32>
    %740 = vector.shape_cast %739 : vector<32x1xf32> to vector<32x1xf32>
    %741 = vector.broadcast %740 : vector<32x1xf32> to vector<32x4xf32>
    %742 = vector.extract_strided_slice %735 {offsets = [0, 2], sizes = [32, 1], strides = [1, 1]} : vector<32x4xf32> to vector<32x1xf32>
    %743 = vector.shape_cast %742 : vector<32x1xf32> to vector<32x1xf32>
    %744 = vector.broadcast %743 : vector<32x1xf32> to vector<32x4xf32>
    %745 = vector.extract_strided_slice %735 {offsets = [0, 3], sizes = [32, 1], strides = [1, 1]} : vector<32x4xf32> to vector<32x1xf32>
    %746 = vector.shape_cast %745 : vector<32x1xf32> to vector<32x1xf32>
    %747 = vector.broadcast %746 : vector<32x1xf32> to vector<32x4xf32>
    %748 = vector.extract_strided_slice %689 {offsets = [0, 0], sizes = [1, 4], strides = [1, 1]} : vector<4x4xf32> to vector<1x4xf32>
    %749 = vector.broadcast %748 : vector<1x4xf32> to vector<32x4xf32>
    %750 = arith.mulf %738, %749 : vector<32x4xf32>
    %751 = vector.extract_strided_slice %689 {offsets = [1, 0], sizes = [1, 4], strides = [1, 1]} : vector<4x4xf32> to vector<1x4xf32>
    %752 = vector.broadcast %751 : vector<1x4xf32> to vector<32x4xf32>
    %753 = arith.mulf %741, %752 : vector<32x4xf32>
    %754 = arith.addf %750, %753 : vector<32x4xf32>
    %755 = vector.extract_strided_slice %689 {offsets = [2, 0], sizes = [1, 4], strides = [1, 1]} : vector<4x4xf32> to vector<1x4xf32>
    %756 = vector.broadcast %755 : vector<1x4xf32> to vector<32x4xf32>
    %757 = arith.mulf %744, %756 : vector<32x4xf32>
    %758 = arith.addf %754, %757 : vector<32x4xf32>
    %759 = vector.extract_strided_slice %689 {offsets = [3, 0], sizes = [1, 4], strides = [1, 1]} : vector<4x4xf32> to vector<1x4xf32>
    %760 = vector.broadcast %759 : vector<1x4xf32> to vector<32x4xf32>
    %761 = arith.mulf %747, %760 : vector<32x4xf32>
    %762 = arith.addf %758, %761 : vector<32x4xf32>
    %763 = arith.addf %734, %762 : vector<32x4xf32>
    %764 = vector.extract_strided_slice %690 {offsets = [0, 10], sizes = [32, 1], strides = [1, 1]} : vector<32x65xf32> to vector<32x1xf32>
    %765 = vector.broadcast %764 : vector<32x1xf32> to vector<32x4xf32>
    %766 = arith.addf %763, %765 : vector<32x4xf32>
    %cst_102 = arith.constant 0.000000e+00 : f32
    %767 = vector.broadcast %cst_102 : f32 to vector<32x4xf32>
    %768 = arith.maximumf %766, %767 : vector<32x4xf32>
    %769 = vector.extract_strided_slice %690 {offsets = [0, 11], sizes = [32, 1], strides = [1, 1]} : vector<32x65xf32> to vector<32x1xf32>
    %770 = vector.broadcast %769 : vector<32x1xf32> to vector<32x4xf32>
    %771 = arith.mulf %768, %770 : vector<32x4xf32>
    %772 = vector.extract_strided_slice %690 {offsets = [0, 12], sizes = [32, 1], strides = [1, 1]} : vector<32x65xf32> to vector<32x1xf32>
    %773 = vector.broadcast %772 : vector<32x1xf32> to vector<32x4xf32>
    %774 = arith.addf %771, %773 : vector<32x4xf32>
    %775 = vector.extract_strided_slice %690 {offsets = [0, 13], sizes = [16, 32], strides = [1, 1]} : vector<32x65xf32> to vector<16x32xf32>
    %cst_103 = arith.constant dense<0.000000e+00> : vector<16x4xf32>
    %776 = tpu.matmul %775, %774, %cst_103 {dimension_numbers = #tpu.dot_dimension_numbers<[1], [0], [0], [1], [0, 0, 1, 1], [], []>} : vector<16x32xf32>, vector<32x4xf32>, vector<16x4xf32> -> vector<16x4xf32>
    %777 = vector.extract_strided_slice %690 {offsets = [0, 45], sizes = [16, 1], strides = [1, 1]} : vector<32x65xf32> to vector<16x1xf32>
    %778 = vector.broadcast %777 : vector<16x1xf32> to vector<16x4xf32>
    %779 = arith.addf %776, %778 : vector<16x4xf32>
    %cst_104 = arith.constant 0.000000e+00 : f32
    %780 = vector.broadcast %cst_104 : f32 to vector<16x4xf32>
    %781 = arith.maximumf %779, %780 : vector<16x4xf32>
    %782 = vector.extract_strided_slice %690 {offsets = [0, 46], sizes = [16, 1], strides = [1, 1]} : vector<32x65xf32> to vector<16x1xf32>
    %783 = vector.broadcast %782 : vector<16x1xf32> to vector<16x4xf32>
    %784 = arith.mulf %781, %783 : vector<16x4xf32>
    %785 = vector.extract_strided_slice %690 {offsets = [0, 47], sizes = [16, 1], strides = [1, 1]} : vector<32x65xf32> to vector<16x1xf32>
    %786 = vector.broadcast %785 : vector<16x1xf32> to vector<16x4xf32>
    %787 = arith.addf %784, %786 : vector<16x4xf32>
    %cst_105 = arith.constant 5.000000e-01 : f32
    %788 = vector.broadcast %cst_105 : f32 to vector<16x4xf32>
    %789 = arith.mulf %788, %787 : vector<16x4xf32>
    %790 = math.tanh %789 : vector<16x4xf32>
    %cst_106 = arith.constant 5.000000e-01 : f32
    %791 = vector.broadcast %cst_106 : f32 to vector<16x4xf32>
    %792 = arith.mulf %791, %790 : vector<16x4xf32>
    %cst_107 = arith.constant 5.000000e-01 : f32
    %793 = vector.broadcast %cst_107 : f32 to vector<16x4xf32>
    %794 = arith.addf %792, %793 : vector<16x4xf32>
    %795 = arith.mulf %787, %794 : vector<16x4xf32>
    %796 = vector.extract_strided_slice %690 {offsets = [0, 48], sizes = [3, 16], strides = [1, 1]} : vector<32x65xf32> to vector<3x16xf32>
    %797 = vector.extract_strided_slice %796 {offsets = [0, 0], sizes = [3, 1], strides = [1, 1]} : vector<3x16xf32> to vector<3x1xf32>
    %798 = vector.shape_cast %797 : vector<3x1xf32> to vector<3x1xf32>
    %799 = vector.broadcast %798 : vector<3x1xf32> to vector<3x4xf32>
    %800 = vector.extract_strided_slice %796 {offsets = [0, 1], sizes = [3, 1], strides = [1, 1]} : vector<3x16xf32> to vector<3x1xf32>
    %801 = vector.shape_cast %800 : vector<3x1xf32> to vector<3x1xf32>
    %802 = vector.broadcast %801 : vector<3x1xf32> to vector<3x4xf32>
    %803 = vector.extract_strided_slice %796 {offsets = [0, 2], sizes = [3, 1], strides = [1, 1]} : vector<3x16xf32> to vector<3x1xf32>
    %804 = vector.shape_cast %803 : vector<3x1xf32> to vector<3x1xf32>
    %805 = vector.broadcast %804 : vector<3x1xf32> to vector<3x4xf32>
    %806 = vector.extract_strided_slice %796 {offsets = [0, 3], sizes = [3, 1], strides = [1, 1]} : vector<3x16xf32> to vector<3x1xf32>
    %807 = vector.shape_cast %806 : vector<3x1xf32> to vector<3x1xf32>
    %808 = vector.broadcast %807 : vector<3x1xf32> to vector<3x4xf32>
    %809 = vector.extract_strided_slice %796 {offsets = [0, 4], sizes = [3, 1], strides = [1, 1]} : vector<3x16xf32> to vector<3x1xf32>
    %810 = vector.shape_cast %809 : vector<3x1xf32> to vector<3x1xf32>
    %811 = vector.broadcast %810 : vector<3x1xf32> to vector<3x4xf32>
    %812 = vector.extract_strided_slice %796 {offsets = [0, 5], sizes = [3, 1], strides = [1, 1]} : vector<3x16xf32> to vector<3x1xf32>
    %813 = vector.shape_cast %812 : vector<3x1xf32> to vector<3x1xf32>
    %814 = vector.broadcast %813 : vector<3x1xf32> to vector<3x4xf32>
    %815 = vector.extract_strided_slice %796 {offsets = [0, 6], sizes = [3, 1], strides = [1, 1]} : vector<3x16xf32> to vector<3x1xf32>
    %816 = vector.shape_cast %815 : vector<3x1xf32> to vector<3x1xf32>
    %817 = vector.broadcast %816 : vector<3x1xf32> to vector<3x4xf32>
    %818 = vector.extract_strided_slice %796 {offsets = [0, 7], sizes = [3, 1], strides = [1, 1]} : vector<3x16xf32> to vector<3x1xf32>
    %819 = vector.shape_cast %818 : vector<3x1xf32> to vector<3x1xf32>
    %820 = vector.broadcast %819 : vector<3x1xf32> to vector<3x4xf32>
    %821 = vector.extract_strided_slice %796 {offsets = [0, 8], sizes = [3, 1], strides = [1, 1]} : vector<3x16xf32> to vector<3x1xf32>
    %822 = vector.shape_cast %821 : vector<3x1xf32> to vector<3x1xf32>
    %823 = vector.broadcast %822 : vector<3x1xf32> to vector<3x4xf32>
    %824 = vector.extract_strided_slice %796 {offsets = [0, 9], sizes = [3, 1], strides = [1, 1]} : vector<3x16xf32> to vector<3x1xf32>
    %825 = vector.shape_cast %824 : vector<3x1xf32> to vector<3x1xf32>
    %826 = vector.broadcast %825 : vector<3x1xf32> to vector<3x4xf32>
    %827 = vector.extract_strided_slice %796 {offsets = [0, 10], sizes = [3, 1], strides = [1, 1]} : vector<3x16xf32> to vector<3x1xf32>
    %828 = vector.shape_cast %827 : vector<3x1xf32> to vector<3x1xf32>
    %829 = vector.broadcast %828 : vector<3x1xf32> to vector<3x4xf32>
    %830 = vector.extract_strided_slice %796 {offsets = [0, 11], sizes = [3, 1], strides = [1, 1]} : vector<3x16xf32> to vector<3x1xf32>
    %831 = vector.shape_cast %830 : vector<3x1xf32> to vector<3x1xf32>
    %832 = vector.broadcast %831 : vector<3x1xf32> to vector<3x4xf32>
    %833 = vector.extract_strided_slice %796 {offsets = [0, 12], sizes = [3, 1], strides = [1, 1]} : vector<3x16xf32> to vector<3x1xf32>
    %834 = vector.shape_cast %833 : vector<3x1xf32> to vector<3x1xf32>
    %835 = vector.broadcast %834 : vector<3x1xf32> to vector<3x4xf32>
    %836 = vector.extract_strided_slice %796 {offsets = [0, 13], sizes = [3, 1], strides = [1, 1]} : vector<3x16xf32> to vector<3x1xf32>
    %837 = vector.shape_cast %836 : vector<3x1xf32> to vector<3x1xf32>
    %838 = vector.broadcast %837 : vector<3x1xf32> to vector<3x4xf32>
    %839 = vector.extract_strided_slice %796 {offsets = [0, 14], sizes = [3, 1], strides = [1, 1]} : vector<3x16xf32> to vector<3x1xf32>
    %840 = vector.shape_cast %839 : vector<3x1xf32> to vector<3x1xf32>
    %841 = vector.broadcast %840 : vector<3x1xf32> to vector<3x4xf32>
    %842 = vector.extract_strided_slice %796 {offsets = [0, 15], sizes = [3, 1], strides = [1, 1]} : vector<3x16xf32> to vector<3x1xf32>
    %843 = vector.shape_cast %842 : vector<3x1xf32> to vector<3x1xf32>
    %844 = vector.broadcast %843 : vector<3x1xf32> to vector<3x4xf32>
    %845 = vector.extract_strided_slice %795 {offsets = [0, 0], sizes = [1, 4], strides = [1, 1]} : vector<16x4xf32> to vector<1x4xf32>
    %846 = vector.broadcast %845 : vector<1x4xf32> to vector<3x4xf32>
    %847 = arith.mulf %799, %846 : vector<3x4xf32>
    %848 = vector.extract_strided_slice %795 {offsets = [1, 0], sizes = [1, 4], strides = [1, 1]} : vector<16x4xf32> to vector<1x4xf32>
    %849 = vector.broadcast %848 : vector<1x4xf32> to vector<3x4xf32>
    %850 = arith.mulf %802, %849 : vector<3x4xf32>
    %851 = arith.addf %847, %850 : vector<3x4xf32>
    %852 = vector.extract_strided_slice %795 {offsets = [2, 0], sizes = [1, 4], strides = [1, 1]} : vector<16x4xf32> to vector<1x4xf32>
    %853 = vector.broadcast %852 : vector<1x4xf32> to vector<3x4xf32>
    %854 = arith.mulf %805, %853 : vector<3x4xf32>
    %855 = arith.addf %851, %854 : vector<3x4xf32>
    %856 = vector.extract_strided_slice %795 {offsets = [3, 0], sizes = [1, 4], strides = [1, 1]} : vector<16x4xf32> to vector<1x4xf32>
    %857 = vector.broadcast %856 : vector<1x4xf32> to vector<3x4xf32>
    %858 = arith.mulf %808, %857 : vector<3x4xf32>
    %859 = arith.addf %855, %858 : vector<3x4xf32>
    %860 = vector.extract_strided_slice %795 {offsets = [4, 0], sizes = [1, 4], strides = [1, 1]} : vector<16x4xf32> to vector<1x4xf32>
    %861 = vector.broadcast %860 : vector<1x4xf32> to vector<3x4xf32>
    %862 = arith.mulf %811, %861 : vector<3x4xf32>
    %863 = arith.addf %859, %862 : vector<3x4xf32>
    %864 = vector.extract_strided_slice %795 {offsets = [5, 0], sizes = [1, 4], strides = [1, 1]} : vector<16x4xf32> to vector<1x4xf32>
    %865 = vector.broadcast %864 : vector<1x4xf32> to vector<3x4xf32>
    %866 = arith.mulf %814, %865 : vector<3x4xf32>
    %867 = arith.addf %863, %866 : vector<3x4xf32>
    %868 = vector.extract_strided_slice %795 {offsets = [6, 0], sizes = [1, 4], strides = [1, 1]} : vector<16x4xf32> to vector<1x4xf32>
    %869 = vector.broadcast %868 : vector<1x4xf32> to vector<3x4xf32>
    %870 = arith.mulf %817, %869 : vector<3x4xf32>
    %871 = arith.addf %867, %870 : vector<3x4xf32>
    %872 = vector.extract_strided_slice %795 {offsets = [7, 0], sizes = [1, 4], strides = [1, 1]} : vector<16x4xf32> to vector<1x4xf32>
    %873 = vector.broadcast %872 : vector<1x4xf32> to vector<3x4xf32>
    %874 = arith.mulf %820, %873 : vector<3x4xf32>
    %875 = arith.addf %871, %874 : vector<3x4xf32>
    %876 = vector.extract_strided_slice %795 {offsets = [8, 0], sizes = [1, 4], strides = [1, 1]} : vector<16x4xf32> to vector<1x4xf32>
    %877 = vector.broadcast %876 : vector<1x4xf32> to vector<3x4xf32>
    %878 = arith.mulf %823, %877 : vector<3x4xf32>
    %879 = arith.addf %875, %878 : vector<3x4xf32>
    %880 = vector.extract_strided_slice %795 {offsets = [9, 0], sizes = [1, 4], strides = [1, 1]} : vector<16x4xf32> to vector<1x4xf32>
    %881 = vector.broadcast %880 : vector<1x4xf32> to vector<3x4xf32>
    %882 = arith.mulf %826, %881 : vector<3x4xf32>
    %883 = arith.addf %879, %882 : vector<3x4xf32>
    %884 = vector.extract_strided_slice %795 {offsets = [10, 0], sizes = [1, 4], strides = [1, 1]} : vector<16x4xf32> to vector<1x4xf32>
    %885 = vector.broadcast %884 : vector<1x4xf32> to vector<3x4xf32>
    %886 = arith.mulf %829, %885 : vector<3x4xf32>
    %887 = arith.addf %883, %886 : vector<3x4xf32>
    %888 = vector.extract_strided_slice %795 {offsets = [11, 0], sizes = [1, 4], strides = [1, 1]} : vector<16x4xf32> to vector<1x4xf32>
    %889 = vector.broadcast %888 : vector<1x4xf32> to vector<3x4xf32>
    %890 = arith.mulf %832, %889 : vector<3x4xf32>
    %891 = arith.addf %887, %890 : vector<3x4xf32>
    %892 = vector.extract_strided_slice %795 {offsets = [12, 0], sizes = [1, 4], strides = [1, 1]} : vector<16x4xf32> to vector<1x4xf32>
    %893 = vector.broadcast %892 : vector<1x4xf32> to vector<3x4xf32>
    %894 = arith.mulf %835, %893 : vector<3x4xf32>
    %895 = arith.addf %891, %894 : vector<3x4xf32>
    %896 = vector.extract_strided_slice %795 {offsets = [13, 0], sizes = [1, 4], strides = [1, 1]} : vector<16x4xf32> to vector<1x4xf32>
    %897 = vector.broadcast %896 : vector<1x4xf32> to vector<3x4xf32>
    %898 = arith.mulf %838, %897 : vector<3x4xf32>
    %899 = arith.addf %895, %898 : vector<3x4xf32>
    %900 = vector.extract_strided_slice %795 {offsets = [14, 0], sizes = [1, 4], strides = [1, 1]} : vector<16x4xf32> to vector<1x4xf32>
    %901 = vector.broadcast %900 : vector<1x4xf32> to vector<3x4xf32>
    %902 = arith.mulf %841, %901 : vector<3x4xf32>
    %903 = arith.addf %899, %902 : vector<3x4xf32>
    %904 = vector.extract_strided_slice %795 {offsets = [15, 0], sizes = [1, 4], strides = [1, 1]} : vector<16x4xf32> to vector<1x4xf32>
    %905 = vector.broadcast %904 : vector<1x4xf32> to vector<3x4xf32>
    %906 = arith.mulf %844, %905 : vector<3x4xf32>
    %907 = arith.addf %903, %906 : vector<3x4xf32>
    %908 = vector.extract_strided_slice %690 {offsets = [0, 64], sizes = [3, 1], strides = [1, 1]} : vector<32x65xf32> to vector<3x1xf32>
    %909 = vector.broadcast %908 : vector<3x1xf32> to vector<3x4xf32>
    %910 = arith.addf %907, %909 : vector<3x4xf32>
    %c0_108 = arith.constant 0 : index
    %c0_109 = arith.constant 0 : index
    %911 = vector.load %arg5[%c0_108, %c0_109] : memref<3x4xf32, #tpu.memory_space<vmem>>, vector<3x4xf32>
    tpu.vector_store %arg5[%c0_108, %c0_109], %910 {strides = array<i32>} : memref<3x4xf32, #tpu.memory_space<vmem>>, vector<3x4xf32>,
    return
  }
  func.func @transform_0(%arg0: i32) -> (i32, i32, i32) {
    %c0_i32 = arith.constant 0 : i32
    %c0_i32_0 = arith.constant 0 : i32
    %c0_i32_1 = arith.constant 0 : i32
    return %c0_i32, %c0_i32_0, %arg0 : i32, i32, i32
  }
  func.func @transform_1(%arg0: i32) -> (i32, i32) {
    %c0_i32 = arith.constant 0 : i32
    %c0_i32_0 = arith.constant 0 : i32
    return %c0_i32, %arg0 : i32, i32
  }
  func.func @transform_2(%arg0: i32) -> (i32, i32) {
    %c0_i32 = arith.constant 0 : i32
    %c0_i32_0 = arith.constant 0 : i32
    %c0_i32_1 = arith.constant 0 : i32
    return %c0_i32, %c0_i32_0 : i32, i32
  }
  func.func @transform_3(%arg0: i32) -> (i32, i32) {
    %c0_i32 = arith.constant 0 : i32
    %c0_i32_0 = arith.constant 0 : i32
    %c0_i32_1 = arith.constant 0 : i32
    return %c0_i32, %c0_i32_0 : i32, i32
  }
  func.func @transform_4(%arg0: i32) -> (i32, i32) {
    %c0_i32 = arith.constant 0 : i32
    %c0_i32_0 = arith.constant 0 : i32
    return %c0_i32, %arg0 : i32, i32
  }
}

</mosaic_0001>

<bundles_post_ra>
// kernel: tpu_custom_call.1
= control target key start
LH: loop header
LB: loop body
LE: loop exit
PB: predicated region body
PF: predicated region fallthrough
CT: control target
= control target key end

     0   :  { %9 = vsyncpa [#allocation3], 0  ;;  %s2743_s0 = inlined_call_operand.vmem [shape: f32[6,2,4], index: 0, kind: input, shape index: {}]   ;;  %s2744_s1 = inlined_call_operand.vmem [shape: f32[6,4], index: 1, kind: input, shape index: {}]   ;;  %s2745_s2 = inlined_call_operand.hbm [shape: f32[16,16], index: 2, kind: input, shape index: {}]   ;;  %s2746_s3 = inlined_call_operand.vmem [shape: f32[32,65], index: 3, kind: input, shape index: {}]   ;;  %s2747_s4 = inlined_call_operand.hbm [shape: f32[3,4], index: 4, kind: output, shape index: {}]  }
   0x1   :  { %10 = vsyncpa [#allocation4], 0  ;;  %s1871_s15 = smov [#allocation2]   ;;  %s1823_s19 = scalar_lea.hbm %s2745_s2, 256 }
   0x2   :  { %s20_s16 = sshll.u32 %s1871_s15, 4  ;;  %p1824_p0 = scmp.ne.s32.totalorder %s2745_s2, %s1823_s19  ;;  %s21_s16 = int_to_ptr.vmem [resolvable:$true] %s20_s16 }
   0x3   :  { %p1827_p1 = scmp.lt.u32.totalorder %s1823_s19, %s2745_s2 }
   0x5   :  { %p1829_p2 = pnand %p1827_p1, %p1824_p0 }
   0x7   :  { %1832 = shalt.err (!%p1829_p2)
}
   0x8   :  { %s1833_s24 = scalar_lea.vmem %s21_s16, 256  ;;  %p1838_p4 = scmp.lt.s32.totalorder %s21_s16, %s21_s16 }
   0x9   :  { %p1834_p3 = scmp.ne.s32.totalorder %s21_s16, %s1833_s24  ;;  %p1839_p5 = scmp.lt.s32.totalorder %s1833_s24, %s1833_s24 }
   0xb   :  { %p1840_p6 = por %p1839_p5, %p1838_p4 }
   0xd   :  { %p1841_p7 = pnand %p1840_p6, %p1834_p3 }
   0xf   :  { %1844 = shalt.err (!%p1841_p7)
}
  0x10   :  { %s1872_s25 = smov 128   ;;  %s1873_s26 = smov 8  }
  0x11   :  { %26 = dma.hbm_to_vmem [thread:$0]  %s2745_s2, 256, %s21_s16, [#allocation3], %s1872_s25, %s1872_s25, %s1873_s26  }
  0x12   :  { %1867 = dma.done.wait [#allocation3], 256  }
  0x13   :  { %1868 = vsyncadd [#allocation3], 4294967040  ;;  %v1874_v0 = vmov 2   ;;  %v1875_v1 = vmov 0   ;;  %v1951_v2 = vld [vmem:[#allocation2] sm:$0xff]  ;;  %v1876_v3 = vmov 1   ;;  %v165_v26 = vlaneseq }
  0x14   :  { %1654 = vset.pattern.permute.xlu0 %v1874_v0  ;;  %1656 = vset.pattern.permute.xlu1 %v1875_v1  ;;  %v1877_v4 = vmov 3   ;;  %v1959_v5 = vld [vmem:[#allocation2 + $0x8] sm:$0xff]  ;;  %v1878_v6 = vmov 4   ;;  %v2754_v7 = vmov 5   ;;  %v1880_v8 = vmov 6   ;;  %v1999_v16 = vld [vmem:[%s2746_s3] sm:$0xff] }
  0x15   :  { %36 = vperm.xlu1 %1656, %v1951_v2   ;;  %53 = vperm.xlu0 %1654, %v1951_v2   ;;  %v1881_v9 = vmov 7   ;;  %v2750_v10 = vmov 11   ;;  %v1883_v11 = vmov 8   ;;  %v2753_v12 = vmov 9   ;;  %v2007_v17 = vld [vmem:[%s2746_s3 + $0x10] sm:$0xff]  ;;  %v2015_v18 = vld [vmem:[%s2746_s3 + $0x8] sm:$0xff] }
  0x16   :  { %v1885_v13 = vmov 14   ;;  %v1886_v14 = vmov 15   ;;  %v2748_v15 = vmov 12   ;;  %v2752_v19 = vmov 10   ;;  %v2024_v20 = vld [vmem:[%s2746_s3 + $0x18] sm:$0xff]  ;;  %s1890_s19 = smov 115  }
  0x17   :  { %v1889_v21 = vmov 13   ;;  %v2084_v28 = vshrl.u32 %v165_v26, 7  ;;  %v164_v35 = vld [vmem:[%s2743_s0] sm:$0x3]  ;;  %vm1288_vm0 = vcmask 261120   ;;  %vm1564_vm1 = vcmask 26624  }
  0x19   :  { %1657 = vset.pattern.permute.xlu1 %v1876_v3  ;;  %1655 = vset.pattern.permute.xlu0 %v1877_v4  ;;  %v2091_v31 = vsub.s32 1, %v2084_v28  ;;  %v2098_v34 = vsub.s32 0, %v2084_v28 }
  0x1a   :  { %45 = vperm.xlu1 %1657, %v1951_v2   ;;  %61 = vperm.xlu0 %1655, %v1951_v2  }
  0x1b   :  { %2815 = vst [vmem:[#allocation15_spill] sm:$0xff] %v2091_v31  ;;  %v174_v36 = vrot.slane %v164_v35, %v2091_v31  ;;  %v168_v41 = vrot.slane %v164_v35, %v2098_v34 }
  0x1e   :  { %1658 = vset.pattern.permute.xlu1 %v1878_v6  ;;  %1659 = vset.pattern.permute.xlu0 %v1874_v0 }
  0x1f   :  { %69 = vperm.xlu1 %1658, %v1951_v2   ;;  %57 = vperm.xlu0 %1659, %v1959_v5  }
  0x23   :  { %1660 = vset.pattern.permute.xlu1 %v1877_v4  ;;  %1662 = vset.pattern.permute.xlu0 %v1875_v1 }
  0x24   :  { %65 = vperm.xlu1 %1660, %v1959_v5   ;;  %41 = vperm.xlu0 %1662, %v1959_v5  }
  0x28   :  { %1661 = vset.pattern.permute.xlu1 %v2754_v7  ;;  %1665 = vset.pattern.permute.xlu0 %v1880_v8 }
  0x29   :  { %77 = vperm.xlu1 %1661, %v1951_v2   ;;  %149 = vperm.xlu0 %1665, %v1951_v2  }
  0x2d   :  { %1663 = vset.pattern.permute.xlu1 %v1876_v3  ;;  %1668 = vset.pattern.permute.xlu0 %v1881_v9 }
  0x2e   :  { %49 = vperm.xlu1 %1663, %v1959_v5   ;;  %85 = vperm.xlu0 %1668, %v1951_v2  }
  0x32   :  { %1664 = vset.pattern.permute.xlu1 %v1878_v6  ;;  %1671 = vset.pattern.permute.xlu0 %v2750_v10 }
  0x33   :  { %73 = vperm.xlu1 %1664, %v1959_v5   ;;  %117 = vperm.xlu0 %1671, %v1951_v2  }
  0x37   :  { %1666 = vset.pattern.permute.xlu1 %v2754_v7  ;;  %1674 = vset.pattern.permute.xlu0 %v1883_v11 }
  0x38   :  { %81 = vperm.xlu1 %1666, %v1959_v5   ;;  %97 = vperm.xlu0 %1674, %v1959_v5  }
  0x3c   :  { %1667 = vset.pattern.permute.xlu1 %v1880_v8  ;;  %1677 = vset.pattern.permute.xlu0 %v2753_v12 }
  0x3d   :  { %153 = vperm.xlu1 %1667, %v1959_v5   ;;  %105 = vperm.xlu0 %1677, %v1959_v5  }
  0x41   :  { %1669 = vset.pattern.permute.xlu1 %v1883_v11  ;;  %1680 = vset.pattern.permute.xlu0 %v1885_v13 }
  0x42   :  { %93 = vperm.xlu1 %1669, %v1951_v2   ;;  %141 = vperm.xlu0 %1680, %v1951_v2  }
  0x46   :  { %1670 = vset.pattern.permute.xlu1 %v2753_v12  ;;  %1683 = vset.pattern.permute.xlu0 %v1886_v14 }
  0x47   :  { %101 = vperm.xlu1 %1670, %v1951_v2   ;;  %157 = vperm.xlu0 %1683, %v1951_v2  }
  0x4b   :  { %1672 = vset.pattern.permute.xlu1 %v2748_v15  ;;  %1686 = vset.pattern.permute.xlu0 %v1875_v1 }
  0x4c   :  { %125 = vperm.xlu1 %1672, %v1951_v2   ;;  %934 = vperm.xlu0 %1686, %v1999_v16  }
  0x50   :  { %1673 = vset.pattern.permute.xlu1 %v1881_v9  ;;  %944 = vperm.xlu0 %1686, %v2007_v17  }
  0x51   :  { %89 = vperm.xlu1 %1673, %v1959_v5  }
  0x54   :  { %1690 = vset.pattern.permute.xlu0 %v1876_v3 }
  0x55   :  { %1675 = vset.pattern.permute.xlu1 %v2752_v19  ;;  %957 = vperm.xlu0 %1690, %v2015_v18  }
  0x56   :  { %109 = vperm.xlu1 %1675, %v1951_v2  }
  0x59   :  { %965 = vperm.xlu0 %1690, %v2024_v20  }
  0x5a   :  { %1676 = vset.pattern.permute.xlu1 %v1889_v21 }
  0x5b   :  { %133 = vperm.xlu1 %1676, %v1951_v2  }
  0x5d   :  { %1696 = vset.pattern.permute.xlu0 %v1881_v9 }
  0x5e   :  { %1121 = vperm.xlu0 %1696, %v2015_v18  }
  0x5f   :  { %1678 = vset.pattern.permute.xlu1 %v2750_v10 }
  0x60   :  { %121 = vperm.xlu1 %1678, %v1959_v5  }
  0x62   :  { %1700 = vset.pattern.permute.xlu0 %v1883_v11 }
  0x63   :  { %1137 = vperm.xlu0 %1700, %v2015_v18  }
  0x64   :  { %1679 = vset.pattern.permute.xlu1 %v2748_v15 }
  0x65   :  { %129 = vperm.xlu1 %1679, %v1959_v5  }
  0x67   :  { %1701 = vset.pattern.permute.xlu0 %v1880_v8 }
  0x68   :  { %1101 = vperm.xlu0 %1701, %v1999_v16  }
  0x69   :  { %1681 = vset.pattern.permute.xlu1 %v2752_v19 }
  0x6a   :  { %113 = vperm.xlu1 %1681, %v1959_v5  }
  0x6c   :  { %1113 = vperm.xlu0 %1701, %v2024_v20  }
  0x6e   :  { %1682 = vset.pattern.permute.xlu1 %v1889_v21 }
  0x6f   :  { %137 = vperm.xlu1 %1682, %v1959_v5  }
  0x70   :  { %1705 = vset.pattern.permute.xlu0 %v1878_v6 }
  0x71   :  { %1001 = vperm.xlu0 %1705, %v1999_v16  }
  0x73   :  { %1684 = vset.pattern.permute.xlu1 %v1885_v13 }
  0x74   :  { %145 = vperm.xlu1 %1684, %v1959_v5  }
  0x75   :  { %1013 = vperm.xlu0 %1705, %v2024_v20  }
  0x78   :  { %1685 = vset.pattern.permute.xlu1 %v1886_v14 }
  0x79   :  { %161 = vperm.xlu1 %1685, %v1959_v5   ;;  %1709 = vset.pattern.permute.xlu0 %v2754_v7 }
  0x7a   :  { %1017 = vperm.xlu0 %1709, %v1999_v16  }
  0x7d   :  { %1687 = vset.pattern.permute.xlu1 %v1875_v1 }
  0x7e   :  { %939 = vperm.xlu1 %1687, %v2015_v18   ;;  %1025 = vperm.xlu0 %1709, %v2007_v17  }
  0x82   :  { %1688 = vset.pattern.permute.xlu1 %v1876_v3  ;;  %1711 = vset.pattern.permute.xlu0 %v2753_v12 }
  0x83   :  { %953 = vperm.xlu1 %1688, %v1999_v16   ;;  %1149 = vperm.xlu0 %1711, %v1999_v16  }
  0x87   :  { %1689 = vset.pattern.permute.xlu1 %v1874_v0  ;;  %1161 = vperm.xlu0 %1711, %v2024_v20  }
  0x88   :  { %969 = vperm.xlu1 %1689, %v1999_v16  }
  0x8b   :  { %1715 = vset.pattern.permute.xlu0 %v2752_v19 }
  0x8c   :  { %973 = vperm.xlu1 %1689, %v2015_v18   ;;  %1221 = vperm.xlu0 %1715, %v2007_v17  }
  0x90   :  { %1691 = vset.pattern.permute.xlu1 %v1875_v1  ;;  %1717 = vset.pattern.permute.xlu0 %v2750_v10 }
  0x91   :  { %949 = vperm.xlu1 %1691, %v2024_v20   ;;  %1241 = vperm.xlu0 %1717, %v2015_v18  }
  0x94   :  { %v2066_v22 = vpop.permute.xlu1 %36  ;;  %v2070_v23 = vpop.permute.xlu0 %53 }
  0x95   :  { %2808 = vst [vmem:[#allocation8_spill] sm:$0xff] %v2066_v22  ;;  %1692 = vset.pattern.permute.xlu1 %v1876_v3  ;;  %1245 = vperm.xlu0 %1717, %v2007_v17   ;;  %2809 = vst [vmem:[#allocation9_spill] sm:$0xff] %v2070_v23  ;;  %v271_v32 = vmul.f32 0.0, %v2070_v23  ;;  %v169_v45 = vmul.f32 %v168_v41, %v2066_v22 }
  0x96   :  { %961 = vperm.xlu1 %1692, %v2007_v17  }
  0x99   :  { %v2073_v24 = vpop.permute.xlu1 %45  ;;  %1720 = vset.pattern.permute.xlu0 %v2748_v15  ;;  %v2079_v25 = vpop.permute.xlu0 %61 }
  0x9a   :  { %2810 = vst [vmem:[#allocation10_spill] sm:$0xff] %v2073_v24  ;;  %1693 = vset.pattern.permute.xlu1 %v1877_v4  ;;  %1265 = vperm.xlu0 %1720, %v2007_v17   ;;  %2811 = vst [vmem:[#allocation11_spill] sm:$0xff] %v2079_v25  ;;  %v273_v33 = vmul.f32 0.0, %v2079_v25  ;;  %v175_v43 = vmul.f32 %v174_v36, %v2073_v24 }
  0x9b   :  { %985 = vperm.xlu1 %1693, %v1999_v16  }
  0x9c   :  { %v275_v39 = vadd.f32 %v273_v33, %v271_v32  ;;  %v177_v48 = vadd.f32 %v175_v43, %v169_v45 }
  0x9e   :  { %v2081_v27 = vpop.permute.xlu1 %69  ;;  %v2086_v29 = vpop.permute.xlu0 %57  ;;  %1286 = vrot.lane.b32.xlu0 %v2015_v18, %s1890_s19 }
  0x9f   :  { %2812 = vst [vmem:[#allocation12_spill] sm:$0xff] %v2081_v27  ;;  %989 = vperm.xlu1 %1693, %v2015_v18   ;;  %2813 = vst [vmem:[#allocation13_spill] sm:$0xff] %v2086_v29  ;;  %v277_v40 = vmul.f32 0.0, %v2081_v27  ;;  %v272_v53 = vmul.f32 0.0, %v2086_v29 }
  0xa1   :  { %v279_v44 = vadd.f32 %v277_v40, %v275_v39 }
  0xa3   :  { %v2088_v30 = vpop.permute.xlu1 %65  ;;  %1694 = vset.pattern.permute.xlu1 %v1880_v8  ;;  %v2104_v37 = vpop.permute.xlu0 %41 }
  0xa4   :  { %2814 = vst [vmem:[#allocation14_spill] sm:$0xff] %v2088_v30  ;;  %1105 = vperm.xlu1 %1694, %v2015_v18   ;;  %2816 = vst [vmem:[#allocation16_spill] sm:$0xff] %v2104_v37  ;;  %v274_v54 = vmul.f32 0.0, %v2088_v30  ;;  %v170_v55 = vmul.f32 %v168_v41, %v2104_v37 }
  0xa6   :  { %v276_v60 = vadd.f32 %v274_v54, %v272_v53 }
  0xa8   :  { %v2106_v38 = vpop.permute.xlu1 %77  ;;  %1695 = vset.pattern.permute.xlu1 %v1881_v9  ;;  %v2118_v47 = vpop.permute.xlu0 %149 }
  0xa9   :  { %2817 = vst [vmem:[#allocation17_spill] sm:$0xff] %v2106_v38  ;;  %1117 = vperm.xlu1 %1695, %v1999_v16   ;;  %v281_v42 = vmul.f32 0.0, %v2106_v38  ;;  %2819 = vst [vmem:[#allocation19_spill] sm:$0xff] %v2118_v47  ;;  %v179_v50 = vadd.f32 %v177_v48, %v2118_v47 }
  0xab   :  { %v283_v49 = vadd.f32 %v281_v42, %v279_v44 }
  0xad   :  { %v2115_v46 = vpop.permute.xlu1 %49  ;;  %1697 = vset.pattern.permute.xlu1 %v1874_v0  ;;  %v285_v52 = vadd.f32 %v283_v49, %v179_v50  ;;  %v2155_v41 = vpop.permute.xlu0 %85  ;;  %v2176_v49 = vsub.s32 4, %v2084_v28  ;;  %v2179_v50 = vsub.s32 5, %v2084_v28 }
  0xae   :  { %2818 = vst [vmem:[#allocation18_spill] sm:$0xff] %v2115_v46  ;;  %977 = vperm.xlu1 %1697, %v2007_v17   ;;  %v176_v57 = vmul.f32 %v174_v36, %v2115_v46  ;;  %2826 = vst [vmem:[#allocation26_spill] sm:$0xff] %v2155_v41 }
  0xaf   :  { %v287_v56 = vmul.f32 0.5, %v285_v52  ;;  %v2182_v52 = vsub.s32 6, %v2084_v28 }
  0xb0   :  { %v178_v63 = vadd.f32 %v176_v57, %v170_v55 }
  0xb1   :  { %1745 = vtanh.f32 %v287_v56  ;;  %v2187_v56 = vsub.s32 7, %v2084_v28 }
  0xb2   :  { %v2122_v51 = vpop.permute.xlu1 %73  ;;  %981 = vperm.xlu1 %1697, %v2024_v20   ;;  %v2164_v44 = vpop.permute.xlu0 %117 }
  0xb3   :  { %2820 = vst [vmem:[#allocation20_spill] sm:$0xff] %v2122_v51  ;;  %v278_v58 = vmul.f32 0.0, %v2122_v51  ;;  %2827 = vst [vmem:[#allocation27_spill] sm:$0xff] %v2164_v44 }
  0xb5   :  { %v280_v62 = vadd.f32 %v278_v58, %v276_v60 }
  0xb6   :  { %1698 = vset.pattern.permute.xlu1 %v1878_v6 }
  0xb7   :  { %v2131_v59 = vpop.permute.xlu1 %81  ;;  %1005 = vperm.xlu1 %1698, %v2015_v18   ;;  %v2169_v48 = vpop.permute.xlu0 %97 }
  0xb8   :  { %2821 = vst [vmem:[#allocation21_spill] sm:$0xff] %v2131_v59  ;;  %v282_v61 = vmul.f32 0.0, %v2131_v59  ;;  %2829 = vst [vmem:[#allocation29_spill] sm:$0xff] %v2169_v48 }
  0xba   :  { %v284_v1 = vadd.f32 %v282_v61, %v280_v62 }
  0xbb   :  { %1699 = vset.pattern.permute.xlu1 %v1883_v11  ;;  %v1746_v14 = vpop.eup %1745 }
  0xbc   :  { %v2136_v0 = vpop.permute.xlu1 %153  ;;  %1133 = vperm.xlu1 %1699, %v1999_v16   ;;  %v291_v26 = vmul.f32 0.5, %v1746_v14 }
  0xbd   :  { %2822 = vst [vmem:[#allocation22_spill] sm:$0xff] %v2136_v0  ;;  %v180_v2 = vadd.f32 %v178_v63, %v2136_v0 }
  0xbe   :  { %v292_v33 = vadd.f32 0.5, %v291_v26 }
  0xbf   :  { %v286_v3 = vadd.f32 %v284_v1, %v180_v2  ;;  %v2195_v1 = vpop.permute.xlu0 %105 }
  0xc0   :  { %1702 = vset.pattern.permute.xlu1 %v1877_v4  ;;  %v295_v36 = vmul.f32 0.0, %v292_v33 }
  0xc1   :  { %v288_v5 = vmul.f32 0.5, %v286_v3  ;;  %v2141_v13 = vpop.permute.xlu1 %93  ;;  %993 = vperm.xlu1 %1702, %v2007_v17  }
  0xc2   :  { %2823 = vst [vmem:[#allocation23_spill] sm:$0xff] %v2141_v13 }
  0xc3   :  { %1747 = vtanh.f32 %v288_v5 }
  0xc5   :  { %997 = vperm.xlu1 %1702, %v2024_v20  }
  0xc6   :  { %v2145_v21 = vpop.permute.xlu1 %101 }
  0xc9   :  { %1703 = vset.pattern.permute.xlu1 %v2754_v7 }
  0xca   :  { %1021 = vperm.xlu1 %1703, %v2015_v18  }
  0xcb   :  { %v2149_v32 = vpop.permute.xlu1 %125 }
  0xcc   :  { %2824 = vst [vmem:[#allocation24_spill] sm:$0xff] %v2149_v32 }
  0xcd   :  { %v1748_v4 = vpop.eup %1747 }
  0xce   :  { %v296_v35 = vmul.f32 %v1748_v4, %v292_v33  ;;  %1704 = vset.pattern.permute.xlu1 %v1880_v8  ;;  %v293_v8 = vmul.f32 0.5, %v1748_v4 }
  0xcf   :  { %1109 = vperm.xlu1 %1704, %v2007_v17  }
  0xd0   :  { %v298_v39 = vrot.slane %v296_v35, 4  ;;  %v2153_v40 = vpop.permute.xlu1 %89  ;;  %v294_v53 = vadd.f32 0.5, %v293_v8  ;;  %v335_v8 = vmul.f32 0.0, %v2164_v44 }
  0xd1   :  { %2825 = vst [vmem:[#allocation25_spill] sm:$0xff] %v2153_v40 }
  0xd2   :  { %v2157_v42 = vadd.f32 %v298_v39, %v295_v36  ;;  %v337_v39 = vmul.f32 0.0, %v2149_v32 }
  0xd3   :  { %1706 = vset.pattern.permute.xlu1 %v1881_v9  ;;  %v1581_v9 = vld [vmem:[%s2743_s0 + $0x2] sm:$0x3] }
  0xd4   :  { %1749 = vtanh.f32 %v2157_v42  ;;  %1125 = vperm.xlu1 %1706, %v2007_v17   ;;  %v192_v55 = vrot.slane %v1581_v9, %v2091_v31  ;;  %v186_v60 = vrot.slane %v1581_v9, %v2098_v34 }
  0xd5   :  { %v2162_v43 = vpop.permute.xlu1 %109 }
  0xd6   :  { %v188_v2 = vmul.f32 %v186_v60, %v2104_v37  ;;  %v193_v3 = vmul.f32 %v192_v55, %v2073_v24  ;;  %v194_v5 = vmul.f32 %v192_v55, %v2115_v46 }
  0xd8   :  { %1129 = vperm.xlu1 %1706, %v2024_v20   ;;  %v196_v10 = vadd.f32 %v194_v5, %v188_v2  ;;  %v339_v2 = vadd.f32 %v337_v39, %v335_v8  ;;  %v2830_v8 = vmov 5  }
  0xda   :  { %v2167_v45 = vpop.permute.xlu1 %133 }
  0xdb   :  { %2828 = vst [vmem:[#allocation28_spill] sm:$0xff] %v2167_v45 }
  0xdc   :  { %1707 = vset.pattern.permute.xlu1 %v2753_v12 }
  0xdd   :  { %1153 = vperm.xlu1 %1707, %v2015_v18  }
  0xde   :  { %v1750_v54 = vpop.eup %1749 }
  0xdf   :  { %v302_v57 = vmul.f32 %v1750_v54, %v294_v53  ;;  %v2189_v58 = vpop.permute.xlu1 %121 }
  0xe1   :  { %v306_v61 = vrot.slane %v302_v57, %v2176_v49  ;;  %v312_v62 = vrot.slane %v302_v57, %v2179_v50  ;;  %v320_v63 = vrot.slane %v302_v57, %v2182_v52  ;;  %1708 = vset.pattern.permute.xlu1 %v1878_v6  ;;  %v328_v14 = vrot.slane %v302_v57, %v2187_v56 }
  0xe2   :  { %1009 = vperm.xlu1 %1708, %v2007_v17   ;;  %v187_v6 = vmul.f32 %v186_v60, %v2066_v22  ;;  %v341_v60 = vmul.f32 0.0, %v2167_v45 }
  0xe3   :  { %v367_v26 = vmul.f32 %v306_v61, %v2070_v23  ;;  %v368_v33 = vmul.f32 %v306_v61, %v2086_v29  ;;  %v369_v4 = vmul.f32 %v312_v62, %v2079_v25  ;;  %v370_v35 = vmul.f32 %v312_v62, %v2088_v30 }
  0xe4   :  { %v373_v36 = vmul.f32 %v320_v63, %v2081_v27  ;;  %v2211_v9 = vpop.permute.xlu1 %129  ;;  %v374_v55 = vmul.f32 %v320_v63, %v2122_v51  ;;  %v313_v57 = vmul.f32 %v312_v62, %v2141_v13  ;;  %v195_v15 = vadd.f32 %v193_v3, %v187_v6 }
  0xe5   :  { %v371_v53 = vadd.f32 %v369_v4, %v367_v26  ;;  %v372_v54 = vadd.f32 %v370_v35, %v368_v33  ;;  %v307_v19 = vmul.f32 %v306_v61, %v2155_v41  ;;  %v377_v32 = vmul.f32 %v328_v14, %v2106_v38  ;;  %v2220_v26 = vpop.permute.xlu0 %141 }
  0xe6   :  { %1710 = vset.pattern.permute.xlu1 %v1883_v11  ;;  %v378_v44 = vmul.f32 %v328_v14, %v2131_v59  ;;  %v321_v33 = vmul.f32 %v320_v63, %v2145_v21  ;;  %v197_v5 = vadd.f32 %v195_v15, %v2118_v47  ;;  %v198_v4 = vadd.f32 %v196_v10, %v2136_v0 }
  0xe7   :  { %v375_v12 = vadd.f32 %v373_v36, %v371_v53  ;;  %v376_v7 = vadd.f32 %v374_v55, %v372_v54  ;;  %1141 = vperm.xlu1 %1710, %v2007_v17   ;;  %v315_v3 = vadd.f32 %v313_v57, %v307_v19  ;;  %v329_v36 = vmul.f32 %v328_v14, %v2162_v43 }
  0xe8   :  { %v343_v53 = vadd.f32 %v341_v60, %v339_v2  ;;  %v345_v54 = vmul.f32 0.0, %v2220_v26  ;;  %v308_v10 = vmul.f32 %v306_v61, %v2153_v40  ;;  %v336_v61 = vmul.f32 0.0, %v2189_v58 }
  0xe9   :  { %v379_v35 = vadd.f32 %v377_v32, %v375_v12  ;;  %v380_v11 = vadd.f32 %v378_v44, %v376_v7  ;;  %v2226_v6 = vpop.permute.xlu1 %113  ;;  %v323_v55 = vadd.f32 %v321_v33, %v315_v3  ;;  %v2230_v38 = vpop.permute.xlu0 %157  ;;  %v314_v7 = vmul.f32 %v312_v62, %v2169_v48 }
  0xea   :  { %v347_v12 = vadd.f32 %v345_v54, %v343_v53  ;;  %v338_v33 = vmul.f32 0.0, %v2211_v9  ;;  %v330_v62 = vmul.f32 %v328_v14, %v2226_v6 }
  0xeb   :  { %v381_v45 = vadd.f32 %v379_v35, %v197_v5  ;;  %v382_v59 = vadd.f32 %v380_v11, %v198_v4  ;;  %1145 = vperm.xlu1 %1710, %v2024_v20   ;;  %v331_v19 = vadd.f32 %v329_v36, %v323_v55  ;;  %v316_v60 = vadd.f32 %v314_v7, %v308_v10 }
  0xec   :  { %v2831_v5 = vmov 9   ;;  %v340_v35 = vadd.f32 %v338_v33, %v336_v61 }
  0xed   :  { %v383_v15 = vmul.f32 0.5, %v381_v45  ;;  %v333_v32 = vadd.f32 %v331_v19, %v2230_v38  ;;  %v384_v39 = vmul.f32 0.5, %v382_v59  ;;  %v322_v45 = vmul.f32 %v320_v63, %v2195_v1 }
  0xee   :  { %v2236_v44 = vpop.permute.xlu1 %137  ;;  %v2832_v19 = vmov 10  }
  0xef   :  { %1751 = vtanh.f32 %v383_v15  ;;  %1712 = vset.pattern.permute.xlu1 %v2830_v8  ;;  %v349_v57 = vadd.f32 %v347_v12, %v333_v32  ;;  %v342_v2 = vmul.f32 0.0, %v2236_v44  ;;  %v324_v4 = vadd.f32 %v322_v45, %v316_v60 }
  0xf0   :  { %1029 = vperm.xlu1 %1712, %v2024_v20   ;;  %1753 = vtanh.f32 %v384_v39 }
  0xf1   :  { %v351_v3 = vmul.f32 0.5, %v349_v57  ;;  %v344_v63 = vadd.f32 %v342_v2, %v340_v35  ;;  %v332_v36 = vadd.f32 %v330_v62, %v324_v4  ;;  %v1582_v62 = vld [vmem:[%s2743_s0 + $0x4] sm:$0x3] }
  0xf2   :  { %v210_v2 = vrot.slane %v1582_v62, %v2091_v31  ;;  %v204_v35 = vrot.slane %v1582_v62, %v2098_v34  ;;  %v2294_v62 = vsub.s32 2, %v2084_v28 }
  0xf3   :  { %v2245_v59 = vpop.permute.xlu1 %145  ;;  %1755 = vtanh.f32 %v351_v3  ;;  %v2833_v3 = vmov 11  }
  0xf4   :  { %1713 = vset.pattern.permute.xlu1 %v2831_v5  ;;  %v346_v11 = vmul.f32 0.0, %v2245_v59  ;;  %2836 = vst [vmem:[#allocation31_spill] sm:$0xff] %v2294_v62 }
  0xf5   :  { %1157 = vperm.xlu1 %1713, %v2007_v17  }
  0xf6   :  { %v348_v14 = vadd.f32 %v346_v11, %v344_v63 }
  0xf8   :  { %v2250_v53 = vpop.permute.xlu1 %161 }
  0xf9   :  { %v1752_v54 = vpop.eup %1751  ;;  %v334_v55 = vadd.f32 %v332_v36, %v2250_v53  ;;  %1714 = vset.pattern.permute.xlu1 %v2832_v19  ;;  %v211_v36 = vmul.f32 %v210_v2, %v2073_v24  ;;  %v2834_v19 = vmov 12  }
  0xfa   :  { %v387_v15 = vmul.f32 0.5, %v1752_v54  ;;  %1213 = vperm.xlu1 %1714, %v1999_v16   ;;  %v1754_v12 = vpop.eup %1753  ;;  %v2274_v54 = vld [vmem:[%s2744_s1] sm:$0x3f] }
  0xfb   :  { %v350_v10 = vadd.f32 %v348_v14, %v334_v55  ;;  %v389_v11 = vmul.f32 0.5, %v1754_v12  ;;  %v935_v55 = vpop.permute.xlu0 %934 }
  0xfc   :  { %v388_v7 = vadd.f32 0.5, %v387_v15  ;;  %v206_v15 = vmul.f32 %v204_v35, %v2104_v37 }
  0xfd   :  { %v352_v32 = vmul.f32 0.5, %v350_v10  ;;  %v2255_v39 = vpop.permute.xlu1 %939  ;;  %v1756_v60 = vpop.eup %1755  ;;  %v212_v10 = vmul.f32 %v210_v2, %v2115_v46 }
  0xfe   :  { %v392_v17 = vmul.f32 %v1754_v12, %v388_v7  ;;  %1217 = vperm.xlu1 %1714, %v2015_v18   ;;  %v391_v8 = vmul.f32 %v388_v7, %v2157_v42  ;;  %v355_v61 = vmul.f32 0.5, %v1756_v60  ;;  %v205_v12 = vmul.f32 %v204_v35, %v2066_v22 }
  0xff   :  { %1757 = vtanh.f32 %v352_v32  ;;  %v2287_v60 = vrot.slane %v2274_v54, %v2098_v34  ;;  %v2305_v37 = vpop.permute.xlu0 %944 }
 0x100   :  { %v394_v57 = vrot.slane %v392_v17, 4  ;;  %v356_v42 = vadd.f32 0.5, %v355_v61  ;;  %v390_v17 = vadd.f32 0.5, %v389_v11  ;;  %v2291_v61 = vrot.slane %v2274_v54, %v2091_v31 }
 0x101   :  { %v213_v2 = vadd.f32 %v211_v36, %v205_v12 }
 0x102   :  { %v2259_v33 = vadd.f32 %v394_v57, %v391_v8  ;;  %v954_v45 = vpop.permute.xlu1 %953  ;;  %1225 = vperm.xlu1 %1714, %v2024_v20   ;;  %v359_v7 = vmul.f32 0.0, %v356_v42 }
 0x103   :  { %v1044_v35 = vmul.f32 %v2291_v61, %v954_v45  ;;  %v215_v36 = vadd.f32 %v213_v2, %v2118_v47 }
 0x104   :  { %1759 = vtanh.f32 %v2259_v33 }
 0x106   :  { %1716 = vset.pattern.permute.xlu1 %v2833_v3 }
 0x107   :  { %v970_v5 = vpop.permute.xlu1 %969  ;;  %1237 = vperm.xlu1 %1716, %v1999_v16  }
 0x109   :  { %v1758_v4 = vpop.eup %1757 }
 0x10a   :  { %v360_v63 = vmul.f32 %v1758_v4, %v356_v42 }
 0x10b   :  { %v2276_v14 = vpop.permute.xlu1 %973  ;;  %1718 = vset.pattern.permute.xlu1 %v2834_v19 }
 0x10c   :  { %v362_v32 = vrot.slane %v360_v63, 4  ;;  %1257 = vperm.xlu1 %1718, %v1999_v16   ;;  %v214_v63 = vadd.f32 %v212_v10, %v206_v15  ;;  %v2312_v10 = vrot.slane %v2274_v54, %v2294_v62 }
 0x10e   :  { %v1760_v8 = vpop.eup %1759  ;;  %v2283_v57 = vadd.f32 %v362_v32, %v359_v7  ;;  %v1036_v7 = vmul.f32 %v2287_v60, %v935_v55  ;;  %v216_v15 = vadd.f32 %v214_v63, %v2136_v0  ;;  %v1056_v2 = vmul.f32 %v2312_v10, %v970_v5 }
 0x10f   :  { %v398_v42 = vmul.f32 %v1760_v8, %v390_v17  ;;  %v2330_v5 = vsub.s32 3, %v2084_v28 }
 0x110   :  { %2835 = vst [vmem:[#allocation30_spill] sm:$0xff] %v2283_v57  ;;  %1761 = vtanh.f32 %v2283_v57  ;;  %v2298_v11 = vpop.permute.xlu1 %949  ;;  %1261 = vperm.xlu1 %1718, %v2015_v18   ;;  %v357_v57 = vmul.f32 0.5, %v1758_v4  ;;  %v1048_v63 = vadd.f32 %v1044_v35, %v1036_v7  ;;  %v2838_v7 = vld [vmem:[#allocation17_spill] sm:$0xff] }
 0x111   :  { %v402_v32 = vrot.slane %v398_v42, %v2176_v49  ;;  %v408_v46 = vrot.slane %v398_v42, %v2179_v50  ;;  %v416_v22 = vrot.slane %v398_v42, %v2182_v52  ;;  %v424_v45 = vrot.slane %v398_v42, %v2187_v56  ;;  %2837 = vst [vmem:[#allocation32_spill] sm:$0xff] %v2330_v5 }
 0x113   :  { %v479_v55 = vmul.f32 %v402_v32, %v2070_v23  ;;  %v480_v12 = vmul.f32 %v402_v32, %v2086_v29  ;;  %v481_v17 = vmul.f32 %v408_v46, %v2079_v25  ;;  %v482_v8 = vmul.f32 %v408_v46, %v2088_v30 }
 0x114   :  { %v485_v24 = vmul.f32 %v416_v22, %v2081_v27  ;;  %1719 = vset.pattern.permute.xlu1 %v2833_v3  ;;  %v486_v62 = vmul.f32 %v416_v22, %v2122_v51  ;;  %v409_v47 = vmul.f32 %v408_v46, %v2141_v13  ;;  %v403_v30 = vmul.f32 %v402_v32, %v2155_v41 }
 0x115   :  { %v483_v42 = vadd.f32 %v481_v17, %v479_v55  ;;  %v484_v0 = vadd.f32 %v482_v8, %v480_v12  ;;  %v2323_v23 = vpop.permute.xlu1 %961  ;;  %1249 = vperm.xlu1 %1719, %v2024_v20   ;;  %v404_v27 = vmul.f32 %v402_v32, %v2153_v40  ;;  %v410_v4 = vmul.f32 %v408_v46, %v2169_v48  ;;  %v2839_v12 = vld [vmem:[#allocation21_spill] sm:$0xff]  ;;  %v958_v8 = vpop.permute.xlu0 %957 }
 0x116   :  { %v489_v55 = vmul.f32 %v424_v45, %v2838_v7  ;;  %v490_v17 = vmul.f32 %v424_v45, %v2839_v12  ;;  %v1037_v51 = vmul.f32 %v2287_v60, %v2255_v39  ;;  %v1060_v25 = vadd.f32 %v1056_v2, %v1048_v63 }
 0x117   :  { %v487_v3 = vadd.f32 %v485_v24, %v483_v42  ;;  %v488_v35 = vadd.f32 %v486_v62, %v484_v0  ;;  %v412_v13 = vadd.f32 %v410_v4, %v404_v27  ;;  %v1045_v41 = vmul.f32 %v2291_v61, %v958_v8 }
 0x118   :  { %v411_v46 = vadd.f32 %v409_v47, %v403_v30  ;;  %v358_v48 = vadd.f32 0.5, %v357_v57  ;;  %v418_v28 = vmul.f32 %v416_v22, %v2195_v1  ;;  %v1057_v0 = vmul.f32 %v2312_v10, %v2276_v14 }
 0x119   :  { %v491_v32 = vadd.f32 %v489_v55, %v487_v3  ;;  %v492_v40 = vadd.f32 %v490_v17, %v488_v35  ;;  %1721 = vset.pattern.permute.xlu1 %v2834_v19  ;;  %v2343_v27 = vrot.slane %v2274_v54, %v2330_v5  ;;  %v417_v30 = vmul.f32 %v416_v22, %v2145_v21 }
 0x11a   :  { %v1762_v24 = vpop.eup %1761  ;;  %v986_v39 = vpop.permute.xlu1 %985  ;;  %1269 = vperm.xlu1 %1721, %v2024_v20   ;;  %v425_v19 = vmul.f32 %v424_v45, %v2162_v43  ;;  %v420_v57 = vadd.f32 %v418_v28, %v412_v13  ;;  %v426_v63 = vmul.f32 %v424_v45, %v2226_v6  ;;  %v1049_v42 = vadd.f32 %v1045_v41, %v1037_v51  ;;  %v2841_v51 = vld [vmem:[#allocation24_spill] sm:$0xff] }
 0x11b   :  { %v493_v62 = vadd.f32 %v491_v32, %v215_v36  ;;  %v494_v2 = vadd.f32 %v492_v40, %v216_v15  ;;  %v366_v47 = vmul.f32 %v1762_v24, %v358_v48  ;;  %v419_v14 = vadd.f32 %v417_v30, %v411_v46  ;;  %v2840_v36 = vld [vmem:[#allocation27_spill] sm:$0xff]  ;;  %v2842_v24 = vld [vmem:[#allocation28_spill] sm:$0xff] }
 0x11c   :  { %v1068_v22 = vmul.f32 %v2343_v27, %v986_v39  ;;  %v1061_v17 = vadd.f32 %v1057_v0, %v1049_v42  ;;  %v428_v32 = vadd.f32 %v426_v63, %v420_v57 }
 0x11d   :  { %v495_v4 = vmul.f32 0.5, %v493_v62  ;;  %v434_v3 = vrot.slane %v366_v47, %v2176_v49  ;;  %v440_v35 = vrot.slane %v366_v47, %v2179_v50  ;;  %v496_v55 = vmul.f32 0.5, %v494_v2 }
 0x11e   :  { %v448_v20 = vrot.slane %v366_v47, %v2182_v52  ;;  %v456_v40 = vrot.slane %v366_v47, %v2187_v56  ;;  %v990_v48 = vpop.permute.xlu1 %989  ;;  %v427_v8 = vadd.f32 %v425_v19, %v419_v14  ;;  %v2361_v30 = vadd.f32 %v1068_v22, %v1060_v25  ;;  %1284 = vrot.lane.b32.xlu1 %v1999_v16, %s1890_s19 }
 0x11f   :  { %1763 = vtanh.f32 %v495_v4  ;;  %v435_v13 = vmul.f32 %v434_v3, %v2840_v36  ;;  %v436_v15 = vmul.f32 %v434_v3, %v2189_v58  ;;  %v441_v41 = vmul.f32 %v440_v35, %v2841_v51 }
 0x120   :  { %v442_v45 = vmul.f32 %v440_v35, %v2211_v9  ;;  %v449_v28 = vmul.f32 %v448_v20, %v2842_v24  ;;  %v450_v2 = vmul.f32 %v448_v20, %v2236_v44  ;;  %v1069_v39 = vmul.f32 %v2343_v27, %v990_v48  ;;  %2843 = vst [vmem:[#allocation17_spill] sm:$0xff] %v2361_v30 }
 0x121   :  { %v443_v46 = vadd.f32 %v441_v41, %v435_v13  ;;  %1765 = vtanh.f32 %v496_v55  ;;  %v457_v4 = vmul.f32 %v456_v40, %v2220_v26  ;;  %v458_v0 = vmul.f32 %v456_v40, %v2245_v59 }
 0x122   :  { %v444_v62 = vadd.f32 %v442_v45, %v436_v15  ;;  %v1073_v19 = vadd.f32 %v1069_v39, %v1061_v17  ;;  %v429_v57 = vadd.f32 %v427_v8, %v2230_v38  ;;  %v430_v42 = vadd.f32 %v428_v32, %v2250_v53  ;;  %v966_v45 = vpop.permute.xlu0 %965 }
 0x123   :  { %v451_v47 = vadd.f32 %v449_v28, %v443_v46  ;;  %v2364_v3 = vpop.permute.xlu1 %1105  ;;  %v1046_v25 = vmul.f32 %v2291_v61, %v2323_v23  ;;  %v1038_v22 = vmul.f32 %v2287_v60, %v2305_v37  ;;  %v1039_v8 = vmul.f32 %v2287_v60, %v2298_v11 }
 0x124   :  { %2844 = vst [vmem:[#allocation27_spill] sm:$0xff] %v2364_v3  ;;  %v452_v35 = vadd.f32 %v450_v2, %v444_v62  ;;  %v1047_v46 = vmul.f32 %v2291_v61, %v966_v45  ;;  %v2387_v61 = vrot.slane %v2274_v54, %v2176_v49  ;;  %v2859_v3 = vld [vmem:[#allocation26_spill] sm:$0xff] }
 0x125   :  { %v459_v63 = vadd.f32 %v457_v4, %v451_v47  ;;  %v1050_v32 = vadd.f32 %v1046_v25, %v1038_v22 }
 0x126   :  { %v460_v14 = vadd.f32 %v458_v0, %v452_v35  ;;  %v1051_v47 = vadd.f32 %v1047_v46, %v1039_v8  ;;  %2846 = vst [vmem:[#allocation28_spill] sm:$0xff] %v2387_v61  ;;  %v2849_v46 = vld [vmem:[#allocation10_spill] sm:$0xff] }
 0x127   :  { %v461_v20 = vadd.f32 %v459_v63, %v429_v57 }
 0x128   :  { %v462_v48 = vadd.f32 %v460_v14, %v430_v42  ;;  %v2371_v55 = vpop.permute.xlu1 %1117 }
 0x129   :  { %2845 = vst [vmem:[#allocation24_spill] sm:$0xff] %v2371_v55  ;;  %v1764_v13 = vpop.eup %1763  ;;  %v463_v15 = vmul.f32 0.5, %v461_v20 }
 0x12a   :  { %v499_v40 = vmul.f32 0.5, %v1764_v13  ;;  %v464_v41 = vmul.f32 0.5, %v462_v48  ;;  %v1583_v48 = vld [vmem:[%s2743_s0 + $0x6] sm:$0x3] }
 0x12b   :  { %1767 = vtanh.f32 %v463_v15  ;;  %v1766_v28 = vpop.eup %1765  ;;  %v228_v22 = vrot.slane %v1583_v48, %v2091_v31 }
 0x12c   :  { %v500_v17 = vadd.f32 0.5, %v499_v40  ;;  %1769 = vtanh.f32 %v464_v41  ;;  %v222_v40 = vrot.slane %v1583_v48, %v2098_v34  ;;  %v2848_v41 = vld [vmem:[#allocation30_spill] sm:$0xff] }
 0x12d   :  { %v978_v23 = vpop.permute.xlu1 %977 }
 0x12e   :  { %v504_v62 = vmul.f32 %v1766_v28, %v500_v17  ;;  %v1058_v2 = vmul.f32 %v2312_v10, %v978_v23  ;;  %v503_v37 = vmul.f32 %v500_v17, %v2259_v33 }
 0x130   :  { %v506_v39 = vrot.slane %v504_v62, 4  ;;  %v2380_v4 = vadd.f32 %v1058_v2, %v1050_v32  ;;  %v2850_v62 = vld [vmem:[#allocation16_spill] sm:$0xff] }
 0x131   :  { %v982_v35 = vpop.permute.xlu1 %981  ;;  %v224_v2 = vmul.f32 %v222_v40, %v2850_v62 }
 0x132   :  { %v2382_v0 = vadd.f32 %v506_v39, %v503_v37  ;;  %v1059_v60 = vmul.f32 %v2312_v10, %v982_v35  ;;  %v501_v10 = vmul.f32 0.5, %v1766_v28  ;;  %v2851_v37 = vld [vmem:[#allocation8_spill] sm:$0xff] }
 0x133   :  { %v223_v39 = vmul.f32 %v222_v40, %v2851_v37  ;;  %v2855_v40 = vld [vmem:[#allocation14_spill] sm:$0xff] }
 0x134   :  { %1771 = vtanh.f32 %v2382_v0  ;;  %v2390_v11 = vadd.f32 %v1059_v60, %v1051_v47  ;;  %v502_v8 = vadd.f32 0.5, %v501_v10  ;;  %v2852_v47 = vld [vmem:[#allocation18_spill] sm:$0xff]  ;;  %v2854_v10 = vld [vmem:[#allocation11_spill] sm:$0xff] }
 0x135   :  { %v1768_v57 = vpop.eup %1767  ;;  %v230_v16 = vmul.f32 %v228_v22, %v2852_v47 }
 0x136   :  { %v467_v63 = vmul.f32 0.5, %v1768_v57  ;;  %v1006_v33 = vpop.permute.xlu1 %1005  ;;  %v1770_v20 = vpop.eup %1769 }
 0x137   :  { %v1081_v42 = vmul.f32 %v2387_v61, %v1006_v33 }
 0x138   :  { %v468_v14 = vadd.f32 0.5, %v467_v63 }
 0x139   :  { %v2396_v25 = vadd.f32 %v1081_v42, %v1073_v19  ;;  %v229_v19 = vmul.f32 %v228_v22, %v2849_v46  ;;  %v2853_v42 = vld [vmem:[#allocation9_spill] sm:$0xff] }
 0x13a   :  { %v472_v13 = vmul.f32 %v1770_v20, %v468_v14  ;;  %v471_v45 = vmul.f32 %v468_v14, %v2848_v41  ;;  %v232_v41 = vadd.f32 %v230_v16, %v224_v2  ;;  %v2429_v2 = vrot.slane %v2274_v54, %v2179_v50 }
 0x13b   :  { %v2399_v15 = vpop.permute.xlu1 %1133  ;;  %v231_v63 = vadd.f32 %v229_v19, %v223_v39  ;;  %v2857_v19 = vld [vmem:[#allocation20_spill] sm:$0xff] }
 0x13c   :  { %2847 = vst [vmem:[#allocation33_spill] sm:$0xff] %v2399_v15  ;;  %v474_v17 = vrot.slane %v472_v13, 4  ;;  %2862 = vst [vmem:[#allocation30_spill] sm:$0xff] %v2429_v2 }
 0x13e   :  { %v1772_v32 = vpop.eup %1771  ;;  %v2406_v28 = vadd.f32 %v474_v17, %v471_v45  ;;  %v2856_v45 = vld [vmem:[#allocation12_spill] sm:$0xff] }
 0x13f   :  { %v510_v23 = vmul.f32 %v1772_v32, %v502_v8  ;;  %v469_v8 = vmul.f32 0.5, %v1770_v20 }
 0x140   :  { %1773 = vtanh.f32 %v2406_v28  ;;  %v994_v18 = vpop.permute.xlu1 %993 }
 0x141   :  { %v514_v35 = vrot.slane %v510_v23, %v2176_v49  ;;  %v520_v60 = vrot.slane %v510_v23, %v2179_v50  ;;  %v528_v57 = vrot.slane %v510_v23, %v2182_v52  ;;  %v536_v33 = vrot.slane %v510_v23, %v2187_v56  ;;  %v2858_v23 = vld [vmem:[#allocation23_spill] sm:$0xff] }
 0x142   :  { %v1070_v32 = vmul.f32 %v2343_v27, %v994_v18  ;;  %v470_v54 = vadd.f32 0.5, %v469_v8 }
 0x143   :  { %v591_v14 = vmul.f32 %v514_v35, %v2853_v42  ;;  %v592_v48 = vmul.f32 %v514_v35, %v2086_v29  ;;  %v593_v13 = vmul.f32 %v520_v60, %v2854_v10  ;;  %v594_v22 = vmul.f32 %v520_v60, %v2855_v40  ;;  %v2860_v29 = vld [vmem:[#allocation25_spill] sm:$0xff] }
 0x144   :  { %v597_v17 = vmul.f32 %v528_v57, %v2856_v45  ;;  %v998_v5 = vpop.permute.xlu1 %997  ;;  %v598_v39 = vmul.f32 %v528_v57, %v2857_v19  ;;  %v521_v55 = vmul.f32 %v520_v60, %v2858_v23  ;;  %v515_v42 = vmul.f32 %v514_v35, %v2859_v3  ;;  %v2861_v10 = vld [vmem:[#allocation29_spill] sm:$0xff] }
 0x145   :  { %v595_v15 = vadd.f32 %v593_v13, %v591_v14  ;;  %v596_v30 = vadd.f32 %v594_v22, %v592_v48  ;;  %v516_v47 = vmul.f32 %v514_v35, %v2860_v29  ;;  %v522_v62 = vmul.f32 %v520_v60, %v2861_v10  ;;  %v2863_v48 = vld [vmem:[#allocation19_spill] sm:$0xff]  ;;  %v2864_v22 = vld [vmem:[#allocation22_spill] sm:$0xff] }
 0x146   :  { %v601_v18 = vmul.f32 %v536_v33, %v2838_v7  ;;  %v602_v14 = vmul.f32 %v536_v33, %v2839_v12  ;;  %v233_v13 = vadd.f32 %v231_v63, %v2863_v48  ;;  %v234_v23 = vadd.f32 %v232_v41, %v2864_v22 }
 0x147   :  { %v599_v20 = vadd.f32 %v597_v17, %v595_v15  ;;  %v600_v16 = vadd.f32 %v598_v39, %v596_v30  ;;  %v2436_v3 = vadd.f32 %v1070_v32, %v2380_v4  ;;  %v1071_v35 = vmul.f32 %v2343_v27, %v998_v5  ;;  %v2444_v32 = vpop.permute.xlu0 %1121 }
 0x148   :  { %v523_v29 = vadd.f32 %v521_v55, %v515_v42  ;;  %v524_v30 = vadd.f32 %v522_v62, %v516_v47  ;;  %v529_v41 = vmul.f32 %v528_v57, %v2145_v21  ;;  %2865 = vst [vmem:[#allocation10_spill] sm:$0xff] %v2444_v32  ;;  %v537_v5 = vmul.f32 %v536_v33, %v2162_v43 }
 0x149   :  { %v603_v60 = vadd.f32 %v601_v18, %v599_v20  ;;  %v604_v10 = vadd.f32 %v602_v14, %v600_v16  ;;  %v1022_v19 = vpop.permute.xlu1 %1021  ;;  %v2440_v17 = vadd.f32 %v1071_v35, %v2390_v11  ;;  %v530_v27 = vmul.f32 %v528_v57, %v2195_v1 }
 0x14a   :  { %v1774_v15 = vpop.eup %1773  ;;  %v1093_v39 = vmul.f32 %v2429_v2, %v1022_v19  ;;  %v531_v47 = vadd.f32 %v529_v41, %v523_v29  ;;  %v538_v29 = vmul.f32 %v536_v33, %v2226_v6 }
 0x14b   :  { %v605_v63 = vadd.f32 %v603_v60, %v233_v13  ;;  %v606_v48 = vadd.f32 %v604_v10, %v234_v23  ;;  %v478_v4 = vmul.f32 %v1774_v15, %v470_v54  ;;  %v532_v10 = vadd.f32 %v530_v27, %v524_v30  ;;  %v2463_v35 = vpop.permute.xlu0 %1137 }
 0x14c   :  { %v2449_v55 = vadd.f32 %v1093_v39, %v2396_v25  ;;  %v539_v14 = vadd.f32 %v537_v5, %v531_v47  ;;  %2868 = vst [vmem:[#allocation12_spill] sm:$0xff] %v2463_v35 }
 0x14d   :  { %v607_v62 = vmul.f32 0.5, %v605_v63  ;;  %v546_v11 = vrot.slane %v478_v4, %v2176_v49  ;;  %v552_v42 = vrot.slane %v478_v4, %v2179_v50  ;;  %v608_v8 = vmul.f32 0.5, %v606_v48 }
 0x14e   :  { %2866 = vst [vmem:[#allocation8_spill] sm:$0xff] %v2449_v55  ;;  %v560_v19 = vrot.slane %v478_v4, %v2182_v52  ;;  %v568_v23 = vrot.slane %v478_v4, %v2187_v56  ;;  %v2455_v20 = vpop.permute.xlu1 %1109  ;;  %v540_v60 = vadd.f32 %v538_v29, %v532_v10  ;;  %v541_v4 = vadd.f32 %v539_v14, %v2230_v38  ;;  %v2882_v55 = vld [vmem:[#allocation13_spill] sm:$0xff] }
 0x14f   :  { %2867 = vst [vmem:[#allocation14_spill] sm:$0xff] %v2455_v20  ;;  %1775 = vtanh.f32 %v607_v62  ;;  %v547_v57 = vmul.f32 %v546_v11, %v2840_v36  ;;  %v548_v25 = vmul.f32 %v546_v11, %v2189_v58  ;;  %v553_v16 = vmul.f32 %v552_v42, %v2841_v51  ;;  %v2472_v11 = vpop.permute.xlu0 %1101  ;;  %v2885_v20 = vld [vmem:[#allocation23_spill] sm:$0xff] }
 0x150   :  { %v554_v18 = vmul.f32 %v552_v42, %v2211_v9  ;;  %v561_v13 = vmul.f32 %v560_v19, %v2842_v24  ;;  %v562_v15 = vmul.f32 %v560_v19, %v2236_v44  ;;  %1777 = vtanh.f32 %v608_v8  ;;  %2870 = vst [vmem:[#allocation34_spill] sm:$0xff] %v2472_v11  ;;  %v2887_v11 = vld [vmem:[#allocation25_spill] sm:$0xff] }
 0x151   :  { %v555_v48 = vadd.f32 %v553_v16, %v547_v57  ;;  %v569_v39 = vmul.f32 %v568_v23, %v2220_v26  ;;  %v570_v33 = vmul.f32 %v568_v23, %v2245_v59  ;;  %v542_v27 = vadd.f32 %v540_v60, %v2250_v53 }
 0x152   :  { %v556_v54 = vadd.f32 %v554_v18, %v548_v25 }
 0x153   :  { %v563_v30 = vadd.f32 %v561_v13, %v555_v48  ;;  %v2467_v63 = vpop.permute.xlu1 %1125  ;;  %v2478_v18 = vpop.permute.xlu0 %1113 }
 0x154   :  { %2869 = vst [vmem:[#allocation22_spill] sm:$0xff] %v2467_v63  ;;  %v564_v41 = vadd.f32 %v562_v15, %v556_v54  ;;  %2873 = vst [vmem:[#allocation37_spill] sm:$0xff] %v2478_v18  ;;  %v2884_v18 = vld [vmem:[#allocation20_spill] sm:$0xff] }
 0x155   :  { %v571_v5 = vadd.f32 %v569_v39, %v563_v30 }
 0x156   :  { %v572_v62 = vadd.f32 %v570_v33, %v564_v41 }
 0x157   :  { %v573_v47 = vadd.f32 %v571_v5, %v541_v4  ;;  %v2474_v42 = vpop.permute.xlu1 %1129  ;;  %v2484_v30 = vpop.permute.xlu0 %1001 }
 0x158   :  { %2871 = vst [vmem:[#allocation35_spill] sm:$0xff] %v2474_v42  ;;  %v574_v8 = vadd.f32 %v572_v62, %v542_v27  ;;  %2874 = vst [vmem:[#allocation38_spill] sm:$0xff] %v2484_v30 }
 0x159   :  { %v1776_v10 = vpop.eup %1775  ;;  %v575_v19 = vmul.f32 0.5, %v573_v47  ;;  %v1584_v47 = vld [vmem:[%s2743_s0 + $0x8] sm:$0x3] }
 0x15a   :  { %v611_v57 = vmul.f32 0.5, %v1776_v10  ;;  %v576_v25 = vmul.f32 0.5, %v574_v8  ;;  %v1778_v23 = vpop.eup %1777 }
 0x15b   :  { %1779 = vtanh.f32 %v575_v19  ;;  %v613_v27 = vmul.f32 0.5, %v1778_v23  ;;  %v1014_v62 = vpop.permute.xlu0 %1013 }
 0x15c   :  { %v612_v16 = vadd.f32 0.5, %v611_v57  ;;  %v2476_v29 = vpop.permute.xlu1 %1153  ;;  %1781 = vtanh.f32 %v576_v25  ;;  %v1083_v10 = vmul.f32 %v2387_v61, %v1014_v62 }
 0x15d   :  { %2872 = vst [vmem:[#allocation36_spill] sm:$0xff] %v2476_v29 }
 0x15e   :  { %v615_v14 = vmul.f32 %v612_v16, %v2382_v0  ;;  %v616_v48 = vmul.f32 %v1778_v23, %v612_v16  ;;  %v240_v16 = vrot.slane %v1584_v47, %v2098_v34 }
 0x160   :  { %v618_v13 = vrot.slane %v616_v48, 4  ;;  %v241_v62 = vmul.f32 %v240_v16, %v2851_v37 }
 0x161   :  { %v1010_v60 = vpop.permute.xlu1 %1009 }
 0x162   :  { %v2481_v54 = vadd.f32 %v618_v13, %v615_v14  ;;  %v1082_v15 = vmul.f32 %v2387_v61, %v1010_v60  ;;  %v614_v14 = vadd.f32 0.5, %v613_v27  ;;  %v1087_v13 = vadd.f32 %v1083_v10, %v2440_v17 }
 0x164   :  { %1783 = vtanh.f32 %v2481_v54  ;;  %v2488_v39 = vadd.f32 %v1082_v15, %v2436_v3  ;;  %v246_v3 = vrot.slane %v1584_v47, %v2091_v31  ;;  %v2878_v47 = vld [vmem:[#allocation16_spill] sm:$0xff] }
 0x165   :  { %v1780_v41 = vpop.eup %1779 }
 0x166   :  { %2875 = vst [vmem:[#allocation39_spill] sm:$0xff] %v2488_v39  ;;  %v579_v33 = vmul.f32 0.5, %v1780_v41  ;;  %v2490_v4 = vpop.permute.xlu1 %1141  ;;  %v1782_v5 = vpop.eup %1781  ;;  %v247_v41 = vmul.f32 %v246_v3, %v2849_v46  ;;  %v2883_v39 = vld [vmem:[#allocation11_spill] sm:$0xff] }
 0x167   :  { %2876 = vst [vmem:[#allocation40_spill] sm:$0xff] %v2490_v4  ;;  %v581_v63 = vmul.f32 0.5, %v1782_v5 }
 0x168   :  { %v580_v0 = vadd.f32 0.5, %v579_v33  ;;  %v249_v29 = vadd.f32 %v247_v41, %v241_v62 }
 0x16a   :  { %v584_v8 = vmul.f32 %v1782_v5, %v580_v0  ;;  %v2496_v19 = vpop.permute.xlu1 %1145  ;;  %v583_v57 = vmul.f32 %v580_v0, %v2406_v28  ;;  %v2889_v5 = vld [vmem:[#allocation19_spill] sm:$0xff] }
 0x16b   :  { %2877 = vst [vmem:[#allocation41_spill] sm:$0xff] %v2496_v19 }
 0x16c   :  { %v586_v25 = vrot.slane %v584_v8, 4  ;;  %v242_v8 = vmul.f32 %v240_v16, %v2878_v47 }
 0x16e   :  { %v1784_v48 = vpop.eup %1783  ;;  %v2501_v23 = vadd.f32 %v586_v25, %v583_v57  ;;  %v2879_v57 = vld [vmem:[#allocation18_spill] sm:$0xff] }
 0x16f   :  { %v622_v60 = vmul.f32 %v1784_v48, %v614_v14  ;;  %v1030_v15 = vpop.permute.xlu1 %1029  ;;  %v248_v17 = vmul.f32 %v246_v3, %v2879_v57  ;;  %v2881_v14 = vld [vmem:[#allocation9_spill] sm:$0xff] }
 0x170   :  { %1785 = vtanh.f32 %v2501_v23  ;;  %v1095_v33 = vmul.f32 %v2429_v2, %v1030_v15  ;;  %v2888_v2 = vld [vmem:[#allocation29_spill] sm:$0xff] }
 0x171   :  { %v626_v28 = vrot.slane %v622_v60, %v2176_v49  ;;  %v632_v0 = vrot.slane %v622_v60, %v2179_v50  ;;  %v640_v27 = vrot.slane %v622_v60, %v2182_v52  ;;  %v648_v10 = vrot.slane %v622_v60, %v2187_v56 }
 0x172   :  { %v2514_v25 = vadd.f32 %v1095_v33, %v1087_v13  ;;  %v250_v13 = vadd.f32 %v248_v17, %v242_v8  ;;  %v2886_v33 = vld [vmem:[#allocation26_spill] sm:$0xff]  ;;  %v582_v8 = vadd.f32 0.5, %v581_v63 }
 0x173   :  { %v703_v48 = vmul.f32 %v626_v28, %v2881_v14  ;;  %v704_v15 = vmul.f32 %v626_v28, %v2882_v55  ;;  %v705_v19 = vmul.f32 %v632_v0, %v2883_v39  ;;  %v706_v4 = vmul.f32 %v632_v0, %v2855_v40 }
 0x174   :  { %2880 = vst [vmem:[#allocation16_spill] sm:$0xff] %v2514_v25  ;;  %v709_v42 = vmul.f32 %v640_v27, %v2856_v45  ;;  %v710_v3 = vmul.f32 %v640_v27, %v2884_v18  ;;  %v633_v60 = vmul.f32 %v632_v0, %v2885_v20  ;;  %v627_v25 = vmul.f32 %v626_v28, %v2886_v33 }
 0x175   :  { %v707_v35 = vadd.f32 %v705_v19, %v703_v48  ;;  %v708_v16 = vadd.f32 %v706_v4, %v704_v15  ;;  %v628_v32 = vmul.f32 %v626_v28, %v2887_v11  ;;  %v634_v61 = vmul.f32 %v632_v0, %v2888_v2 }
 0x176   :  { %v713_v41 = vmul.f32 %v648_v10, %v2838_v7  ;;  %v714_v62 = vmul.f32 %v648_v10, %v2839_v12  ;;  %v251_v19 = vadd.f32 %v249_v29, %v2889_v5  ;;  %v252_v4 = vadd.f32 %v250_v13, %v2864_v22 }
 0x177   :  { %v711_v30 = vadd.f32 %v709_v42, %v707_v35  ;;  %v712_v39 = vadd.f32 %v710_v3, %v708_v16  ;;  %v635_v20 = vadd.f32 %v633_v60, %v627_v25  ;;  %v636_v33 = vadd.f32 %v634_v61, %v628_v32 }
 0x178   :  { %v641_v0 = vmul.f32 %v640_v27, %v2145_v21  ;;  %v649_v42 = vmul.f32 %v648_v10, %v2162_v43  ;;  %v642_v16 = vmul.f32 %v640_v27, %v2195_v1 }
 0x179   :  { %v715_v48 = vadd.f32 %v713_v41, %v711_v30  ;;  %v716_v15 = vadd.f32 %v714_v62, %v712_v39  ;;  %v2535_v39 = vpop.permute.xlu1 %1157 }
 0x17a   :  { %v1786_v17 = vpop.eup %1785  ;;  %v643_v12 = vadd.f32 %v641_v0, %v635_v20  ;;  %v644_v25 = vadd.f32 %v642_v16, %v636_v33  ;;  %v650_v20 = vmul.f32 %v648_v10, %v2226_v6 }
 0x17b   :  { %v717_v18 = vadd.f32 %v715_v48, %v251_v19  ;;  %v718_v28 = vadd.f32 %v716_v15, %v252_v4  ;;  %v590_v35 = vmul.f32 %v1786_v17, %v582_v8 }
 0x17c   :  { %v651_v41 = vadd.f32 %v649_v42, %v643_v12  ;;  %v652_v33 = vadd.f32 %v650_v20, %v644_v25 }
 0x17d   :  { %v719_v3 = vmul.f32 0.5, %v717_v18  ;;  %v658_v29 = vrot.slane %v590_v35, %v2176_v49  ;;  %v664_v30 = vrot.slane %v590_v35, %v2179_v50  ;;  %v720_v63 = vmul.f32 0.5, %v718_v28  ;;  %v2547_v17 = vpop.permute.xlu1 %1213 }
 0x17e   :  { %v672_v61 = vrot.slane %v590_v35, %v2182_v52  ;;  %v680_v32 = vrot.slane %v590_v35, %v2187_v56  ;;  %v653_v10 = vadd.f32 %v651_v41, %v2230_v38  ;;  %v654_v12 = vadd.f32 %v652_v33, %v2250_v53 }
 0x17f   :  { %1787 = vtanh.f32 %v719_v3  ;;  %v659_v60 = vmul.f32 %v658_v29, %v2840_v36  ;;  %v660_v13 = vmul.f32 %v658_v29, %v2189_v58  ;;  %v665_v18 = vmul.f32 %v664_v30, %v2841_v51 }
 0x180   :  { %v666_v27 = vmul.f32 %v664_v30, %v2211_v9  ;;  %v673_v19 = vmul.f32 %v672_v61, %v2842_v24  ;;  %v674_v48 = vmul.f32 %v672_v61, %v2236_v44  ;;  %1789 = vtanh.f32 %v720_v63 }
 0x181   :  { %v667_v62 = vadd.f32 %v665_v18, %v659_v60  ;;  %v681_v8 = vmul.f32 %v680_v32, %v2220_v26  ;;  %v682_v0 = vmul.f32 %v680_v32, %v2245_v59  ;;  %v2552_v25 = vpop.permute.xlu1 %1217 }
 0x182   :  { %v668_v4 = vadd.f32 %v666_v27, %v660_v13 }
 0x183   :  { %v675_v15 = vadd.f32 %v673_v19, %v667_v62 }
 0x184   :  { %v676_v28 = vadd.f32 %v674_v48, %v668_v4 }
 0x185   :  { %v683_v35 = vadd.f32 %v681_v8, %v675_v15  ;;  %v2555_v20 = vpop.permute.xlu1 %1225 }
 0x186   :  { %v684_v42 = vadd.f32 %v682_v0, %v676_v28  ;;  %v1585_v0 = vld [vmem:[%s2743_s0 + $0xa] sm:$0x3] }
 0x187   :  { %v685_v16 = vadd.f32 %v683_v35, %v653_v10  ;;  %v264_v10 = vrot.slane %v1585_v0, %v2091_v31 }
 0x188   :  { %v686_v3 = vadd.f32 %v684_v42, %v654_v12 }
 0x189   :  { %v1788_v29 = vpop.eup %1787  ;;  %v687_v30 = vmul.f32 0.5, %v685_v16  ;;  %v2559_v62 = vpop.permute.xlu1 %1237  ;;  %v258_v16 = vrot.slane %v1585_v0, %v2098_v34 }
 0x18a   :  { %v723_v63 = vmul.f32 0.5, %v1788_v29  ;;  %v688_v61 = vmul.f32 0.5, %v686_v3  ;;  %v1790_v13 = vpop.eup %1789 }
 0x18b   :  { %1791 = vtanh.f32 %v687_v30  ;;  %v725_v15 = vmul.f32 0.5, %v1790_v13 }
 0x18c   :  { %v724_v60 = vadd.f32 0.5, %v723_v63  ;;  %1793 = vtanh.f32 %v688_v61  ;;  %v265_v63 = vmul.f32 %v264_v10, %v2849_v46 }
 0x18d   :  { %v2562_v8 = vpop.permute.xlu1 %1257  ;;  %v726_v12 = vadd.f32 0.5, %v725_v15 }
 0x18e   :  { %v727_v18 = vmul.f32 %v724_v60, %v2481_v54  ;;  %v728_v32 = vmul.f32 %v1790_v13, %v724_v60  ;;  %v260_v13 = vmul.f32 %v258_v16, %v2878_v47 }
 0x190   :  { %v730_v27 = vrot.slane %v728_v32, 4  ;;  %v266_v32 = vmul.f32 %v264_v10, %v2879_v57  ;;  %v2892_v10 = vld [vmem:[#allocation23_spill] sm:$0xff] }
 0x191   :  { %v2572_v30 = vpop.permute.xlu1 %1261 }
 0x192   :  { %v2557_v41 = vadd.f32 %v730_v27, %v727_v18  ;;  %v259_v18 = vmul.f32 %v258_v16, %v2851_v37  ;;  %v268_v16 = vadd.f32 %v266_v32, %v260_v13 }
 0x194   :  { %1795 = vtanh.f32 %v2557_v41 }
 0x195   :  { %v1792_v19 = vpop.eup %1791 }
 0x196   :  { %v691_v33 = vmul.f32 0.5, %v1792_v19  ;;  %v1794_v48 = vpop.eup %1793 }
 0x197   :  { %v693_v47 = vmul.f32 0.5, %v1794_v48 }
 0x198   :  { %v692_v4 = vadd.f32 0.5, %v691_v33  ;;  %v2890_v33 = vld [vmem:[#allocation11_spill] sm:$0xff] }
 0x199   :  { %v694_v13 = vadd.f32 0.5, %v693_v47 }
 0x19a   :  { %v695_v54 = vmul.f32 %v692_v4, %v2501_v23  ;;  %v696_v28 = vmul.f32 %v1794_v48, %v692_v4 }
 0x19c   :  { %v698_v35 = vrot.slane %v696_v28, 4  ;;  %v267_v28 = vadd.f32 %v265_v63, %v259_v18  ;;  %v2894_v18 = vld [vmem:[#allocation21_spill] sm:$0xff] }
 0x19e   :  { %v1796_v42 = vpop.eup %1795  ;;  %v2570_v3 = vadd.f32 %v698_v35, %v695_v54  ;;  %v2587_v54 = vpop.permute.xlu1 %1249  ;;  %v269_v48 = vadd.f32 %v267_v28, %v2889_v5 }
 0x19f   :  { %v734_v29 = vmul.f32 %v1796_v42, %v726_v12  ;;  %v2891_v12 = vld [vmem:[#allocation20_spill] sm:$0xff] }
 0x1a0   :  { %1797 = vtanh.f32 %v2570_v3 }
 0x1a1   :  { %v738_v23 = vrot.slane %v734_v29, %v2176_v49  ;;  %v744_v61 = vrot.slane %v734_v29, %v2179_v50  ;;  %v752_v60 = vrot.slane %v734_v29, %v2182_v52  ;;  %v760_v27 = vrot.slane %v734_v29, %v2187_v56 }
 0x1a2   :  { %v2599_v32 = vpop.permute.xlu1 %1269 }
 0x1a3   :  { %v815_v19 = vmul.f32 %v738_v23, %v2881_v14  ;;  %v816_v46 = vmul.f32 %v738_v23, %v2882_v55  ;;  %v817_v4 = vmul.f32 %v744_v61, %v2890_v33  ;;  %v818_v15 = vmul.f32 %v744_v61, %v2855_v40  ;;  %v2893_v14 = vld [vmem:[#allocation26_spill] sm:$0xff] }
 0x1a4   :  { %v821_v0 = vmul.f32 %v752_v60, %v2856_v45  ;;  %v822_v57 = vmul.f32 %v752_v60, %v2891_v12  ;;  %v745_v42 = vmul.f32 %v744_v61, %v2892_v10  ;;  %v739_v29 = vmul.f32 %v738_v23, %v2893_v14 }
 0x1a5   :  { %v819_v35 = vadd.f32 %v817_v4, %v815_v19  ;;  %v820_v37 = vadd.f32 %v818_v15, %v816_v46  ;;  %v740_v55 = vmul.f32 %v738_v23, %v2887_v11  ;;  %v746_v33 = vmul.f32 %v744_v61, %v2888_v2 }
 0x1a6   :  { %v825_v63 = vmul.f32 %v760_v27, %v2838_v7  ;;  %v826_v45 = vmul.f32 %v760_v27, %v2894_v18  ;;  %v270_v19 = vadd.f32 %v268_v16, %v2864_v22  ;;  %v747_v15 = vadd.f32 %v745_v42, %v739_v29  ;;  %v2615_v18 = vld [vmem:[%s2746_s3] sm:$0xff] }
 0x1a7   :  { %v823_v40 = vadd.f32 %v821_v0, %v819_v35  ;;  %v824_v31 = vadd.f32 %v822_v57, %v820_v37  ;;  %v753_v23 = vmul.f32 %v752_v60, %v2145_v21  ;;  %v748_v61 = vadd.f32 %v746_v33, %v740_v55  ;;  %v1285_v57 = vpop.permute.xlu1 %1284 }
 0x1a8   :  { %v761_v7 = vmul.f32 %v760_v27, %v2162_v43  ;;  %v754_v5 = vmul.f32 %v752_v60, %v2195_v1  ;;  %v1891_v42 = vmov 45   ;;  %1602 = vmatprep.mubr.msk.f32.mxu0 %vm1288_vm0, %v1285_v57  ;;  %v1822_v57 = vld [vmem:[%s2746_s3 + $0x8] sm:$0xff]  ;;  %s1911_s3 = smov [#allocation5]  }
 0x1a9   :  { %v827_v46 = vadd.f32 %v825_v63, %v823_v40  ;;  %v828_v4 = vadd.f32 %v826_v45, %v824_v31  ;;  %v755_v22 = vadd.f32 %v753_v23, %v747_v15  ;;  %1722 = vset.pattern.permute.xlu1 %v1891_v42  ;;  %v762_v45 = vmul.f32 %v760_v27, %v2226_v6  ;;  %s1572_s27 = sshll.u32 %s1911_s3, 4  ;;  %s1573_s27 = int_to_ptr.vmem [resolvable:$true] %s1572_s27 }
 0x1aa   :  { %v1798_v12 = vpop.eup %1797  ;;  %v756_v29 = vadd.f32 %v754_v5, %v748_v61  ;;  %1277 = vperm.xlu1 %1722, %v2615_v18   ;;  %s1845_s28 = scalar_lea.vmem %s1573_s27, 64  ;;  %p1850_p9 = scmp.lt.s32.totalorder %s1573_s27, %s1573_s27 }
 0x1ab   :  { %v829_v0 = vadd.f32 %v827_v46, %v269_v48  ;;  %v830_v35 = vadd.f32 %v828_v4, %v270_v19  ;;  %v702_v37 = vmul.f32 %v1798_v12, %v694_v13  ;;  %v763_v19 = vadd.f32 %v761_v7, %v755_v22  ;;  %p1846_p8 = scmp.ne.s32.totalorder %s1573_s27, %s1845_s28  ;;  %p1851_p10 = scmp.lt.s32.totalorder %s1845_s28, %s1845_s28 }
 0x1ac   :  { %v764_v15 = vadd.f32 %v762_v45, %v756_v29 }
 0x1ad   :  { %v831_v28 = vmul.f32 0.5, %v829_v0  ;;  %v770_v31 = vrot.slane %v702_v37, %v2176_v49  ;;  %v776_v47 = vrot.slane %v702_v37, %v2179_v50  ;;  %v832_v16 = vmul.f32 0.5, %v830_v35  ;;  %p1852_p11 = por %p1851_p10, %p1850_p9 }
 0x1ae   :  { %v784_v55 = vrot.slane %v702_v37, %v2182_v52  ;;  %v792_v33 = vrot.slane %v702_v37, %v2187_v56  ;;  %v1892_v0 = vmov 47   ;;  %v1893_v35 = vmov 46  }
 0x1af   :  { %1799 = vtanh.f32 %v831_v28  ;;  %v771_v60 = vmul.f32 %v770_v31, %v2840_v36  ;;  %v772_v40 = vmul.f32 %v770_v31, %v2189_v58  ;;  %v777_v63 = vmul.f32 %v776_v47, %v2841_v51  ;;  %1724 = vset.pattern.permute.xlu1 %v1892_v0  ;;  %1723 = vset.pattern.permute.xlu0 %v1893_v35  ;;  %p1853_p12 = pnand %p1852_p11, %p1846_p8 }
 0x1b0   :  { %v778_v48 = vmul.f32 %v776_v47, %v2211_v9  ;;  %v785_v4 = vmul.f32 %v784_v55, %v2842_v24  ;;  %v786_v12 = vmul.f32 %v784_v55, %v2236_v44  ;;  %1801 = vtanh.f32 %v832_v16  ;;  %1381 = vperm.xlu1 %1724, %v2615_v18   ;;  %1371 = vperm.xlu0 %1723, %v2615_v18  }
 0x1b1   :  { %v779_v46 = vadd.f32 %v777_v63, %v771_v60  ;;  %v793_v61 = vmul.f32 %v792_v33, %v2220_v26  ;;  %v794_v27 = vmul.f32 %v792_v33, %v2245_v59  ;;  %v765_v7 = vadd.f32 %v763_v19, %v2230_v38 }
 0x1b2   :  { %v780_v13 = vadd.f32 %v778_v48, %v772_v40  ;;  %v766_v28 = vadd.f32 %v764_v15, %v2250_v53  ;;  %v1894_v40 = vmov 48   ;;  %v1895_v19 = vmov 51  }
 0x1b3   :  { %v787_v23 = vadd.f32 %v785_v4, %v779_v46  ;;  %v1896_v4 = vmov 49  }
 0x1b4   :  { %v788_v37 = vadd.f32 %v786_v12, %v780_v13  ;;  %1725 = vset.pattern.permute.xlu1 %v1891_v42  ;;  %1375 = vperm.xlu0 %1723, %v1822_v57   ;;  %v1897_v12 = vmov 54  }
 0x1b5   :  { %v795_v5 = vadd.f32 %v793_v61, %v787_v23  ;;  %1281 = vperm.xlu1 %1725, %v1822_v57   ;;  %v1898_v23 = vmov 50  }
 0x1b6   :  { %v796_v22 = vadd.f32 %v794_v27, %v788_v37  ;;  %v1899_v27 = vmov 57  }
 0x1b7   :  { %v797_v31 = vadd.f32 %v795_v5, %v765_v7  ;;  %v1900_v5 = vmov 52  }
 0x1b8   :  { %v798_v47 = vadd.f32 %v796_v22, %v766_v28  ;;  %1727 = vset.pattern.permute.xlu0 %v1894_v40 }
 0x1b9   :  { %v1800_v16 = vpop.eup %1799  ;;  %v799_v29 = vmul.f32 0.5, %v797_v31  ;;  %1726 = vset.pattern.permute.xlu1 %v1892_v0  ;;  %1401 = vperm.xlu0 %1727, %v2615_v18  }
 0x1ba   :  { %v835_v55 = vmul.f32 0.5, %v1800_v16  ;;  %v800_v33 = vmul.f32 0.5, %v798_v47  ;;  %v1802_v63 = vpop.eup %1801  ;;  %1385 = vperm.xlu1 %1726, %v1822_v57   ;;  %v1901_v57 = vmov 60  }
 0x1bb   :  { %1803 = vtanh.f32 %v799_v29  ;;  %v837_v0 = vmul.f32 0.5, %v1802_v63  ;;  %v1902_v29 = vmov 53  }
 0x1bc   :  { %v836_v60 = vadd.f32 0.5, %v835_v55  ;;  %1805 = vtanh.f32 %v800_v33 }
 0x1bd   :  { %1730 = vset.pattern.permute.xlu0 %v1895_v19  ;;  %v838_v28 = vadd.f32 0.5, %v837_v0 }
 0x1be   :  { %v839_v42 = vmul.f32 %v836_v60, %v2557_v41  ;;  %v840_v45 = vmul.f32 %v1802_v63, %v836_v60  ;;  %1728 = vset.pattern.permute.xlu1 %v1896_v4  ;;  %1413 = vperm.xlu0 %1730, %v2615_v18  }
 0x1bf   :  { %1405 = vperm.xlu1 %1728, %v2615_v18  }
 0x1c0   :  { %v842_v48 = vrot.slane %v840_v45, 4  ;;  %v1903_v45 = vmov 55  }
 0x1c2   :  { %v844_v46 = vadd.f32 %v842_v48, %v839_v42  ;;  %1733 = vset.pattern.permute.xlu0 %v1897_v12  ;;  %v1904_v48 = vmov 63   ;;  %v1906_v12 = vmov 64  }
 0x1c3   :  { %1729 = vset.pattern.permute.xlu1 %v1898_v23  ;;  %1425 = vperm.xlu0 %1733, %v2615_v18  }
 0x1c4   :  { %1807 = vtanh.f32 %v844_v46  ;;  %1409 = vperm.xlu1 %1729, %v2615_v18  }
 0x1c5   :  { %v1804_v15 = vpop.eup %1803 }
 0x1c6   :  { %v803_v13 = vmul.f32 0.5, %v1804_v15  ;;  %v1806_v61 = vpop.eup %1805 }
 0x1c7   :  { %1736 = vset.pattern.permute.xlu0 %v1899_v27  ;;  %v805_v63 = vmul.f32 0.5, %v1806_v61 }
 0x1c8   :  { %v804_v41 = vadd.f32 0.5, %v803_v13  ;;  %1731 = vset.pattern.permute.xlu1 %v1900_v5  ;;  %1437 = vperm.xlu0 %1736, %v2615_v18   ;;  %v1905_v13 = vmov 56  }
 0x1c9   :  { %1417 = vperm.xlu1 %1731, %v2615_v18  }
 0x1ca   :  { %v807_v35 = vmul.f32 %v804_v41, %v2570_v3  ;;  %v808_v37 = vmul.f32 %v1806_v61, %v804_v41 }
 0x1cc   :  { %v810_v7 = vrot.slane %v808_v37, 4  ;;  %1739 = vset.pattern.permute.xlu0 %v1901_v57  ;;  %v1907_v57 = vmov 58  }
 0x1cd   :  { %1732 = vset.pattern.permute.xlu1 %v1902_v29  ;;  %1449 = vperm.xlu0 %1739, %v2615_v18  }
 0x1ce   :  { %v1808_v22 = vpop.eup %1807  ;;  %v2640_v31 = vadd.f32 %v810_v7, %v807_v35  ;;  %1421 = vperm.xlu1 %1732, %v2615_v18  }
 0x1cf   :  { %v846_v47 = vmul.f32 %v1808_v22, %v838_v28 }
 0x1d0   :  { %1809 = vtanh.f32 %v2640_v31 }
 0x1d1   :  { %v850_v3 = vrot.slane %v846_v47, %v2176_v49  ;;  %v856_v16 = vrot.slane %v846_v47, %v2179_v50  ;;  %v864_v42 = vrot.slane %v846_v47, %v2182_v52  ;;  %1742 = vset.pattern.permute.xlu0 %v1904_v48 }
 0x1d2   :  { %1734 = vset.pattern.permute.xlu1 %v1903_v45  ;;  %1461 = vperm.xlu0 %1742, %v2615_v18  }
 0x1d3   :  { %v857_v55 = vmul.f32 %v856_v16, %v2892_v10  ;;  %v851_v33 = vmul.f32 %v850_v3, %v2893_v14  ;;  %v852_v60 = vmul.f32 %v850_v3, %v2887_v11  ;;  %v858_v40 = vmul.f32 %v856_v16, %v2888_v2  ;;  %1429 = vperm.xlu1 %1734, %v2615_v18  }
 0x1d4   :  { %v806_v10 = vadd.f32 0.5, %v805_v63  ;;  %v872_v14 = vrot.slane %v846_v47, %v2187_v56  ;;  %v865_v11 = vmul.f32 %v864_v42, %v2145_v21  ;;  %v866_v2 = vmul.f32 %v864_v42, %v2195_v1 }
 0x1d5   :  { %v859_v19 = vadd.f32 %v857_v55, %v851_v33  ;;  %v860_v46 = vadd.f32 %v858_v40, %v852_v60  ;;  %v1908_v40 = vmov 59   ;;  %v1909_v42 = vmov 61  }
 0x1d6   :  { %1744 = vset.pattern.permute.xlu0 %v1906_v12  ;;  %v873_v37 = vmul.f32 %v872_v14, %v2162_v43  ;;  %v874_v21 = vmul.f32 %v872_v14, %v2226_v6 }
 0x1d7   :  { %1735 = vset.pattern.permute.xlu1 %v1905_v13  ;;  %v868_v23 = vadd.f32 %v866_v2, %v860_v46  ;;  %v867_v41 = vadd.f32 %v865_v11, %v859_v19 }
 0x1d8   :  { %1433 = vperm.xlu1 %1735, %v2615_v18  }
 0x1d9   :  { %v875_v22 = vadd.f32 %v873_v37, %v867_v41  ;;  %v876_v47 = vadd.f32 %v874_v21, %v868_v23 }
 0x1da   :  { %v1810_v4 = vpop.eup %1809 }
 0x1db   :  { %v814_v15 = vmul.f32 %v1810_v4, %v806_v10  ;;  %v878_v55 = vadd.f32 %v876_v47, %v2250_v53  ;;  %v1018_v10 = vpop.permute.xlu0 %1017 }
 0x1dc   :  { %1737 = vset.pattern.permute.xlu1 %v1907_v57  ;;  %v2900_v57 = vld [vmem:[#allocation10_spill] sm:$0xff] }
 0x1dd   :  { %v882_v61 = vrot.slane %v814_v15, %v2176_v49  ;;  %v888_v0 = vrot.slane %v814_v15, %v2179_v50  ;;  %v896_v35 = vrot.slane %v814_v15, %v2182_v52  ;;  %v904_v1 = vrot.slane %v814_v15, %v2187_v56  ;;  %1441 = vperm.xlu1 %1737, %v2615_v18  }
 0x1df   :  { %v883_v27 = vmul.f32 %v882_v61, %v2840_v36  ;;  %v884_v7 = vmul.f32 %v882_v61, %v2189_v58  ;;  %v889_v5 = vmul.f32 %v888_v0, %v2841_v51  ;;  %v890_v28 = vmul.f32 %v888_v0, %v2211_v9  ;;  %v1026_v11 = vpop.permute.xlu0 %1025  ;;  %v2895_v61 = vld [vmem:[#allocation38_spill] sm:$0xff]  ;;  %v2896_v0 = vld [vmem:[#allocation28_spill] sm:$0xff] }
 0x1e0   :  { %v897_v43 = vmul.f32 %v896_v35, %v2842_v24  ;;  %v898_v6 = vmul.f32 %v896_v35, %v2236_v44  ;;  %v905_v58 = vmul.f32 %v904_v1, %v2220_v26  ;;  %v906_v51 = vmul.f32 %v904_v1, %v2245_v59 }
 0x1e1   :  { %v891_v3 = vadd.f32 %v889_v5, %v883_v27  ;;  %v892_v16 = vadd.f32 %v890_v28, %v884_v7  ;;  %v877_v9 = vadd.f32 %v875_v22, %v2230_v38  ;;  %1738 = vset.pattern.permute.xlu1 %v1908_v40  ;;  %v1910_v26 = vmov 62   ;;  %v2897_v27 = vld [vmem:[#allocation30_spill] sm:$0xff]  ;;  %v2898_v5 = vld [vmem:[#allocation27_spill] sm:$0xff]  ;;  %v2899_v22 = vld [vmem:[#allocation24_spill] sm:$0xff] }
 0x1e2   :  { %1445 = vperm.xlu1 %1738, %v2615_v18   ;;  %v1092_v7 = vmul.f32 %v2897_v27, %v1018_v10 }
 0x1e3   :  { %v899_v29 = vadd.f32 %v897_v43, %v891_v3  ;;  %v900_v36 = vadd.f32 %v898_v6, %v892_v16  ;;  %v1150_v2 = vpop.permute.xlu0 %1149  ;;  %v2901_v16 = vld [vmem:[#allocation17_spill] sm:$0xff]  ;;  %v2902_v6 = vld [vmem:[#allocation34_spill] sm:$0xff] }
 0x1e5   :  { %v907_v33 = vadd.f32 %v905_v58, %v899_v29  ;;  %v908_v60 = vadd.f32 %v906_v51, %v900_v36  ;;  %v2903_v36 = vld [vmem:[#allocation14_spill] sm:$0xff]  ;;  %v2904_v51 = vld [vmem:[#allocation37_spill] sm:$0xff] }
 0x1e6   :  { %1740 = vset.pattern.permute.xlu1 %v1909_v42 }
 0x1e7   :  { %v909_v24 = vadd.f32 %v907_v33, %v877_v9  ;;  %v910_v44 = vadd.f32 %v908_v60, %v878_v55  ;;  %1453 = vperm.xlu1 %1740, %v2615_v18   ;;  %v1162_v13 = vpop.permute.xlu0 %1161  ;;  %v1094_v55 = vmul.f32 %v2897_v27, %v1026_v11  ;;  %v2905_v60 = vld [vmem:[#allocation12_spill] sm:$0xff] }
 0x1e9   :  { %v911_v63 = vmul.f32 0.5, %v909_v24  ;;  %v912_v45 = vmul.f32 0.5, %v910_v44  ;;  %v2906_v24 = vld [vmem:[#allocation22_spill] sm:$0xff] }
 0x1eb   :  { %1811 = vtanh.f32 %v911_v63  ;;  %1741 = vset.pattern.permute.xlu1 %v1910_v26  ;;  %v1222_v35 = vpop.permute.xlu0 %1221  ;;  %v2907_v63 = vld [vmem:[#allocation35_spill] sm:$0xff] }
 0x1ec   :  { %1813 = vtanh.f32 %v912_v45  ;;  %1457 = vperm.xlu1 %1741, %v2615_v18   ;;  %v2908_v45 = vld [vmem:[#allocation33_spill] sm:$0xff] }
 0x1f0   :  { %1743 = vset.pattern.permute.xlu1 %v1906_v12 }
 0x1f1   :  { %1560 = vperm.xlu1 %1743, %v2615_v18   ;;  %v1080_v18 = vmul.f32 %v2896_v0, %v2895_v61 }
 0x1f3   :  { %v1084_v43 = vadd.f32 %v1080_v18, %v2901_v16 }
 0x1f5   :  { %v1812_v38 = vpop.eup %1811 }
 0x1f6   :  { %v915_v59 = vmul.f32 0.5, %v1812_v38  ;;  %v1814_v48 = vpop.eup %1813 }
 0x1f7   :  { %v917_v15 = vmul.f32 0.5, %v1814_v48 }
 0x1f8   :  { %v916_v53 = vadd.f32 0.5, %v915_v59  ;;  %v2909_v59 = vld [vmem:[#allocation36_spill] sm:$0xff] }
 0x1f9   :  { %v918_v23 = vadd.f32 0.5, %v917_v15  ;;  %v2911_v15 = vld [vmem:[#allocation41_spill] sm:$0xff] }
 0x1fa   :  { %v920_v19 = vmul.f32 %v1814_v48, %v916_v53  ;;  %v919_v46 = vmul.f32 %v916_v53, %v2640_v31  ;;  %v2910_v48 = vld [vmem:[#allocation40_spill] sm:$0xff] }
 0x1fc   :  { %v922_v4 = vrot.slane %v920_v19, 4 }
 0x1fe   :  { %v924_v14 = vadd.f32 %v922_v4, %v919_v46  ;;  %v1242_v46 = vpop.permute.xlu0 %1241 }
 0x200   :  { %1815 = vtanh.f32 %v924_v14 }
 0x20a   :  { %v1816_v41 = vpop.eup %1815 }
 0x20b   :  { %v926_v12 = vmul.f32 %v1816_v41, %v918_v23 }
 0x20d   :  { %v1167_v37 = vrot.slane %v926_v12, %v2176_v49  ;;  %v1175_v21 = vrot.slane %v926_v12, %v2179_v50  ;;  %v1187_v31 = vrot.slane %v926_v12, %v2182_v52  ;;  %v1199_v1 = vrot.slane %v926_v12, %v2187_v56 }
 0x20f   :  { %v1169_v28 = vmul.f32 %v1167_v37, %v2898_v5  ;;  %v1176_v47 = vmul.f32 %v1175_v21, %v2899_v22  ;;  %v1177_v3 = vmul.f32 %v1175_v21, %v2900_v57  ;;  %v1168_v29 = vmul.f32 %v1167_v37, %v2902_v6  ;;  %v2912_v5 = vld [vmem:[#allocation39_spill] sm:$0xff]  ;;  %v1246_v6 = vpop.permute.xlu0 %1245 }
 0x210   :  { %v1170_v58 = vmul.f32 %v1167_v37, %v2903_v36  ;;  %v1171_v9 = vmul.f32 %v1167_v37, %v2904_v51  ;;  %v1189_v40 = vmul.f32 %v1187_v31, %v2905_v60  ;;  %v1178_v44 = vmul.f32 %v1175_v21, %v2906_v24 }
 0x211   :  { %v1181_v33 = vadd.f32 %v1177_v3, %v1169_v28  ;;  %v1179_v42 = vmul.f32 %v1175_v21, %v2907_v63  ;;  %v1188_v26 = vmul.f32 %v1187_v31, %v2908_v45  ;;  %v1180_v38 = vadd.f32 %v1176_v47, %v1168_v29  ;;  %v2913_v47 = vld [vmem:[#allocation8_spill] sm:$0xff] }
 0x212   :  { %v1201_v53 = vmul.f32 %v1199_v1, %v2909_v59  ;;  %v1190_v19 = vmul.f32 %v1187_v31, %v2910_v48  ;;  %v1182_v4 = vadd.f32 %v1178_v44, %v1170_v58  ;;  %v1191_v11 = vmul.f32 %v1187_v31, %v2911_v15  ;;  %v2914_v29 = vld [vmem:[#allocation16_spill] sm:$0xff] }
 0x213   :  { %v1193_v10 = vadd.f32 %v1189_v40, %v1181_v33  ;;  %v1183_v14 = vadd.f32 %v1179_v42, %v1171_v9  ;;  %v1202_v23 = vmul.f32 %v1199_v1, %v2535_v39  ;;  %v1192_v41 = vadd.f32 %v1188_v26, %v1180_v38  ;;  %v1266_v33 = vpop.permute.xlu0 %1265 }
 0x214   :  { %v1200_v12 = vmul.f32 %v1199_v1, %v1150_v2  ;;  %v1194_v0 = vadd.f32 %v1190_v19, %v1182_v4  ;;  %v1203_v37 = vmul.f32 %v1199_v1, %v1162_v13  ;;  %v1096_v21 = vadd.f32 %v1092_v7, %v1084_v43 }
 0x215   :  { %v1205_v61 = vadd.f32 %v1201_v53, %v1193_v10  ;;  %v1195_v18 = vadd.f32 %v1191_v11, %v1183_v14  ;;  %v1098_v28 = vadd.f32 %v1094_v55, %v2912_v5 }
 0x216   :  { %v1204_v27 = vadd.f32 %v1200_v12, %v1192_v41  ;;  %v1206_v22 = vadd.f32 %v1202_v23, %v1194_v0 }
 0x217   :  { %v1209_v57 = vadd.f32 %v1205_v61, %v2913_v47  ;;  %v1207_v3 = vadd.f32 %v1203_v37, %v1195_v18  ;;  %v2915_v47 = vld [vmem:[#allocation15_spill] sm:$0xff] }
 0x218   :  { %v1208_v16 = vadd.f32 %v1204_v27, %v1096_v21  ;;  %v1210_v36 = vadd.f32 %v1206_v22, %v1098_v28 }
 0x219   :  { %v1229_v31 = vadd.f32 %v2552_v25, %v1209_v57  ;;  %v1211_v39 = vadd.f32 %v1207_v3, %v2914_v29 }
 0x21a   :  { %v1228_v2 = vadd.f32 %v2547_v17, %v1208_v16  ;;  %v1230_v51 = vadd.f32 %v1222_v35, %v1210_v36  ;;  %v2916_v16 = vld [vmem:[#allocation31_spill] sm:$0xff] }
 0x21b   :  { %v1233_v58 = vmax.f32 %v1229_v31, 0.0  ;;  %v1231_v13 = vadd.f32 %v2555_v20, %v1211_v39  ;;  %v1287_v20 = vpop.permute.xlu0 %1286  ;;  %v2917_v39 = vld [vmem:[#allocation32_spill] sm:$0xff] }
 0x21c   :  { %v1232_v1 = vmax.f32 %v1228_v2, 0.0  ;;  %v1234_v7 = vmax.f32 %v1230_v51, 0.0 }
 0x21d   :  { %v1253_v43 = vmul.f32 %v1242_v46, %v1233_v58  ;;  %v1235_v9 = vmax.f32 %v1231_v13, 0.0 }
 0x21e   :  { %v1252_v55 = vmul.f32 %v2559_v62, %v1232_v1  ;;  %v1254_v40 = vmul.f32 %v1246_v6, %v1234_v7 }
 0x21f   :  { %v1273_v60 = vadd.f32 %v2572_v30, %v1253_v43  ;;  %v1255_v25 = vmul.f32 %v2587_v54, %v1235_v9 }
 0x220   :  { %v1272_v24 = vadd.f32 %v2562_v8, %v1252_v55  ;;  %v1274_v44 = vadd.f32 %v1266_v33, %v1254_v40 }
 0x221   :  { %v1275_v17 = vadd.f32 %v2599_v32, %v1255_v25 }
 0x222   :  { %v1605_v35 = vpack.c.bf16 %v1273_v60, %v1272_v24 }
 0x223   :  { %v1609_v63 = vpack.c.bf16 %v1275_v17, %v1274_v44 }
 0x224   :  { %1606 = vmatprep.subr.bf16.mxu0 %v1605_v35 }
 0x225   :  { %1608 = vmatpush3.bf16.msra.mxu0 %v1605_v35 }
 0x226   :  { %1610 = vmatprep.subr.bf16.mxu0 %v1609_v63 }
 0x229   :  { %1612 = vmatpush3.bf16.msra.mxu0 %v1609_v63  ;;  %v1278_v62 = vpop.permute.xlu1 %1277 }
 0x22c   :  { %1603 = vmatmul.mubr.msk.f32.vlgmr.msra.gmra.mrb[0].mxu0 %vm1288_vm0, %v1287_v20 }
 0x22f   :  { %v1382_v42 = vpop.permute.xlu1 %1381  ;;  %v1372_v26 = vpop.permute.xlu0 %1371 }
 0x233   :  { %v1376_v53 = vpop.permute.xlu0 %1375 }
 0x234   :  { %v1282_v30 = vpop.permute.xlu1 %1281 }
 0x238   :  { %v1402_v27 = vpop.permute.xlu0 %1401 }
 0x239   :  { %v1386_v45 = vpop.permute.xlu1 %1385 }
 0x23d   :  { %v1414_v2 = vpop.permute.xlu0 %1413 }
 0x23e   :  { %v1406_v54 = vpop.permute.xlu1 %1405 }
 0x242   :  { %v1426_v24 = vpop.permute.xlu0 %1425 }
 0x243   :  { %v1410_v10 = vpop.permute.xlu1 %1409 }
 0x248   :  { %v1418_v23 = vpop.permute.xlu1 %1417 }
 0x24d   :  { %v1422_v12 = vpop.permute.xlu1 %1421 }
 0x252   :  { %v1430_v18 = vpop.permute.xlu1 %1429 }
 0x257   :  { %v1434_v3 = vpop.permute.xlu1 %1433 }
 0x25c   :  { %v1442_v55 = vpop.permute.xlu1 %1441 }
 0x2ff   :  { %v1604_v38 = vpop.f32.mrb[0].mxu0 }
 0x300   :  { %v1365_v8 = vadd.f32 %v1604_v38, %v1282_v30  ;;  %v1359_v59 = vpop.f32.mrb[1].mxu0 }
 0x301   :  { %v1360_v32 = vadd.f32 %v1359_v59, %v1278_v62 }
 0x302   :  { %v1369_v48 = vmax.f32 %v1365_v8, 0.0 }
 0x303   :  { %v1368_v19 = vmax.f32 %v1360_v32, 0.0 }
 0x304   :  { %v1379_v46 = vmul.f32 %v1376_v53, %v1369_v48 }
 0x305   :  { %v1378_v4 = vmul.f32 %v1372_v26, %v1368_v19 }
 0x306   :  { %v1389_v15 = vadd.f32 %v1386_v45, %v1379_v46 }
 0x307   :  { %v1388_v14 = vadd.f32 %v1382_v42, %v1378_v4  ;;  %v1446_v42 = vpop.permute.xlu1 %1445 }
 0x308   :  { %v1391_v41 = vmul.f32 0.5, %v1389_v15 }
 0x309   :  { %v1390_v11 = vmul.f32 0.5, %v1388_v14 }
 0x30b   :  { %1817 = vtanh.f32 %v1390_v11  ;;  %v1454_v19 = vpop.permute.xlu1 %1453 }
 0x30c   :  { %1819 = vtanh.f32 %v1391_v41 }
 0x315   :  { %v1818_v61 = vpop.eup %1817 }
 0x316   :  { %v1394_v0 = vmul.f32 0.5, %v1818_v61  ;;  %v1820_v21 = vpop.eup %1819  ;;  %v1458_v61 = vpop.permute.xlu1 %1457 }
 0x317   :  { %v1395_v28 = vmul.f32 0.5, %v1820_v21 }
 0x318   :  { %v1396_v37 = vadd.f32 0.5, %v1394_v0 }
 0x319   :  { %v1397_v58 = vadd.f32 0.5, %v1395_v28 }
 0x31a   :  { %v1398_v5 = vmul.f32 %v1396_v37, %v1388_v14 }
 0x31b   :  { %v1399_v33 = vmul.f32 %v1397_v58, %v1389_v15 }
 0x31c   :  { %v1467_v22 = vrot.slane %v1398_v5, %v2098_v34  ;;  %v1472_v57 = vrot.slane %v1398_v5, %v2915_v47  ;;  %v1478_v6 = vrot.slane %v1398_v5, %v2916_v16  ;;  %v1484_v36 = vrot.slane %v1398_v5, %v2917_v39 }
 0x31d   :  { %v1490_v1 = vrot.slane %v1398_v5, %v2176_v49  ;;  %v1496_v7 = vrot.slane %v1398_v5, %v2179_v50  ;;  %v1502_v25 = vrot.slane %v1398_v5, %v2182_v52  ;;  %v1508_v44 = vrot.slane %v1398_v5, %v2187_v56 }
 0x31e   :  { %v1473_v31 = vmul.f32 %v1472_v57, %v1406_v54  ;;  %v1468_v29 = vmul.f32 %v1467_v22, %v1402_v27  ;;  %v1479_v13 = vmul.f32 %v1478_v6, %v1410_v10  ;;  %v1485_v9 = vmul.f32 %v1484_v36, %v1414_v2  ;;  %v1438_v54 = vpop.permute.xlu0 %1437 }
 0x31f   :  { %v1491_v60 = vmul.f32 %v1490_v1, %v1418_v23  ;;  %v1497_v17 = vmul.f32 %v1496_v7, %v1422_v12  ;;  %v1514_v63 = vrot.slane %v1399_v33, %v2098_v34  ;;  %v1503_v62 = vmul.f32 %v1502_v25, %v1426_v24 }
 0x320   :  { %v1474_v51 = vadd.f32 %v1473_v31, %v1468_v29  ;;  %v1509_v30 = vmul.f32 %v1508_v44, %v1430_v18  ;;  %v1520_v26 = vrot.slane %v1399_v33, %v2915_v47  ;;  %v1526_v8 = vrot.slane %v1399_v33, %v2916_v16 }
 0x321   :  { %v1515_v38 = vmul.f32 %v1514_v63, %v1434_v3  ;;  %v1532_v32 = vrot.slane %v1399_v33, %v2917_v39  ;;  %v1538_v34 = vrot.slane %v1399_v33, %v2176_v49  ;;  %v1544_v11 = vrot.slane %v1399_v33, %v2179_v50  ;;  %v1561_v49 = vpop.permute.xlu1 %1560 }
 0x322   :  { %v1480_v43 = vadd.f32 %v1479_v13, %v1474_v51  ;;  %v1521_v48 = vmul.f32 %v1520_v26, %v1438_v54  ;;  %v1527_v46 = vmul.f32 %v1526_v8, %v1442_v55  ;;  %v1450_v4 = vpop.permute.xlu0 %1449  ;;  %v1550_v12 = vrot.slane %v1399_v33, %v2182_v52 }
 0x323   :  { %v1533_v14 = vmul.f32 %v1532_v32, %v1446_v42  ;;  %v1539_v41 = vmul.f32 %v1538_v34, %v1450_v4  ;;  %v1545_v0 = vmul.f32 %v1544_v11, %v1454_v19  ;;  %v1556_v37 = vrot.slane %v1399_v33, %v2187_v56 }
 0x324   :  { %v1486_v40 = vadd.f32 %v1485_v9, %v1480_v43  ;;  %v1551_v5 = vmul.f32 %v1550_v12, %v1458_v61 }
 0x326   :  { %v1492_v35 = vadd.f32 %v1491_v60, %v1486_v40  ;;  %v1462_v21 = vpop.permute.xlu0 %1461 }
 0x327   :  { %v1557_v22 = vmul.f32 %v1556_v37, %v1462_v21 }
 0x328   :  { %v1498_v20 = vadd.f32 %v1497_v17, %v1492_v35 }
 0x32a   :  { %v1504_v45 = vadd.f32 %v1503_v62, %v1498_v20 }
 0x32c   :  { %v1510_v59 = vadd.f32 %v1509_v30, %v1504_v45 }
 0x32e   :  { %v1516_v53 = vadd.f32 %v1515_v38, %v1510_v59 }
 0x330   :  { %v1522_v10 = vadd.f32 %v1521_v48, %v1516_v53 }
 0x332   :  { %v1528_v15 = vadd.f32 %v1527_v46, %v1522_v10 }
 0x334   :  { %v1534_v23 = vadd.f32 %v1533_v14, %v1528_v15 }
 0x336   :  { %v1540_v18 = vadd.f32 %v1539_v41, %v1534_v23 }
 0x338   :  { %v1546_v27 = vadd.f32 %v1545_v0, %v1540_v18 }
 0x33a   :  { %v1552_v28 = vadd.f32 %v1551_v5, %v1546_v27 }
 0x33c   :  { %v1558_v47 = vadd.f32 %v1557_v22, %v1552_v28 }
 0x33e   :  { %v1563_v50 = vadd.f32 %v1561_v49, %v1558_v47 }
 0x340   :  { %1565 = vst.msk [vmem:[#allocation5] sm:$0x7] %vm1564_vm1, %v1563_v50 }
 0x341   :  { %1856 = shalt.err (!%p1853_p12)
}
 0x342   :  { %s1857_s30 = scalar_lea.hbm %s2747_s4, 64 }
 0x343   :  { %p1858_p13 = scmp.ne.s32.totalorder %s2747_s4, %s1857_s30  ;;  %p1861_p0 = scmp.lt.u32.totalorder %s1857_s30, %s2747_s4 }
 0x345   :  { %p1863_p1 = pnand %p1861_p0, %p1858_p13 }
 0x347   :  { %1866 = shalt.err (!%p1863_p1)
}
 0x348   :  { %1575 = dma.vmem_to_hbm [thread:$0]  %s1573_s27, 64, %s2747_s4, [#allocation4]  }
 0x349   :  { %1869 = dma.done.wait [#allocation4], 64  }
 0x34a   :  { %1870 = vsyncadd [#allocation4], 4294967232 }
 0x34b   :  { %1579 = vsyncpa [#allocation3], 1 }
 0x34c   :  { %1580 = vsyncpa [#allocation4], 1 }

</bundles_post_ra>
